<compile_context>
chip_gen: v5e
topology: v5e:2x2
jax: 0.10.0
libtpu: 0.0.40
codegen_flags: <defaults>
</compile_context>

<pallas_src>
import functools

import jax
import jax.numpy as jnp
from jax.experimental import pallas as pl
from jax.experimental.pallas import tpu as pltpu

IMAGE_SIZE = 16                       # demo size; original module uses 500
D = IMAGE_SIZE * IMAGE_SIZE           # flattened image features

LANE = 128
SUBLANE = 8

_ENC_DIMS = [D, 256, 128, 64, 10, 3]
_DEC_DIMS = [3, 10, 64, 128, 256, D]
# Encoder: ReLU after every Linear except the last (Linear(10,3) has no activation).
# Decoder: ReLU after every Linear except the last, which is followed by Sigmoid.
_ENC_ACTS = ["relu", "relu", "relu", "relu", "none"]
_DEC_ACTS = ["relu", "relu", "relu", "relu", "sigmoid"]
_ALL_ACTS = tuple(_ENC_ACTS + _DEC_ACTS)


def _round_up(x, m):
    return (x + m - 1) // m * m


def _apply_act_kernel(y, act):
    """Activation used inside Pallas kernels (EUP-friendly sigmoid)."""
    if act == "relu":
        return jnp.maximum(y, 0.0)
    if act == "sigmoid":
        # exp and reciprocal both land on the EUP slot; clamp guards the approx
        # reciprocal so the output respects the [0, 1] sigmoid range exactly.
        s = pl.reciprocal(1.0 + jnp.exp(-y), approx=True)
        return jnp.clip(s, 0.0, 1.0)
    return y


def _apply_act_ref(y, act):
    """Activation used by the pure-JAX reference."""
    if act == "relu":
        return jnp.maximum(y, 0.0)
    if act == "sigmoid":
        return jax.nn.sigmoid(y)
    return y


# ------------------------ Fused whole-network kernel ------------------------
def _fused_mlp_kernel(*refs, acts):
    """refs = (x_ref, w0, b0, w1, b1, ..., w9, b9, o_ref).

    x_ref is a (tile_b, d_in_p) bf16 batch tile; weights/biases are whole-array
    VMEM blocks (constant index_map -> fetched once, resident across batch tiles).
    Intermediate activations stay as SSA values in VMEM/vregs.
    """
    x_ref = refs[0]
    o_ref = refs[-1]
    p_refs = refs[1:-1]

    h = x_ref[...]                                        # bf16 (tile_b, d_in_p)
    for i, act in enumerate(acts):
        w = p_refs[2 * i][...]                            # bf16 (f_in_p, f_out_p)
        b = p_refs[2 * i + 1][...]                        # f32  (1, f_out_p)
        y = jnp.dot(h.astype(jnp.bfloat16), w,
                    preferred_element_type=jnp.float32)   # MXU, f32 accumulate
        y = y + b
        h = _apply_act_kernel(y, act)
    o_ref[...] = h.astype(o_ref.dtype)


def fused_autoencoder(packed_params, x, *, tile_b=128):
    """Run the full encoder+decoder as a single pallas_call with a batch grid.

    packed_params: list of (w_bf16 (f_in_p, f_out_p), b_f32 (1, f_out_p)),
    already zero-padded to 128-lane widths.  x: (B, D) float32 (cast to bf16 here).
    tile_b: batch tile (128 works everywhere; 256 is a good choice on v6e/v7x).
    """
    B, d_in = x.shape
    d_in_p = packed_params[0][0].shape[0]
    d_out = _DEC_DIMS[-1]
    d_out_p = packed_params[-1][0].shape[1]

    tile_b = min(tile_b, _round_up(B, SUBLANE))
    B_p = _round_up(B, tile_b)

    # Stream activations as bf16 (kernel casts to bf16 for every dot anyway).
    x_p = jnp.zeros((B_p, d_in_p), jnp.bfloat16).at[:B, :d_in].set(
        x.astype(jnp.bfloat16))

    flat = []
    param_specs = []
    for w, b in packed_params:
        flat.append(w)
        flat.append(b)
        # Whole-array blocks, constant index_map -> no re-DMA across batch tiles.
        param_specs.append(pl.BlockSpec(w.shape, lambda bi: (0, 0)))
        param_specs.append(pl.BlockSpec(b.shape, lambda bi: (0, 0)))

    flops = 2 * B_p * sum(int(w.shape[0]) * int(w.shape[1]) for w, _ in packed_params)
    bytes_accessed = (
        x_p.size * 2
        + sum(int(w.size) * 2 + int(b.size) * 4 for w, b in packed_params)
        + B_p * d_out_p * 4
    )
    transcendentals = B_p * d_out_p  # final sigmoid (exp + reciprocal)

    kernel = functools.partial(_fused_mlp_kernel, acts=_ALL_ACTS)
    out = pl.pallas_call(
        kernel,
        out_shape=jax.ShapeDtypeStruct((B_p, d_out_p), jnp.float32),
        grid_spec=pltpu.PrefetchScalarGridSpec(
            num_scalar_prefetch=0,
            grid=(B_p // tile_b,),
            in_specs=[pl.BlockSpec((tile_b, d_in_p), lambda bi: (bi, 0))]
                     + param_specs,
            out_specs=pl.BlockSpec((tile_b, d_out_p), lambda bi: (bi, 0)),
        ),
        compiler_params=pltpu.CompilerParams(
            dimension_semantics=("parallel",)),
        cost_estimate=pl.CostEstimate(
            flops=flops,
            transcendentals=transcendentals,
            bytes_accessed=bytes_accessed,
        ),
    )(x_p, *flat)
    return out[:B, :d_out]


@functools.partial(jax.jit, static_argnames=("tile_b",))
def deep_autoencoder_forward(packed_params, x, *, tile_b=128):
    return fused_autoencoder(packed_params, x, tile_b=tile_b)


# -------------- Tiled fallback for layers too large for one block -----------
def _tiled_linear_kernel(x_ref, w_ref, b_ref, o_ref, acc_ref, *, activation):
    k = pl.program_id(2)

    @pl.when(k == 0)
    def _():
        acc_ref[...] = jnp.zeros_like(acc_ref)

    # Operands pinned to bf16 so the MXU runs at its native rate.
    acc_ref[...] += jnp.dot(x_ref[...].astype(jnp.bfloat16),
                            w_ref[...].astype(jnp.bfloat16),
                            preferred_element_type=jnp.float32)

    @pl.when(k == pl.num_programs(2) - 1)
    def _():
        y = acc_ref[...] + b_ref[...]
        o_ref[...] = _apply_act_kernel(y, activation).astype(o_ref.dtype)


def tiled_linear_act(x, w, b, activation="none", *, tb=256, tk=2048, tn=256,
                     vmem_limit_bytes=48 * 1024 * 1024):
    """Batch/K/N-tiled, auto-pipelined Linear+activation for weights that exceed VMEM.

    x: (B, K) bf16, w: (K, N) bf16, b: (1, N) f32.  Tiles are clamped to the array
    extents; remaining extents must divide evenly (pad the caller-side shapes).
    Grid = (B//tb [parallel], N//tn [parallel], K//tk [arbitrary, last]); f32 VMEM
    accumulator with pl.when init/finalize.  Defaults: tn=256 matches the v6e/v7x
    MXU width; tk=2048 keeps per-step overhead negligible; 48 MiB VMEM budget fits
    under v7x's 64 MiB physical VMEM with double-buffered tiles.
    """
    assert x.dtype == jnp.bfloat16, "x must be bf16 (native MXU rate, half DMA)"
    assert w.dtype == jnp.bfloat16, "w must be bf16"
    B, K = x.shape
    N = w.shape[1]
    tb = min(tb, B)
    tk = min(tk, K)
    tn = min(tn, N)
    assert B % tb == 0 and tb % SUBLANE == 0, (B, tb)
    assert K % tk == 0 and tk % LANE == 0, (K, tk)
    assert N % tn == 0 and tn % LANE == 0, (N, tn)

    grid = (B // tb, N // tn, K // tk)
    kernel = functools.partial(_tiled_linear_kernel, activation=activation)
    flops = 2 * B * K * N
    bytes_accessed = (int(x.size) * 2 + int(w.size) * 2 + int(b.size) * 4
                      + B * N * 4)
    transcendentals = B * N if activation == "sigmoid" else 0
    return pl.pallas_call(
        kernel,
        out_shape=jax.ShapeDtypeStruct((B, N), jnp.float32),
        grid_spec=pltpu.PrefetchScalarGridSpec(
            num_scalar_prefetch=0,
            grid=grid,
            in_specs=[
                pl.BlockSpec((tb, tk), lambda bi, n, k: (bi, k)),
                pl.BlockSpec((tk, tn), lambda bi, n, k: (k, n)),
                pl.BlockSpec((1, tn), lambda bi, n, k: (0, n)),
            ],
            out_specs=pl.BlockSpec((tb, tn), lambda bi, n, k: (bi, n)),
            scratch_shapes=[pltpu.VMEM((tb, tn), jnp.float32)],
        ),
        compiler_params=pltpu.CompilerParams(
            dimension_semantics=("parallel", "parallel", "arbitrary"),
            vmem_limit_bytes=vmem_limit_bytes),
        cost_estimate=pl.CostEstimate(
            flops=flops,
            transcendentals=transcendentals,
            bytes_accessed=bytes_accessed,
        ),
    )(x, w, b)


# ------------------------- Parameter construction ---------------------------
def _init_linear(key, fan_in, fan_out):
    """Matches PyTorch nn.Linear default init: U(-1/sqrt(fan_in), +1/sqrt(fan_in))."""
    kw, kb = jax.random.split(key)
    bound = 1.0 / float(fan_in) ** 0.5
    w = jax.random.uniform(kw, (fan_in, fan_out), jnp.float32, -bound, bound)
    b = jax.random.uniform(kb, (fan_out,), jnp.float32, -bound, bound)
    return w, b


def init_params(key):
    """List of (w (f_in, f_out), b (f_out,)) in encoder-then-decoder order.
    Weights are stored (f_in, f_out): y = x @ W + b (nn.Linear weight transposed)."""
    layer_dims = (list(zip(_ENC_DIMS[:-1], _ENC_DIMS[1:]))
                  + list(zip(_DEC_DIMS[:-1], _DEC_DIMS[1:])))
    layers = []
    for fan_in, fan_out in layer_dims:
        key, sub = jax.random.split(key)
        layers.append(_init_linear(sub, fan_in, fan_out))
    return layers


def pack_params(layers):
    """Zero-pad every layer to 128-lane widths, cast W to bf16, pre-shape b (1, f_out_p)."""
    packed = []
    for w, b in layers:
        f_in, f_out = w.shape
        f_in_p = _round_up(f_in, LANE)
        f_out_p = _round_up(f_out, LANE)
        w_p = jnp.zeros((f_in_p, f_out_p), jnp.float32).at[:f_in, :f_out].set(w)
        b_p = jnp.zeros((1, f_out_p), jnp.float32).at[0, :f_out].set(b)
        packed.append((w_p.astype(jnp.bfloat16), b_p))
    return packed


# --------------------------- Pure-JAX reference ------------------------------
def reference_forward(layers, x):
    h = x
    for (w, b), act in zip(layers, _ALL_ACTS):
        y = jnp.dot(h.astype(jnp.bfloat16), w.astype(jnp.bfloat16),
                    preferred_element_type=jnp.float32) + b
        h = _apply_act_ref(y, act)
    return h


# --------------------------------- Main --------------------------------------
if __name__ == "__main__":
    key = jax.random.PRNGKey(0)
    pkey, xkey = jax.random.split(key)

    layers = init_params(pkey)
    packed = pack_params(layers)

    batch = 256  # grid of 2 batch tiles with tile_b=128 (exercises the parallel axis)
    x = jax.random.uniform(xkey, (batch, D), jnp.float32)  # flattened images (B, D)

    # Fused single-kernel forward.
    out = deep_autoencoder_forward(packed, x, tile_b=128)
    out = jax.block_until_ready(out)

    assert out.shape == (batch, D), out.shape
    assert bool(jnp.all((out >= 0.0) & (out <= 1.0))), "sigmoid range violated"

    ref = jax.block_until_ready(reference_forward(layers, x))
    assert float(jnp.max(jnp.abs(out - ref))) < 1e-2, "fused kernel mismatch vs reference"

    # Validate the tiled fallback path (used for the imageSize=500 first/last layers)
    # at a small shape: first encoder layer (256 -> 256 padded), bf16 operands.
    w0, b0 = packed[0]
    x_bf = jnp.zeros((batch, w0.shape[0]), jnp.bfloat16).at[:, :D].set(
        x.astype(jnp.bfloat16))
    y_tiled = jax.block_until_ready(
        tiled_linear_act(x_bf, w0, b0, activation="relu"))
    y_ref = jnp.maximum(
        jnp.dot(x_bf, w0, preferred_element_type=jnp.float32) + b0, 0.0)
    assert float(jnp.max(jnp.abs(y_tiled - y_ref))) < 1e-3, "tiled linear mismatch"

    print("KERNEL_OK")
</pallas_src>

<mosaic_0001>
module attributes {stable_mosaic.version = 11 : i64} {
  func.func @_fused_mlp_kernel(%arg0: i32, %arg1: memref<128x256xbf16, #tpu.memory_space<vmem>>, %arg2: memref<256x256xbf16, #tpu.memory_space<vmem>>, %arg3: memref<1x256xf32, #tpu.memory_space<vmem>>, %arg4: memref<256x128xbf16, #tpu.memory_space<vmem>>, %arg5: memref<1x128xf32, #tpu.memory_space<vmem>>, %arg6: memref<128x128xbf16, #tpu.memory_space<vmem>>, %arg7: memref<1x128xf32, #tpu.memory_space<vmem>>, %arg8: memref<128x128xbf16, #tpu.memory_space<vmem>>, %arg9: memref<1x128xf32, #tpu.memory_space<vmem>>, %arg10: memref<128x128xbf16, #tpu.memory_space<vmem>>, %arg11: memref<1x128xf32, #tpu.memory_space<vmem>>, %arg12: memref<128x128xbf16, #tpu.memory_space<vmem>>, %arg13: memref<1x128xf32, #tpu.memory_space<vmem>>, %arg14: memref<128x128xbf16, #tpu.memory_space<vmem>>, %arg15: memref<1x128xf32, #tpu.memory_space<vmem>>, %arg16: memref<128x128xbf16, #tpu.memory_space<vmem>>, %arg17: memref<1x128xf32, #tpu.memory_space<vmem>>, %arg18: memref<128x256xbf16, #tpu.memory_space<vmem>>, %arg19: memref<1x256xf32, #tpu.memory_space<vmem>>, %arg20: memref<256x256xbf16, #tpu.memory_space<vmem>>, %arg21: memref<1x256xf32, #tpu.memory_space<vmem>>, %arg22: memref<128x256xf32, #tpu.memory_space<vmem>>) attributes {dimension_semantics = [#tpu.dimension_semantics<parallel>], iteration_bounds = array<i64: 2>, scalar_prefetch = 0 : i64, scratch_operands = 0 : i64, tpu.core_type = #tpu.core_type<tc>, window_params = [{transform_indices = @transform_0, window_bounds = array<i64: 128, 256>}, {pipeline_mode = #tpu.pipeline_mode<synchronous>, transform_indices = @transform_1, window_bounds = array<i64: 256, 256>}, {pipeline_mode = #tpu.pipeline_mode<synchronous>, transform_indices = @transform_2, window_bounds = array<i64: 1, 256>}, {pipeline_mode = #tpu.pipeline_mode<synchronous>, transform_indices = @transform_3, window_bounds = array<i64: 256, 128>}, {pipeline_mode = #tpu.pipeline_mode<synchronous>, transform_indices = @transform_4, window_bounds = array<i64: 1, 128>}, {pipeline_mode = #tpu.pipeline_mode<synchronous>, transform_indices = @transform_5, window_bounds = array<i64: 128, 128>}, {pipeline_mode = #tpu.pipeline_mode<synchronous>, transform_indices = @transform_6, window_bounds = array<i64: 1, 128>}, {pipeline_mode = #tpu.pipeline_mode<synchronous>, transform_indices = @transform_7, window_bounds = array<i64: 128, 128>}, {pipeline_mode = #tpu.pipeline_mode<synchronous>, transform_indices = @transform_8, window_bounds = array<i64: 1, 128>}, {pipeline_mode = #tpu.pipeline_mode<synchronous>, transform_indices = @transform_9, window_bounds = array<i64: 128, 128>}, {pipeline_mode = #tpu.pipeline_mode<synchronous>, transform_indices = @transform_10, window_bounds = array<i64: 1, 128>}, {pipeline_mode = #tpu.pipeline_mode<synchronous>, transform_indices = @transform_11, window_bounds = array<i64: 128, 128>}, {pipeline_mode = #tpu.pipeline_mode<synchronous>, transform_indices = @transform_12, window_bounds = array<i64: 1, 128>}, {pipeline_mode = #tpu.pipeline_mode<synchronous>, transform_indices = @transform_13, window_bounds = array<i64: 128, 128>}, {pipeline_mode = #tpu.pipeline_mode<synchronous>, transform_indices = @transform_14, window_bounds = array<i64: 1, 128>}, {pipeline_mode = #tpu.pipeline_mode<synchronous>, transform_indices = @transform_15, window_bounds = array<i64: 128, 128>}, {pipeline_mode = #tpu.pipeline_mode<synchronous>, transform_indices = @transform_16, window_bounds = array<i64: 1, 128>}, {pipeline_mode = #tpu.pipeline_mode<synchronous>, transform_indices = @transform_17, window_bounds = array<i64: 128, 256>}, {pipeline_mode = #tpu.pipeline_mode<synchronous>, transform_indices = @transform_18, window_bounds = array<i64: 1, 256>}, {pipeline_mode = #tpu.pipeline_mode<synchronous>, transform_indices = @transform_19, window_bounds = array<i64: 256, 256>}, {pipeline_mode = #tpu.pipeline_mode<synchronous>, transform_indices = @transform_20, window_bounds = array<i64: 1, 256>}, {transform_indices = @transform_21, window_bounds = array<i64: 128, 256>}]} {
    %c0 = arith.constant 0 : index
    %c0_0 = arith.constant 0 : index
    %0 = vector.load %arg1[%c0, %c0_0] : memref<128x256xbf16, #tpu.memory_space<vmem>>, vector<128x256xbf16>
    %c0_1 = arith.constant 0 : index
    %c0_2 = arith.constant 0 : index
    %1 = vector.load %arg2[%c0_1, %c0_2] : memref<256x256xbf16, #tpu.memory_space<vmem>>, vector<256x256xbf16>
    %c0_3 = arith.constant 0 : index
    %c0_4 = arith.constant 0 : index
    %2 = vector.load %arg3[%c0_3, %c0_4] : memref<1x256xf32, #tpu.memory_space<vmem>>, vector<1x256xf32>
    %cst = arith.constant dense<0.000000e+00> : vector<128x256xf32>
    %3 = tpu.matmul %0, %1, %cst {dimension_numbers = #tpu.dot_dimension_numbers<[1], [0], [0], [1], [0, 0, 1, 1], [], []>} : vector<128x256xbf16>, vector<256x256xbf16>, vector<128x256xf32> -> vector<128x256xf32>
    %4 = vector.broadcast %2 : vector<1x256xf32> to vector<128x256xf32>
    %5 = arith.addf %3, %4 : vector<128x256xf32>
    %cst_5 = arith.constant 0.000000e+00 : f32
    %6 = vector.broadcast %cst_5 : f32 to vector<128x256xf32>
    %7 = arith.maximumf %5, %6 : vector<128x256xf32>
    %c0_6 = arith.constant 0 : index
    %c0_7 = arith.constant 0 : index
    %8 = vector.load %arg4[%c0_6, %c0_7] : memref<256x128xbf16, #tpu.memory_space<vmem>>, vector<256x128xbf16>
    %c0_8 = arith.constant 0 : index
    %c0_9 = arith.constant 0 : index
    %9 = vector.load %arg5[%c0_8, %c0_9] : memref<1x128xf32, #tpu.memory_space<vmem>>, vector<1x128xf32>
    %10 = arith.truncf %7 : vector<128x256xf32> to vector<128x256xbf16>
    %cst_10 = arith.constant dense<0.000000e+00> : vector<128x128xf32>
    %11 = tpu.matmul %10, %8, %cst_10 {dimension_numbers = #tpu.dot_dimension_numbers<[1], [0], [0], [1], [0, 0, 1, 1], [], []>} : vector<128x256xbf16>, vector<256x128xbf16>, vector<128x128xf32> -> vector<128x128xf32>
    %12 = vector.broadcast %9 : vector<1x128xf32> to vector<128x128xf32>
    %13 = arith.addf %11, %12 : vector<128x128xf32>
    %cst_11 = arith.constant 0.000000e+00 : f32
    %14 = vector.broadcast %cst_11 : f32 to vector<128x128xf32>
    %15 = arith.maximumf %13, %14 : vector<128x128xf32>
    %c0_12 = arith.constant 0 : index
    %c0_13 = arith.constant 0 : index
    %16 = vector.load %arg6[%c0_12, %c0_13] : memref<128x128xbf16, #tpu.memory_space<vmem>>, vector<128x128xbf16>
    %c0_14 = arith.constant 0 : index
    %c0_15 = arith.constant 0 : index
    %17 = vector.load %arg7[%c0_14, %c0_15] : memref<1x128xf32, #tpu.memory_space<vmem>>, vector<1x128xf32>
    %18 = arith.truncf %15 : vector<128x128xf32> to vector<128x128xbf16>
    %cst_16 = arith.constant dense<0.000000e+00> : vector<128x128xf32>
    %19 = tpu.matmul %18, %16, %cst_16 {dimension_numbers = #tpu.dot_dimension_numbers<[1], [0], [0], [1], [0, 0, 1, 1], [], []>} : vector<128x128xbf16>, vector<128x128xbf16>, vector<128x128xf32> -> vector<128x128xf32>
    %20 = vector.broadcast %17 : vector<1x128xf32> to vector<128x128xf32>
    %21 = arith.addf %19, %20 : vector<128x128xf32>
    %cst_17 = arith.constant 0.000000e+00 : f32
    %22 = vector.broadcast %cst_17 : f32 to vector<128x128xf32>
    %23 = arith.maximumf %21, %22 : vector<128x128xf32>
    %c0_18 = arith.constant 0 : index
    %c0_19 = arith.constant 0 : index
    %24 = vector.load %arg8[%c0_18, %c0_19] : memref<128x128xbf16, #tpu.memory_space<vmem>>, vector<128x128xbf16>
    %c0_20 = arith.constant 0 : index
    %c0_21 = arith.constant 0 : index
    %25 = vector.load %arg9[%c0_20, %c0_21] : memref<1x128xf32, #tpu.memory_space<vmem>>, vector<1x128xf32>
    %26 = arith.truncf %23 : vector<128x128xf32> to vector<128x128xbf16>
    %cst_22 = arith.constant dense<0.000000e+00> : vector<128x128xf32>
    %27 = tpu.matmul %26, %24, %cst_22 {dimension_numbers = #tpu.dot_dimension_numbers<[1], [0], [0], [1], [0, 0, 1, 1], [], []>} : vector<128x128xbf16>, vector<128x128xbf16>, vector<128x128xf32> -> vector<128x128xf32>
    %28 = vector.broadcast %25 : vector<1x128xf32> to vector<128x128xf32>
    %29 = arith.addf %27, %28 : vector<128x128xf32>
    %cst_23 = arith.constant 0.000000e+00 : f32
    %30 = vector.broadcast %cst_23 : f32 to vector<128x128xf32>
    %31 = arith.maximumf %29, %30 : vector<128x128xf32>
    %c0_24 = arith.constant 0 : index
    %c0_25 = arith.constant 0 : index
    %32 = vector.load %arg10[%c0_24, %c0_25] : memref<128x128xbf16, #tpu.memory_space<vmem>>, vector<128x128xbf16>
    %c0_26 = arith.constant 0 : index
    %c0_27 = arith.constant 0 : index
    %33 = vector.load %arg11[%c0_26, %c0_27] : memref<1x128xf32, #tpu.memory_space<vmem>>, vector<1x128xf32>
    %34 = arith.truncf %31 : vector<128x128xf32> to vector<128x128xbf16>
    %cst_28 = arith.constant dense<0.000000e+00> : vector<128x128xf32>
    %35 = tpu.matmul %34, %32, %cst_28 {dimension_numbers = #tpu.dot_dimension_numbers<[1], [0], [0], [1], [0, 0, 1, 1], [], []>} : vector<128x128xbf16>, vector<128x128xbf16>, vector<128x128xf32> -> vector<128x128xf32>
    %36 = vector.broadcast %33 : vector<1x128xf32> to vector<128x128xf32>
    %37 = arith.addf %35, %36 : vector<128x128xf32>
    %c0_29 = arith.constant 0 : index
    %c0_30 = arith.constant 0 : index
    %38 = vector.load %arg12[%c0_29, %c0_30] : memref<128x128xbf16, #tpu.memory_space<vmem>>, vector<128x128xbf16>
    %c0_31 = arith.constant 0 : index
    %c0_32 = arith.constant 0 : index
    %39 = vector.load %arg13[%c0_31, %c0_32] : memref<1x128xf32, #tpu.memory_space<vmem>>, vector<1x128xf32>
    %40 = arith.truncf %37 : vector<128x128xf32> to vector<128x128xbf16>
    %cst_33 = arith.constant dense<0.000000e+00> : vector<128x128xf32>
    %41 = tpu.matmul %40, %38, %cst_33 {dimension_numbers = #tpu.dot_dimension_numbers<[1], [0], [0], [1], [0, 0, 1, 1], [], []>} : vector<128x128xbf16>, vector<128x128xbf16>, vector<128x128xf32> -> vector<128x128xf32>
    %42 = vector.broadcast %39 : vector<1x128xf32> to vector<128x128xf32>
    %43 = arith.addf %41, %42 : vector<128x128xf32>
    %cst_34 = arith.constant 0.000000e+00 : f32
    %44 = vector.broadcast %cst_34 : f32 to vector<128x128xf32>
    %45 = arith.maximumf %43, %44 : vector<128x128xf32>
    %c0_35 = arith.constant 0 : index
    %c0_36 = arith.constant 0 : index
    %46 = vector.load %arg14[%c0_35, %c0_36] : memref<128x128xbf16, #tpu.memory_space<vmem>>, vector<128x128xbf16>
    %c0_37 = arith.constant 0 : index
    %c0_38 = arith.constant 0 : index
    %47 = vector.load %arg15[%c0_37, %c0_38] : memref<1x128xf32, #tpu.memory_space<vmem>>, vector<1x128xf32>
    %48 = arith.truncf %45 : vector<128x128xf32> to vector<128x128xbf16>
    %cst_39 = arith.constant dense<0.000000e+00> : vector<128x128xf32>
    %49 = tpu.matmul %48, %46, %cst_39 {dimension_numbers = #tpu.dot_dimension_numbers<[1], [0], [0], [1], [0, 0, 1, 1], [], []>} : vector<128x128xbf16>, vector<128x128xbf16>, vector<128x128xf32> -> vector<128x128xf32>
    %50 = vector.broadcast %47 : vector<1x128xf32> to vector<128x128xf32>
    %51 = arith.addf %49, %50 : vector<128x128xf32>
    %cst_40 = arith.constant 0.000000e+00 : f32
    %52 = vector.broadcast %cst_40 : f32 to vector<128x128xf32>
    %53 = arith.maximumf %51, %52 : vector<128x128xf32>
    %c0_41 = arith.constant 0 : index
    %c0_42 = arith.constant 0 : index
    %54 = vector.load %arg16[%c0_41, %c0_42] : memref<128x128xbf16, #tpu.memory_space<vmem>>, vector<128x128xbf16>
    %c0_43 = arith.constant 0 : index
    %c0_44 = arith.constant 0 : index
    %55 = vector.load %arg17[%c0_43, %c0_44] : memref<1x128xf32, #tpu.memory_space<vmem>>, vector<1x128xf32>
    %56 = arith.truncf %53 : vector<128x128xf32> to vector<128x128xbf16>
    %cst_45 = arith.constant dense<0.000000e+00> : vector<128x128xf32>
    %57 = tpu.matmul %56, %54, %cst_45 {dimension_numbers = #tpu.dot_dimension_numbers<[1], [0], [0], [1], [0, 0, 1, 1], [], []>} : vector<128x128xbf16>, vector<128x128xbf16>, vector<128x128xf32> -> vector<128x128xf32>
    %58 = vector.broadcast %55 : vector<1x128xf32> to vector<128x128xf32>
    %59 = arith.addf %57, %58 : vector<128x128xf32>
    %cst_46 = arith.constant 0.000000e+00 : f32
    %60 = vector.broadcast %cst_46 : f32 to vector<128x128xf32>
    %61 = arith.maximumf %59, %60 : vector<128x128xf32>
    %c0_47 = arith.constant 0 : index
    %c0_48 = arith.constant 0 : index
    %62 = vector.load %arg18[%c0_47, %c0_48] : memref<128x256xbf16, #tpu.memory_space<vmem>>, vector<128x256xbf16>
    %c0_49 = arith.constant 0 : index
    %c0_50 = arith.constant 0 : index
    %63 = vector.load %arg19[%c0_49, %c0_50] : memref<1x256xf32, #tpu.memory_space<vmem>>, vector<1x256xf32>
    %64 = arith.truncf %61 : vector<128x128xf32> to vector<128x128xbf16>
    %cst_51 = arith.constant dense<0.000000e+00> : vector<128x256xf32>
    %65 = tpu.matmul %64, %62, %cst_51 {dimension_numbers = #tpu.dot_dimension_numbers<[1], [0], [0], [1], [0, 0, 1, 1], [], []>} : vector<128x128xbf16>, vector<128x256xbf16>, vector<128x256xf32> -> vector<128x256xf32>
    %66 = vector.broadcast %63 : vector<1x256xf32> to vector<128x256xf32>
    %67 = arith.addf %65, %66 : vector<128x256xf32>
    %cst_52 = arith.constant 0.000000e+00 : f32
    %68 = vector.broadcast %cst_52 : f32 to vector<128x256xf32>
    %69 = arith.maximumf %67, %68 : vector<128x256xf32>
    %c0_53 = arith.constant 0 : index
    %c0_54 = arith.constant 0 : index
    %70 = vector.load %arg20[%c0_53, %c0_54] : memref<256x256xbf16, #tpu.memory_space<vmem>>, vector<256x256xbf16>
    %c0_55 = arith.constant 0 : index
    %c0_56 = arith.constant 0 : index
    %71 = vector.load %arg21[%c0_55, %c0_56] : memref<1x256xf32, #tpu.memory_space<vmem>>, vector<1x256xf32>
    %72 = arith.truncf %69 : vector<128x256xf32> to vector<128x256xbf16>
    %cst_57 = arith.constant dense<0.000000e+00> : vector<128x256xf32>
    %73 = tpu.matmul %72, %70, %cst_57 {dimension_numbers = #tpu.dot_dimension_numbers<[1], [0], [0], [1], [0, 0, 1, 1], [], []>} : vector<128x256xbf16>, vector<256x256xbf16>, vector<128x256xf32> -> vector<128x256xf32>
    %74 = vector.broadcast %71 : vector<1x256xf32> to vector<128x256xf32>
    %75 = arith.addf %73, %74 : vector<128x256xf32>
    %cst_58 = arith.constant 0.000000e+00 : f32
    %76 = vector.broadcast %cst_58 : f32 to vector<128x256xf32>
    %77 = arith.subf %76, %75 : vector<128x256xf32>
    %78 = math.exp %77 : vector<128x256xf32>
    %cst_59 = arith.constant 1.000000e+00 : f32
    %79 = vector.broadcast %cst_59 : f32 to vector<128x256xf32>
    %80 = arith.addf %79, %78 : vector<128x256xf32>
    %81 = tpu.reciprocal %80 {approx = true} : vector<128x256xf32> -> vector<128x256xf32>
    %cst_60 = arith.constant 0.000000e+00 : f32
    %cst_61 = arith.constant 1.000000e+00 : f32
    %82 = vector.broadcast %cst_60 : f32 to vector<128x256xf32>
    %83 = arith.maximumf %82, %81 : vector<128x256xf32>
    %84 = vector.broadcast %cst_61 : f32 to vector<128x256xf32>
    %85 = arith.minimumf %84, %83 : vector<128x256xf32>
    %c0_62 = arith.constant 0 : index
    %c0_63 = arith.constant 0 : index
    %86 = vector.load %arg22[%c0_62, %c0_63] : memref<128x256xf32, #tpu.memory_space<vmem>>, vector<128x256xf32>
    tpu.vector_store %arg22[%c0_62, %c0_63], %85 {strides = array<i32>} : memref<128x256xf32, #tpu.memory_space<vmem>>, vector<128x256xf32>,
    return
  }
  func.func @transform_0(%arg0: i32) -> (i32, i32) {
    %c0_i32 = arith.constant 0 : i32
    %c0_i32_0 = arith.constant 0 : i32
    return %arg0, %c0_i32 : i32, i32
  }
  func.func @transform_1(%arg0: i32) -> (i32, i32) {
    %c0_i32 = arith.constant 0 : i32
    %c0_i32_0 = arith.constant 0 : i32
    %c0_i32_1 = arith.constant 0 : i32
    return %c0_i32, %c0_i32_0 : i32, i32
  }
  func.func @transform_2(%arg0: i32) -> (i32, i32) {
    %c0_i32 = arith.constant 0 : i32
    %c0_i32_0 = arith.constant 0 : i32
    %c0_i32_1 = arith.constant 0 : i32
    return %c0_i32, %c0_i32_0 : i32, i32
  }
  func.func @transform_3(%arg0: i32) -> (i32, i32) {
    %c0_i32 = arith.constant 0 : i32
    %c0_i32_0 = arith.constant 0 : i32
    %c0_i32_1 = arith.constant 0 : i32
    return %c0_i32, %c0_i32_0 : i32, i32
  }
  func.func @transform_4(%arg0: i32) -> (i32, i32) {
    %c0_i32 = arith.constant 0 : i32
    %c0_i32_0 = arith.constant 0 : i32
    %c0_i32_1 = arith.constant 0 : i32
    return %c0_i32, %c0_i32_0 : i32, i32
  }
  func.func @transform_5(%arg0: i32) -> (i32, i32) {
    %c0_i32 = arith.constant 0 : i32
    %c0_i32_0 = arith.constant 0 : i32
    %c0_i32_1 = arith.constant 0 : i32
    return %c0_i32, %c0_i32_0 : i32, i32
  }
  func.func @transform_6(%arg0: i32) -> (i32, i32) {
    %c0_i32 = arith.constant 0 : i32
    %c0_i32_0 = arith.constant 0 : i32
    %c0_i32_1 = arith.constant 0 : i32
    return %c0_i32, %c0_i32_0 : i32, i32
  }
  func.func @transform_7(%arg0: i32) -> (i32, i32) {
    %c0_i32 = arith.constant 0 : i32
    %c0_i32_0 = arith.constant 0 : i32
    %c0_i32_1 = arith.constant 0 : i32
    return %c0_i32, %c0_i32_0 : i32, i32
  }
  func.func @transform_8(%arg0: i32) -> (i32, i32) {
    %c0_i32 = arith.constant 0 : i32
    %c0_i32_0 = arith.constant 0 : i32
    %c0_i32_1 = arith.constant 0 : i32
    return %c0_i32, %c0_i32_0 : i32, i32
  }
  func.func @transform_9(%arg0: i32) -> (i32, i32) {
    %c0_i32 = arith.constant 0 : i32
    %c0_i32_0 = arith.constant 0 : i32
    %c0_i32_1 = arith.constant 0 : i32
    return %c0_i32, %c0_i32_0 : i32, i32
  }
  func.func @transform_10(%arg0: i32) -> (i32, i32) {
    %c0_i32 = arith.constant 0 : i32
    %c0_i32_0 = arith.constant 0 : i32
    %c0_i32_1 = arith.constant 0 : i32
    return %c0_i32, %c0_i32_0 : i32, i32
  }
  func.func @transform_11(%arg0: i32) -> (i32, i32) {
    %c0_i32 = arith.constant 0 : i32
    %c0_i32_0 = arith.constant 0 : i32
    %c0_i32_1 = arith.constant 0 : i32
    return %c0_i32, %c0_i32_0 : i32, i32
  }
  func.func @transform_12(%arg0: i32) -> (i32, i32) {
    %c0_i32 = arith.constant 0 : i32
    %c0_i32_0 = arith.constant 0 : i32
    %c0_i32_1 = arith.constant 0 : i32
    return %c0_i32, %c0_i32_0 : i32, i32
  }
  func.func @transform_13(%arg0: i32) -> (i32, i32) {
    %c0_i32 = arith.constant 0 : i32
    %c0_i32_0 = arith.constant 0 : i32
    %c0_i32_1 = arith.constant 0 : i32
    return %c0_i32, %c0_i32_0 : i32, i32
  }
  func.func @transform_14(%arg0: i32) -> (i32, i32) {
    %c0_i32 = arith.constant 0 : i32
    %c0_i32_0 = arith.constant 0 : i32
    %c0_i32_1 = arith.constant 0 : i32
    return %c0_i32, %c0_i32_0 : i32, i32
  }
  func.func @transform_15(%arg0: i32) -> (i32, i32) {
    %c0_i32 = arith.constant 0 : i32
    %c0_i32_0 = arith.constant 0 : i32
    %c0_i32_1 = arith.constant 0 : i32
    return %c0_i32, %c0_i32_0 : i32, i32
  }
  func.func @transform_16(%arg0: i32) -> (i32, i32) {
    %c0_i32 = arith.constant 0 : i32
    %c0_i32_0 = arith.constant 0 : i32
    %c0_i32_1 = arith.constant 0 : i32
    return %c0_i32, %c0_i32_0 : i32, i32
  }
  func.func @transform_17(%arg0: i32) -> (i32, i32) {
    %c0_i32 = arith.constant 0 : i32
    %c0_i32_0 = arith.constant 0 : i32
    %c0_i32_1 = arith.constant 0 : i32
    return %c0_i32, %c0_i32_0 : i32, i32
  }
  func.func @transform_18(%arg0: i32) -> (i32, i32) {
    %c0_i32 = arith.constant 0 : i32
    %c0_i32_0 = arith.constant 0 : i32
    %c0_i32_1 = arith.constant 0 : i32
    return %c0_i32, %c0_i32_0 : i32, i32
  }
  func.func @transform_19(%arg0: i32) -> (i32, i32) {
    %c0_i32 = arith.constant 0 : i32
    %c0_i32_0 = arith.constant 0 : i32
    %c0_i32_1 = arith.constant 0 : i32
    return %c0_i32, %c0_i32_0 : i32, i32
  }
  func.func @transform_20(%arg0: i32) -> (i32, i32) {
    %c0_i32 = arith.constant 0 : i32
    %c0_i32_0 = arith.constant 0 : i32
    %c0_i32_1 = arith.constant 0 : i32
    return %c0_i32, %c0_i32_0 : i32, i32
  }
  func.func @transform_21(%arg0: i32) -> (i32, i32) {
    %c0_i32 = arith.constant 0 : i32
    %c0_i32_0 = arith.constant 0 : i32
    return %arg0, %c0_i32 : i32, i32
  }
}

</mosaic_0001>

<bundles_post_ra>
// kernel: deep_autoencoder_forward.1
= control target key start
LH: loop header
LB: loop body
LE: loop exit
PB: predicated region body
PF: predicated region fallthrough
CT: control target
= control target key end

     0   :  { %s6244_s0 = inlined_call_operand.vmem [shape: bf16[256,256], index: 0, kind: input, shape index: {}]   ;;  %s6245_s1 = inlined_call_operand.vmem [shape: bf16[256,256], index: 1, kind: input, shape index: {}]   ;;  %s6246_s2 = inlined_call_operand.hbm [shape: f32[1,256], index: 2, kind: input, shape index: {}]   ;;  %s6247_s3 = inlined_call_operand.vmem [shape: bf16[256,128], index: 3, kind: input, shape index: {}]   ;;  %s6248_s4 = inlined_call_operand.hbm [shape: f32[1,128], index: 4, kind: input, shape index: {}]   ;;  %s6249_s5 = inlined_call_operand.hbm [shape: bf16[128,128], index: 5, kind: input, shape index: {}]   ;;  %s6250_s6 = inlined_call_operand.hbm [shape: f32[1,128], index: 6, kind: input, shape index: {}]   ;;  %s6251_s7 = inlined_call_operand.hbm [shape: bf16[128,128], index: 7, kind: input, shape index: {}]   ;;  %s6252_s8 = inlined_call_operand.hbm [shape: f32[1,128], index: 8, kind: input, shape index: {}]   ;;  %s6253_s9 = inlined_call_operand.hbm [shape: bf16[128,128], index: 9, kind: input, shape index: {}]   ;;  %s6254_s10 = inlined_call_operand.vmem [shape: f32[1,128], index: 10, kind: input, shape index: {}]   ;;  %s6255_s11 = inlined_call_operand.hbm [shape: bf16[128,128], index: 11, kind: input, shape index: {}]   ;;  %s6256_s12 = inlined_call_operand.vmem [shape: f32[1,128], index: 12, kind: input, shape index: {}]   ;;  %s6257_s13 = inlined_call_operand.hbm [shape: bf16[128,128], index: 13, kind: input, shape index: {}]   ;;  %s6258_s14 = inlined_call_operand.vmem [shape: f32[1,128], index: 14, kind: input, shape index: {}]   ;;  %s6259_s15 = inlined_call_operand.hbm [shape: bf16[128,128], index: 15, kind: input, shape index: {}]   ;;  %s6260_s16 = inlined_call_operand.vmem [shape: f32[1,128], index: 16, kind: input, shape index: {}]   ;;  %s6261_s17 = inlined_call_operand.vmem [shape: bf16[128,256], index: 17, kind: input, shape index: {}]   ;;  %s6262_s18 = inlined_call_operand.vmem [shape: f32[1,256], index: 18, kind: input, shape index: {}]   ;;  %s6263_s19 = inlined_call_operand.vmem [shape: bf16[256,256], index: 19, kind: input, shape index: {}]   ;;  %s6264_s20 = inlined_call_operand.vmem [shape: f32[1,256], index: 20, kind: input, shape index: {}]   ;;  %s6265_s21 = inlined_call_operand.hbm [shape: f32[256,256], index: 21, kind: output, shape index: {}]  }
   0x1   :  { %6279 = sst [smem:[#allocation35_spill]] %s6244_s0 }
   0x2   :  { %6280 = sst [smem:[#allocation36_spill]] %s6245_s1 }
   0x3   :  { %6281 = sst [smem:[#allocation37_spill]] %s6246_s2 }
   0x4   :  { %6282 = sst [smem:[#allocation38_spill]] %s6247_s3 }
   0x5   :  { %6283 = sst [smem:[#allocation39_spill]] %s6248_s4 }
   0x6   :  { %6284 = sst [smem:[#allocation40_spill]] %s6249_s5 }
   0x7   :  { %6285 = sst [smem:[#allocation41_spill]] %s6250_s6 }
   0x8   :  { %6286 = sst [smem:[#allocation42_spill]] %s6252_s8 }
   0x9   :  { %6287 = sst [smem:[#allocation43_spill]] %s6255_s11 }
   0xa   :  { %6288 = sst [smem:[#allocation44_spill]] %s6265_s21 }
   0xb   :  { %26 = vsyncpa [#allocation3], 0 }
   0xc   :  { %27 = vsyncpa [#allocation6], 0 }
   0xd   :  { %28 = vsyncpa [#allocation9], 0 }
   0xe   :  { %29 = vsyncpa [#allocation12], 0 }
   0xf   :  { %30 = vsyncpa [#allocation15], 0 }
  0x10   :  { %31 = vsyncpa [#allocation18], 0 }
  0x11   :  { %32 = vsyncpa [#allocation4], 0 }
  0x12   :  { %34 = vsyncpa [#allocation4 + $0x1], 0  ;;  %s5160_s2 = smov 0   ;;  %s5162_s25 = smov 0  }
  0x13   :  { %s5164_s26 = smov 0   ;;  %s5166_s27 = smov 0  }
  0x14 LB: > { %6289 = sst [smem:[#allocation27_spill]] %s5022_s2  ;;  %s5181_s3 = sadd.s32 4294967295, %s5034_s27   ;;  %s5034_s27 = sphi %s5166_s27, %s6316_s27   ;;  %s5030_s26 = sphi %s5164_s26, %s6319_s26   ;;  %s5026_s25 = sphi %s5162_s25, %s6318_s25   ;;  %s5022_s2 = sphi %s5160_s2, %s6317_s2  }
  0x15   : > { %6290 = sst [smem:[#allocation28_spill]] %s5026_s25  ;;  %s3516_s28 = sadd.s32 4294967294, %s5034_s27  }
  0x16   : > { %6291 = sst [smem:[#allocation29_spill]] %s5030_s26  ;;  %s5185_s29 = sadd.s32 1, %s5034_s27  }
  0x17   : > { %6292 = sst [smem:[#allocation30_spill]] %s5034_s27  ;;  %s493_s0 = sadd.s32 1, %s5030_s26 }
  0x18   : > { %6293 = sst [smem:[#allocation31_spill]] %s5185_s29  ;;  %s490_s4 = ssub.s32 %s5034_s27, %s5185_s29 }
  0x19   : > { %p503_p0 = scmp.ne.s32.totalorder %s5030_s26, %s5026_s25  ;;  %p491_p1 = scmp.eq.s32.totalorder %s490_s4, 0 }
  0x1a   : > { %p504_p2 = scmp.eq.s32.totalorder %s5181_s3, 1  ;;  %p509_p3 = scmp.ne.s32.totalorder %s5026_s25, %s5022_s2 }
  0x1b   : > { %p510_p4 = scmp.eq.s32.totalorder %s3516_s28, 1  ;;  %p3517_p7 = scmp.ge.s32.totalorder %s5034_s27, 1 }
  0x1c   : > { %s5196_s30 = scalar_select %p491_p1, %s5030_s26, %s493_s0  }
  0x1d   : > { %p5198_p5 = por %p504_p2, %p503_p0  ;;  %p5202_p6 = por %p510_p4, %p509_p3 }
  0x1e   : > { %6294 = sst [smem:[#allocation32_spill]] %s5196_s30  ;;  %p517_p8 = scmp.lt.s32.totalorder %s5034_s27, 3 }
  0x1f   : > { %s6295_s5 = scalar_select %p5198_p5, 1, 0 }
  0x20   : > { %s6297_s22 = scalar_select %p5202_p6, 1, 0 }
  0x21   : > { %6296 = sst [smem:[#allocation33_spill]] %s6295_s5  ;;  %p4446_p9 = scmp.eq.s32.totalorder %s5181_s3, 0 }
  0x22   : > { %6298 = sst [smem:[#allocation34_spill]] %s6297_s22  ;;  %p5209_p10 = pnand %p3517_p7, %p517_p8 }
  0x23   : > { %s6300_s28 = sld [smem:[#allocation39_spill]]  ;;  %s5036_s4 = smov [#allocation5]  }
  0x24   : > { %p4411_p11 = pneg %p5209_p10  ;;  %s549_s30 = sshll.u32 %s5036_s4, 4  ;;  %s550_s30 = int_to_ptr.vmem [resolvable:$true] %s549_s30 }
  0x25   : > { %s6301_s6 = sld [smem:[#allocation41_spill]]  ;;  %s5037_s27 = smov [#allocation8]  }
  0x26   : > { %p5223_p12 = pnand %p4446_p9, %p4411_p11  ;;  %s6303_s8 = sld [smem:[#allocation42_spill]] }
  0x27   : > { %s575_s4 = sshll.u32 %s5037_s27, 4  ;;  %s5038_s26 = smov [#allocation11]   ;;  %s576_s4 = int_to_ptr.vmem [resolvable:$true] %s575_s4 }
  0x28   : > { %s601_s29 = sshll.u32 %s5038_s26, 4  ;;  %s6304_s11 = sld [smem:[#allocation43_spill]]  ;;  %s602_s29 = int_to_ptr.vmem [resolvable:$true] %s601_s29 }
  0x29   : > { %s547_s0 = sshll.u32 %s6300_s28, 4  ;;  %s5039_s1 = smov [#allocation14]   ;;  %s548_s0 = int_to_ptr.hbm [resolvable:$true] %s547_s0 }
  0x2a   : > { %4417 = dma.hbm_to_vmem [thread:$0]  (!%p5223_p12), %s548_s0, 16, %s550_s30, [#allocation6]  }
  0x2b   : > { %s573_s22 = sshll.u32 %s6301_s6, 4  ;;  %s629_s27 = sshll.u32 %s5039_s1, 4  ;;  %s574_s22 = int_to_ptr.hbm [resolvable:$true] %s573_s22  ;;  %s630_s27 = int_to_ptr.vmem [resolvable:$true] %s629_s27 }
  0x2c   : > { %s599_s28 = sshll.u32 %s6303_s8, 4  ;;  %s6305_s0 = sld [smem:[#allocation37_spill]]  ;;  %s600_s28 = int_to_ptr.hbm [resolvable:$true] %s599_s28 }
  0x2d   : > { %4423 = dma.hbm_to_vmem [thread:$0]  (!%p5223_p12), %s574_s22, 16, %s576_s4, [#allocation9]  }
  0x2e   : > { %s627_s21 = sshll.u32 %s6304_s11, 4  ;;  %s5040_s22 = smov 64   ;;  %s628_s21 = int_to_ptr.hbm [resolvable:$true] %s627_s21 }
  0x2f   : > { %4429 = dma.hbm_to_vmem [thread:$0]  (!%p5223_p12), %s600_s28, 16, %s602_s29, [#allocation12]  }
  0x30   : > { %s5041_s4 = smov 4   ;;  %s6306_s28 = sld [smem:[#allocation40_spill]] }
  0x31   : > { %4435 = dma.hbm_to_vmem [thread:$0]  (!%p5223_p12), %s628_s21, 1024, %s630_s27, [#allocation15], %s5040_s22, %s5040_s22, %s5041_s4  }
  0x32   : > { %s532_s8 = sshll.u32 %s6305_s0, 4  ;;  %s5042_s29 = smov [#allocation2]   ;;  %s533_s8 = int_to_ptr.hbm [resolvable:$true] %s532_s8 }
  0x33   : > { %s534_s1 = sshll.u32 %s5042_s29, 4  ;;  %s5043_s24 = smov [#allocation7]   ;;  %s535_s1 = int_to_ptr.vmem [resolvable:$true] %s534_s1 }
  0x34   : > { %4414 = dma.hbm_to_vmem [thread:$0]  (!%p5223_p12), %s533_s8, 32, %s535_s1, [#allocation3]  }
  0x35   : > { %s560_s30 = sshll.u32 %s5043_s24, 4  ;;  %s584_s25 = sshll.u32 %s6251_s7, 4  ;;  %s561_s30 = int_to_ptr.vmem [resolvable:$true] %s560_s30  ;;  %s585_s25 = int_to_ptr.hbm [resolvable:$true] %s584_s25 }
  0x36   : > { %s558_s26 = sshll.u32 %s6306_s28, 4  ;;  %s610_s6 = sshll.u32 %s6253_s9, 4  ;;  %s559_s26 = int_to_ptr.hbm [resolvable:$true] %s558_s26  ;;  %s611_s6 = int_to_ptr.hbm [resolvable:$true] %s610_s6 }
  0x37   : > { %4420 = dma.hbm_to_vmem [thread:$0]  (!%p5223_p12), %s559_s26, 1024, %s561_s30, [#allocation6], %s5040_s22, %s5040_s22, %s5041_s4  }
  0x38   : > { %s5044_s5 = smov [#allocation10]   ;;  %s5045_s11 = smov [#allocation13]  }
  0x39   : > { %s586_s8 = sshll.u32 %s5044_s5, 4  ;;  %s612_s28 = sshll.u32 %s5045_s11, 4  ;;  %s587_s8 = int_to_ptr.vmem [resolvable:$true] %s586_s8  ;;  %s613_s28 = int_to_ptr.vmem [resolvable:$true] %s612_s28 }
  0x3a   : > { %4426 = dma.hbm_to_vmem [thread:$0]  (!%p5223_p12), %s585_s25, 1024, %s587_s8, [#allocation9], %s5040_s22, %s5040_s22, %s5041_s4  }
  0x3b   : > { %s644_s26 = sshll.u32 %s6257_s13, 4  ;;  %s661_s0 = sshll.u32 %s6259_s15, 4  ;;  %s645_s26 = int_to_ptr.hbm [resolvable:$true] %s644_s26  ;;  %s662_s0 = int_to_ptr.hbm [resolvable:$true] %s661_s0 }
  0x3c   : > { %4432 = dma.hbm_to_vmem [thread:$0]  (!%p5223_p12), %s611_s6, 1024, %s613_s28, [#allocation12], %s5040_s22, %s5040_s22, %s5041_s4  }
  0x3d   : > { %s5046_s21 = smov [#allocation16]   ;;  %s5047_s27 = smov [#allocation17]  }
  0x3e   : > { %s646_s25 = sshll.u32 %s5046_s21, 4  ;;  %s663_s5 = sshll.u32 %s5047_s27, 4  ;;  %s647_s25 = int_to_ptr.vmem [resolvable:$true] %s646_s25  ;;  %s664_s5 = int_to_ptr.vmem [resolvable:$true] %s663_s5 }
  0x3f   : > { %4438 = dma.hbm_to_vmem [thread:$0]  (!%p5223_p12), %s645_s26, 1024, %s647_s25, [#allocation15], %s5040_s22, %s5040_s22, %s5041_s4  }
  0x40   : > { %4441 = dma.hbm_to_vmem [thread:$0]  (!%p5223_p12), %s662_s0, 1024, %s664_s5, [#allocation18], %s5040_s22, %s5040_s22, %s5041_s4  }
  0x41   : > { %704 = sbr.rel (%p5209_p10) target bundleno = 1759 (0x6df), region = 104 }
  0x46   : > { %4993 = dma.done.wait (%p4446_p9), [#allocation3], 32  }
  0x47   : > { %4995 = vsyncadd (%p4446_p9), [#allocation3], 4294967264 }
  0x48   : > { %4997 = dma.done.wait (%p4446_p9), [#allocation6], 1040  }
  0x49   : > { %4999 = vsyncadd (%p4446_p9), [#allocation6], 4294966256 }
  0x4a   : > { %5001 = dma.done.wait (%p4446_p9), [#allocation9], 1040  }
  0x4b   : > { %5003 = vsyncadd (%p4446_p9), [#allocation9], 4294966256 }
  0x4c   : > { %5005 = dma.done.wait (%p4446_p9), [#allocation12], 1040  }
  0x4d   : > { %5007 = vsyncadd (%p4446_p9), [#allocation12], 4294966256 }
  0x4e   : > { %5009 = dma.done.wait (%p4446_p9), [#allocation15], 2048  }
  0x4f   : > { %5011 = vsyncadd (%p4446_p9), [#allocation15], 4294965248 }
  0x50   : > { %5013 = dma.done.wait (%p4446_p9), [#allocation18], 1024  }
  0x51   : > { %5015 = vsyncadd (%p4446_p9), [#allocation18], 4294966272  ;;  %s6307_s22 = sld [smem:[#allocation36_spill]]  ;;  %s3541_s30 = sshll.u32 %s5181_s3, 4 }
  0x52   : > { %p812_p13 = scmp.lt.s32.totalorder %s3541_s30, 31  ;;  %s6308_s25 = sld [smem:[#allocation35_spill]] }
  0x53   : > { %s6309_s11 = sld [smem:[#allocation38_spill]] }
  0x54   : > { %s6321_s30 = smov (!%p812_p13, %s3541_s30), 31  ;;  %s6310_s2 = sld [smem:[#allocation28_spill]] }
  0x55   : > { %s4190_s5 = sshll.u32 %s6321_s30, 3  ;;  %s6311_s28 = sld [smem:[#allocation44_spill]] }
  0x57   : > { %v3666_v0 = vld [vmem:[%s6307_s22 + $0x70] sm:$0xf]  ;;  %v4222_v1 = vld [vmem:[%s6307_s22 + $0x74] sm:$0xf0]  ;;  %v3658_v5 = vld [vmem:[%s6307_s22 + $0x60] sm:$0xf] }
  0x58   : > { %v3730_v2 = vld [vmem:[%s6307_s22 + $0xf0] sm:$0xf]  ;;  %v3667_v3 = vor.u32 %v4222_v1, %v3666_v0  ;;  %v4238_v4 = vld [vmem:[%s6307_s22 + $0xf4] sm:$0xf0]  ;;  %v4220_v6 = vld [vmem:[%s6307_s22 + $0x64] sm:$0xf0]  ;;  %s5409_s27 = scalar_lea.vmem %s6308_s25, %s4190_s5 }
  0x59   : > { %v3731_v7 = vor.u32 %v4238_v4, %v3730_v2  ;;  %v3722_v8 = vld [vmem:[%s6307_s22 + $0xe0] sm:$0xf]  ;;  %v4236_v9 = vld [vmem:[%s6307_s22 + $0xe4] sm:$0xf0]  ;;  %v3659_v10 = vor.u32 %v4220_v6, %v3658_v5  ;;  %v3650_v12 = vld [vmem:[%s6307_s22 + $0x50] sm:$0xf] }
  0x5a   : > { %1113 = vmatpush.bf16.msra.mxu0 %v3667_v3  ;;  %4353 = vmatpush.bf16.msra.mxu2 %v3667_v3  ;;  %v3723_v11 = vor.u32 %v4236_v9, %v3722_v8  ;;  %v4218_v13 = vld [vmem:[%s6307_s22 + $0x54] sm:$0xf0]  ;;  %v3714_v14 = vld [vmem:[%s6307_s22 + $0xd0] sm:$0xf]  ;;  %v3642_v18 = vld [vmem:[%s6307_s22 + $0x40] sm:$0xf] }
  0x5b   : > { %4361 = vmatpush.bf16.msra.mxu3 %v3731_v7  ;;  %1162 = vmatpush.bf16.msra.mxu1 %v3731_v7  ;;  %v4234_v15 = vld [vmem:[%s6307_s22 + $0xd4] sm:$0xf0]  ;;  %v3651_v16 = vor.u32 %v4218_v13, %v3650_v12  ;;  %v4216_v19 = vld [vmem:[%s6307_s22 + $0x44] sm:$0xf0]  ;;  %v3706_v20 = vld [vmem:[%s6307_s22 + $0xc0] sm:$0xf] }
  0x5c   : > { %v3715_v17 = vor.u32 %v4234_v15, %v3714_v14  ;;  %v4232_v21 = vld [vmem:[%s6307_s22 + $0xc4] sm:$0xf0]  ;;  %v3643_v22 = vor.u32 %v4216_v19, %v3642_v18  ;;  %v3634_v24 = vld [vmem:[%s6307_s22 + $0x30] sm:$0xf]  ;;  %v4214_v25 = vld [vmem:[%s6307_s22 + $0x34] sm:$0xf0] }
  0x5d   : > { %v3707_v23 = vor.u32 %v4232_v21, %v3706_v20  ;;  %v3698_v26 = vld [vmem:[%s6307_s22 + $0xb0] sm:$0xf]  ;;  %v4230_v27 = vld [vmem:[%s6307_s22 + $0xb4] sm:$0xf0]  ;;  %v3635_v28 = vor.u32 %v4214_v25, %v3634_v24  ;;  %v3626_v30 = vld [vmem:[%s6307_s22 + $0x20] sm:$0xf] }
  0x5e   : > { %1114 = vmatpush.bf16.msra.mxu0 %v3659_v10  ;;  %4354 = vmatpush.bf16.msra.mxu2 %v3659_v10  ;;  %v3699_v29 = vor.u32 %v4230_v27, %v3698_v26  ;;  %v4212_v31 = vld [vmem:[%s6307_s22 + $0x24] sm:$0xf0]  ;;  %v3690_v32 = vld [vmem:[%s6307_s22 + $0xa0] sm:$0xf]  ;;  %v3618_v36 = vld [vmem:[%s6307_s22 + $0x10] sm:$0xf] }
  0x5f   : > { %4362 = vmatpush.bf16.msra.mxu3 %v3723_v11  ;;  %1163 = vmatpush.bf16.msra.mxu1 %v3723_v11  ;;  %v4228_v33 = vld [vmem:[%s6307_s22 + $0xa4] sm:$0xf0]  ;;  %v3627_v34 = vor.u32 %v4212_v31, %v3626_v30  ;;  %v4210_v37 = vld [vmem:[%s6307_s22 + $0x14] sm:$0xf0]  ;;  %v3682_v38 = vld [vmem:[%s6307_s22 + $0x90] sm:$0xf] }
  0x60   : > { %v3691_v35 = vor.u32 %v4228_v33, %v3690_v32  ;;  %v4226_v39 = vld [vmem:[%s6307_s22 + $0x94] sm:$0xf0]  ;;  %v3610_v40 = vld [vmem:[%s6307_s22] sm:$0xf]  ;;  %v4208_v41 = vld [vmem:[%s6307_s22 + $0x4] sm:$0xf0]  ;;  %v3619_v42 = vor.u32 %v4210_v37, %v3618_v36 }
  0x61   : > { %v3683_v43 = vor.u32 %v4226_v39, %v3682_v38  ;;  %v3674_v44 = vld [vmem:[%s6307_s22 + $0x80] sm:$0xf]  ;;  %v4224_v45 = vld [vmem:[%s6307_s22 + $0x84] sm:$0xf0]  ;;  %v4221_v48 = vld [vmem:[%s6307_s22 + $0x74] sm:$0xf]  ;;  %v3611_v52 = vor.u32 %v4208_v41, %v3610_v40 }
  0x62   : > { %1115 = vmatpush.bf16.msra.mxu0 %v3651_v16  ;;  %4355 = vmatpush.bf16.msra.mxu2 %v3651_v16  ;;  %v3546_v46 = vld [vmem:[%s5409_s27] sm:$0xf]  ;;  %v4192_v47 = vld [vmem:[%s5409_s27 + $0x4] sm:$0xf0]  ;;  %v3668_v49 = vld [vmem:[%s6307_s22 + $0x78] sm:$0xf0]  ;;  %v3675_v56 = vor.u32 %v4224_v45, %v3674_v44 }
  0x63   : > { %4363 = vmatpush.bf16.msra.mxu3 %v3715_v17  ;;  %1164 = vmatpush.bf16.msra.mxu1 %v3715_v17  ;;  %v4237_v50 = vld [vmem:[%s6307_s22 + $0xf4] sm:$0xf]  ;;  %v3732_v51 = vld [vmem:[%s6307_s22 + $0xf8] sm:$0xf0]  ;;  %v3578_v53 = vld [vmem:[%s5409_s27 + $0x40] sm:$0xf]  ;;  %v3671_v60 = vor.u32 %v4221_v48, %v3668_v49  ;;  %v5440_v63 = vor.u32 %v4192_v47, %v3546_v46 }
  0x64   : > { %v4200_v54 = vld [vmem:[%s5409_s27 + $0x44] sm:$0xf0]  ;;  %v4199_v55 = vld [vmem:[%s5409_s27 + $0x44] sm:$0xf]  ;;  %v3580_v57 = vld [vmem:[%s5409_s27 + $0x48] sm:$0xf0]  ;;  %v3735_v61 = vor.u32 %v4237_v50, %v3732_v51 }
  0x65   : > { %v4191_v58 = vld [vmem:[%s5409_s27 + $0x4] sm:$0xf]  ;;  %v3548_v59 = vld [vmem:[%s5409_s27 + $0x8] sm:$0xf0]  ;;  %v5442_v0 = vor.u32 %v4200_v54, %v3578_v53  ;;  %v5453_v4 = vor.u32 %v4199_v55, %v3580_v57  ;;  %v4217_v8 = vld [vmem:[%s6307_s22 + $0x54] sm:$0xf] }
  0x66   : > { %1116 = vmatpush.bf16.msra.mxu0 %v3643_v22  ;;  %4356 = vmatpush.bf16.msra.mxu2 %v3643_v22  ;;  %v4219_v62 = vld [vmem:[%s6307_s22 + $0x64] sm:$0xf]  ;;  %v3660_v1 = vld [vmem:[%s6307_s22 + $0x68] sm:$0xf0]  ;;  %v5455_v5 = vor.u32 %v4191_v58, %v3548_v59  ;;  %v3652_v9 = vld [vmem:[%s6307_s22 + $0x58] sm:$0xf0] }
  0x67   : > { %4364 = vmatpush.bf16.msra.mxu3 %v3707_v23  ;;  %1165 = vmatpush.bf16.msra.mxu1 %v3707_v23  ;;  %v4235_v2 = vld [vmem:[%s6307_s22 + $0xe4] sm:$0xf]  ;;  %v3724_v3 = vld [vmem:[%s6307_s22 + $0xe8] sm:$0xf0]  ;;  %v3663_v6 = vor.u32 %v4219_v62, %v3660_v1  ;;  %v4233_v10 = vld [vmem:[%s6307_s22 + $0xd4] sm:$0xf]  ;;  %v3655_v12 = vor.u32 %v4217_v8, %v3652_v9 }
  0x68   : > { %v3727_v7 = vor.u32 %v4235_v2, %v3724_v3  ;;  %v3716_v11 = vld [vmem:[%s6307_s22 + $0xd8] sm:$0xf0]  ;;  %v4215_v14 = vld [vmem:[%s6307_s22 + $0x44] sm:$0xf]  ;;  %v3644_v15 = vld [vmem:[%s6307_s22 + $0x48] sm:$0xf0] }
  0x69   : > { %v3719_v13 = vor.u32 %v4233_v10, %v3716_v11  ;;  %v4231_v16 = vld [vmem:[%s6307_s22 + $0xc4] sm:$0xf]  ;;  %v3708_v17 = vld [vmem:[%s6307_s22 + $0xc8] sm:$0xf0]  ;;  %v3554_v18 = vld [vmem:[%s5409_s27 + $0x10] sm:$0xf]  ;;  %v3647_v20 = vor.u32 %v4215_v14, %v3644_v15 }
  0x6a   : > { %1117 = vmatpush.bf16.msra.mxu0 %v3635_v28  ;;  %4357 = vmatpush.bf16.msra.mxu2 %v3635_v28  ;;  %v4194_v19 = vld [vmem:[%s5409_s27 + $0x14] sm:$0xf0]  ;;  %v3711_v21 = vor.u32 %v4231_v16, %v3708_v17  ;;  %v4213_v22 = vld [vmem:[%s6307_s22 + $0x34] sm:$0xf]  ;;  %v3636_v23 = vld [vmem:[%s6307_s22 + $0x38] sm:$0xf0] }
  0x6b   : > { %4365 = vmatpush.bf16.msra.mxu3 %v3699_v29  ;;  %1166 = vmatpush.bf16.msra.mxu1 %v3699_v29  ;;  %v4229_v24 = vld [vmem:[%s6307_s22 + $0xb4] sm:$0xf]  ;;  %v3700_v25 = vld [vmem:[%s6307_s22 + $0xb8] sm:$0xf0]  ;;  %v3586_v26 = vld [vmem:[%s5409_s27 + $0x50] sm:$0xf]  ;;  %v3639_v32 = vor.u32 %v4213_v22, %v3636_v23 }
  0x6c   : > { %v4202_v27 = vld [vmem:[%s5409_s27 + $0x54] sm:$0xf0]  ;;  %v4201_v28 = vld [vmem:[%s5409_s27 + $0x54] sm:$0xf]  ;;  %v3588_v29 = vld [vmem:[%s5409_s27 + $0x58] sm:$0xf0]  ;;  %v3703_v33 = vor.u32 %v4229_v24, %v3700_v25 }
  0x6d   : > { %v4193_v30 = vld [vmem:[%s5409_s27 + $0x14] sm:$0xf]  ;;  %v3556_v31 = vld [vmem:[%s5409_s27 + $0x18] sm:$0xf0]  ;;  %v5510_v36 = vor.u32 %v4202_v27, %v3586_v26  ;;  %v3628_v37 = vld [vmem:[%s6307_s22 + $0x28] sm:$0xf0]  ;;  %v5521_v40 = vor.u32 %v4201_v28, %v3588_v29 }
  0x6e   : > { %1118 = vmatpush.bf16.msra.mxu0 %v3627_v34  ;;  %4358 = vmatpush.bf16.msra.mxu2 %v3627_v34  ;;  %v4211_v34 = vld [vmem:[%s6307_s22 + $0x24] sm:$0xf]  ;;  %v3692_v39 = vld [vmem:[%s6307_s22 + $0xa8] sm:$0xf0]  ;;  %v5523_v41 = vor.u32 %v4193_v30, %v3556_v31  ;;  %v4209_v44 = vld [vmem:[%s6307_s22 + $0x14] sm:$0xf] }
  0x6f   : > { %4366 = vmatpush.bf16.msra.mxu3 %v3691_v35  ;;  %1167 = vmatpush.bf16.msra.mxu1 %v3691_v35  ;;  %v5508_v35 = vor.u32 %v4194_v19, %v3554_v18  ;;  %v4227_v38 = vld [vmem:[%s6307_s22 + $0xa4] sm:$0xf]  ;;  %v3620_v45 = vld [vmem:[%s6307_s22 + $0x18] sm:$0xf0]  ;;  %v4225_v46 = vld [vmem:[%s6307_s22 + $0x94] sm:$0xf] }
  0x70   : > { %v3684_v47 = vld [vmem:[%s6307_s22 + $0x98] sm:$0xf0]  ;;  %v3623_v48 = vor.u32 %v4209_v44, %v3620_v45  ;;  %v4207_v50 = vld [vmem:[%s6307_s22 + $0x4] sm:$0xf]  ;;  %v3612_v51 = vld [vmem:[%s6307_s22 + $0x8] sm:$0xf0] }
  0x71   : > { %v3687_v49 = vor.u32 %v4225_v46, %v3684_v47  ;;  %v3676_v53 = vld [vmem:[%s6307_s22 + $0x88] sm:$0xf0]  ;;  %v3615_v54 = vor.u32 %v4207_v50, %v3612_v51  ;;  %v4196_v57 = vld [vmem:[%s5409_s27 + $0x24] sm:$0xf0]  ;;  %v3594_v58 = vld [vmem:[%s5409_s27 + $0x60] sm:$0xf] }
  0x72   : > { %1119 = vmatpush.bf16.msra.mxu0 %v3619_v42  ;;  %4359 = vmatpush.bf16.msra.mxu2 %v3619_v42  ;;  %v3631_v42 = vor.u32 %v4211_v34, %v3628_v37  ;;  %v4204_v59 = vld [vmem:[%s5409_s27 + $0x64] sm:$0xf0]  ;;  %v4195_v62 = vld [vmem:[%s5409_s27 + $0x24] sm:$0xf]  ;;  %v3564_v1 = vld [vmem:[%s5409_s27 + $0x28] sm:$0xf0] }
  0x73   : > { %4367 = vmatpush.bf16.msra.mxu3 %v3683_v43  ;;  %1168 = vmatpush.bf16.msra.mxu1 %v3683_v43  ;;  %v3695_v43 = vor.u32 %v4227_v38, %v3692_v39  ;;  %v5561_v3 = vor.u32 %v4204_v59, %v3594_v58  ;;  %v3570_v8 = vld [vmem:[%s5409_s27 + $0x30] sm:$0xf]  ;;  %v4198_v9 = vld [vmem:[%s5409_s27 + $0x34] sm:$0xf0]  ;;  %v4197_v14 = vld [vmem:[%s5409_s27 + $0x34] sm:$0xf] }
  0x74   : > { %v3602_v10 = vld [vmem:[%s5409_s27 + $0x70] sm:$0xf]  ;;  %v4206_v11 = vld [vmem:[%s5409_s27 + $0x74] sm:$0xf0]  ;;  %v3572_v15 = vld [vmem:[%s5409_s27 + $0x38] sm:$0xf0]  ;;  %v3571_v16 = vor.u32 %v4198_v9, %v3570_v8 }
  0x75   : > { %v5575_v17 = vor.u32 %v4206_v11, %v3602_v10  ;;  %v3575_v19 = vor.u32 %v4197_v14, %v3572_v15  ;;  %v4242_v22 = vld [vmem:[%s6309_s11 + $0x18] sm:$0xff]  ;;  %v4241_v23 = vld [vmem:[%s6309_s11 + $0x10] sm:$0xff]  ;;  %v4240_v24 = vld [vmem:[%s6309_s11 + $0x8] sm:$0xff]  ;;  %s808_s23 = sand.u32 1, %s6310_s2   ;;  %s4352_s5 = sshll.u32 %s5181_s3, 8 }
  0x76   : > { %1120 = vmatpush.bf16.msra.mxu0 %v3611_v52  ;;  %4360 = vmatpush.bf16.msra.mxu2 %v3611_v52  ;;  %v4223_v52 = vld [vmem:[%s6307_s22 + $0x84] sm:$0xf]  ;;  %v4254_v26 = vld [vmem:[%s6309_s11 + $0x78] sm:$0xff]  ;;  %v5612_v27 = vld [vmem:[#allocation2] sm:$0x3]  ;;  %s3540_s4 = sshll.u32 %s808_s23, 8  ;;  %s3352_s29 = scalar_lea.hbm %s6311_s28, %s4352_s5 }
  0x77   : > { %4368 = vmatpush.bf16.msra.mxu3 %v3675_v56  ;;  %1169 = vmatpush.bf16.msra.mxu1 %v3675_v56  ;;  %v3679_v55 = vor.u32 %v4223_v52, %v3676_v53  ;;  %v3562_v56 = vld [vmem:[%s5409_s27 + $0x20] sm:$0xf]  ;;  %v5615_v29 = vperm.slane %v5612_v27, 0  ;;  %v4250_v8 = vld [vmem:[%s6309_s11 + $0x58] sm:$0xff]  ;;  %s6151_s6 = scalar_lea.vmem [#allocation19], %s3540_s4  ;;  %s3355_s26 = sshll.u32 %s3352_s29, 4  ;;  %s3356_s26 = int_to_ptr.hbm [resolvable:$true] %s3355_s26 }
  0x78   : > { %v3563_v2 = vor.u32 %v4196_v57, %v3562_v56  ;;  %v4239_v25 = vld [vmem:[%s6309_s11] sm:$0xff]  ;;  %s3353_s1 = sshll.u32 %s6151_s6, 4  ;;  %s3340_s3 = scalar_lea.sflag [#allocation4], %s808_s23  ;;  %s3354_s1 = int_to_ptr.vmem [resolvable:$true] %s3353_s1 }
  0x79   : > { %1121 = vmatmul.bf16.vlgmr.msra.gmra.mxu0 %v5440_v63  ;;  %1141 = vmatmul.bf16.vlgmr.msra.gmra.mxu2 %v5442_v0  ;;  %s4962_s24 = sshra.s32 %s3356_s26, 4  ;;  %s4968_s4 = scalar_lea.hbm %s6311_s28, 512  ;;  %s4963_s24 = int_to_ptr.hbm [resolvable:$true] %s4962_s24 }
  0x7a   : > { %1211 = vmatpush.bf16.msrb.mxu2 %v3671_v60  ;;  %1190 = vmatmul.bf16.vlgmr.msra.gmra.mxu3 %v5453_v4  ;;  %v4203_v60 = vld [vmem:[%s5409_s27 + $0x64] sm:$0xf]  ;;  %s4964_s0 = scalar_lea.hbm %s4963_s24, 256  ;;  %p4969_p3 = scmp.lt.s32.totalorder %s4963_s24, %s6311_s28 }
  0x7b   : > { %1260 = vmatpush.bf16.msrb.mxu3 %v3735_v61  ;;  %1170 = vmatmul.bf16.vlgmr.msra.gmra.mxu1 %v5455_v5  ;;  %v3596_v61 = vld [vmem:[%s5409_s27 + $0x68] sm:$0xf0]  ;;  %p4965_p0 = scmp.ne.s32.totalorder %s4963_s24, %s4964_s0  ;;  %p4970_p4 = scmp.lt.s32.totalorder %s4968_s4, %s4964_s0 }
  0x7c   : > { %1538 = vmatpush.bf16.msrb.mxu1 %v4254_v26 }
  0x7d   : > { %p4966_p1 = pnand %p4965_p0, %p5198_p5  ;;  %p4971_p7 = por %p4970_p4, %p4969_p3 }
  0x7e   : > { %1212 = vmatpush.bf16.msrb.mxu2 %v3663_v6  ;;  %v5563_v6 = vor.u32 %v4203_v60, %v3596_v61 }
  0x7f   : > { %1261 = vmatpush.bf16.msrb.mxu3 %v3727_v7  ;;  %v3567_v7 = vor.u32 %v4195_v62, %v3564_v1  ;;  %p4967_p2 = pneg %p4966_p1 }
  0x81   : > { %p4972_p8 = pnand %p4971_p7, %p4967_p2 }
  0x82   : > { %1213 = vmatpush.bf16.msrb.mxu2 %v3655_v12  ;;  %v4205_v12 = vld [vmem:[%s5409_s27 + $0x74] sm:$0xf] }
  0x83   : > { %1262 = vmatpush.bf16.msrb.mxu3 %v3719_v13  ;;  %v3604_v13 = vld [vmem:[%s5409_s27 + $0x78] sm:$0xf0] }
  0x84   : > { %v5577_v18 = vor.u32 %v4205_v12, %v3604_v13 }
  0x86   : > { %1214 = vmatpush.bf16.msrb.mxu2 %v3647_v20  ;;  %v4246_v20 = vld [vmem:[%s6309_s11 + $0x38] sm:$0xff] }
  0x87   : > { %1263 = vmatpush.bf16.msrb.mxu3 %v3711_v21  ;;  %1489 = vmatpush.bf16.msrb.mxu0 %v4246_v20  ;;  %v4245_v21 = vld [vmem:[%s6309_s11 + $0x30] sm:$0xff] }
  0x89   : > { %1126 = vmatmul.bf16.gmra.mxu0 %v5508_v35  ;;  %1146 = vmatmul.bf16.gmra.mxu2 %v5510_v36 }
  0x8a   : > { %1215 = vmatpush.bf16.msrb.mxu2 %v3639_v32  ;;  %1195 = vmatmul.bf16.gmra.mxu3 %v5521_v40  ;;  %v4253_v32 = vld [vmem:[%s6309_s11 + $0x70] sm:$0xff] }
  0x8b   : > { %1264 = vmatpush.bf16.msrb.mxu3 %v3703_v33  ;;  %1175 = vmatmul.bf16.gmra.mxu1 %v5523_v41 }
  0x8c   : > { %1490 = vmatpush.bf16.msrb.mxu0 %v4245_v21  ;;  %1539 = vmatpush.bf16.msrb.mxu1 %v4253_v32  ;;  %v4249_v21 = vld [vmem:[%s6309_s11 + $0x50] sm:$0xff]  ;;  %v4248_v32 = vld [vmem:[%s6309_s11 + $0x48] sm:$0xff] }
  0x8e   : > { %1216 = vmatpush.bf16.msrb.mxu2 %v3631_v42 }
  0x8f   : > { %1265 = vmatpush.bf16.msrb.mxu3 %v3695_v43 }
  0x92   : > { %1217 = vmatpush.bf16.msrb.mxu2 %v3623_v48 }
  0x93   : > { %1266 = vmatpush.bf16.msrb.mxu3 %v3687_v49 }
  0x96   : > { %1218 = vmatpush.bf16.msrb.mxu2 %v3615_v54 }
  0x97   : > { %1267 = vmatpush.bf16.msrb.mxu3 %v3679_v55  ;;  %v4251_v55 = vld [vmem:[%s6309_s11 + $0x60] sm:$0xff] }
  0x99   : > { %1131 = vmatmul.bf16.gmra.mxu0 %v3563_v2  ;;  %1151 = vmatmul.bf16.gmra.mxu2 %v5561_v3 }
  0x9a   : > { %1200 = vmatmul.bf16.gmra.mxu3 %v5563_v6 }
  0x9b   : > { %1180 = vmatmul.bf16.gmra.mxu1 %v3567_v7 }
  0xa9   : > { %1136 = vmatmul.bf16.gmra.mxu0 %v3571_v16  ;;  %1156 = vmatmul.bf16.gmra.mxu2 %v5575_v17 }
  0xaa   : > { %1205 = vmatmul.bf16.gmra.mxu3 %v5577_v18 }
  0xab   : > { %1185 = vmatmul.bf16.gmra.mxu1 %v3575_v19 }
  0xb9   : > { %1219 = vmatmul.bf16.vlgmr.msrb.gmra.mxu2 %v5440_v63  ;;  %v4244_v63 = vld [vmem:[%s6309_s11 + $0x28] sm:$0xff] }
  0xba   : > { %1268 = vmatmul.bf16.vlgmr.msrb.gmra.mxu3 %v5455_v5  ;;  %1491 = vmatpush.bf16.msrb.mxu0 %v4244_v63  ;;  %v4243_v5 = vld [vmem:[%s6309_s11 + $0x20] sm:$0xff] }
  0xbe   : > { %1492 = vmatpush.bf16.msrb.mxu0 %v4243_v5 }
  0xc2   : > { %1493 = vmatpush.bf16.msrb.mxu0 %v4242_v22 }
  0xc6   : > { %1494 = vmatpush.bf16.msrb.mxu0 %v4241_v23 }
  0xc9   : > { %1224 = vmatmul.bf16.gmra.mxu2 %v5508_v35 }
  0xca   : > { %1273 = vmatmul.bf16.gmra.mxu3 %v5523_v41  ;;  %1495 = vmatpush.bf16.msrb.mxu0 %v4240_v24 }
  0xce   : > { %1496 = vmatpush.bf16.msrb.mxu0 %v4239_v25 }
  0xd9   : > { %1229 = vmatmul.bf16.gmra.mxu2 %v3563_v2 }
  0xda   : > { %1278 = vmatmul.bf16.gmra.mxu3 %v3567_v7 }
  0xe9   : > { %1234 = vmatmul.bf16.gmra.mxu2 %v3571_v16 }
  0xea   : > { %1283 = vmatmul.bf16.gmra.mxu3 %v3575_v19 }
  0xf6   : > { %v1122_v28 = vpop.f32.mrf.mxu0 }
  0xf7   : > { %v1123_v31 = vadd.f32 %v1122_v28, %v5615_v29 }
  0xf8   : > { %v1171_v30 = vpop.f32.mrf.mxu1 }
  0xf9   : > { %1239 = vmatmul.bf16.gmra.mxu2 %v5442_v0  ;;  %v1172_v34 = vadd.f32 %v1171_v30, %v1123_v31  ;;  %v4252_v0 = vld [vmem:[%s6309_s11 + $0x68] sm:$0xff] }
  0xfa   : > { %1288 = vmatmul.bf16.gmra.mxu3 %v5453_v4  ;;  %1540 = vmatpush.bf16.msrb.mxu1 %v4252_v0  ;;  %v4247_v0 = vld [vmem:[%s6309_s11 + $0x40] sm:$0xff] }
  0xfb   : > { %v1309_v43 = vmax.f32 %v1172_v34, 0.0 }
  0xfc   : > { %v1142_v33 = vpop.f32.mrf.mxu2 }
  0xfd   : > { %v1143_v35 = vadd.f32 %v1142_v33, %v5615_v29  ;;  %v1191_v37 = vpop.f32.mrf.mxu3 }
  0xfe   : > { %v1124_v38 = vpop.f32.mrf.mxu0  ;;  %1541 = vmatpush.bf16.msrb.mxu1 %v4251_v55 }
  0xff   : > { %v1192_v39 = vadd.f32 %v1191_v37, %v1143_v35  ;;  %v1125_v41 = vadd.f32 %v1124_v38, %v5615_v29 }
 0x100   : > { %v1173_v42 = vpop.f32.mrf.mxu1 }
 0x101   : > { %v1174_v44 = vadd.f32 %v1173_v42, %v1125_v41  ;;  %v1325_v52 = vmax.f32 %v1192_v39, 0.0 }
 0x102   : > { %1542 = vmatpush.bf16.msrb.mxu1 %v4250_v8 }
 0x103   : > { %v1311_v45 = vmax.f32 %v1174_v44, 0.0 }
 0x104   : > { %v1144_v4 = vpop.f32.mrf.mxu2 }
 0x105   : > { %v1145_v46 = vadd.f32 %v1144_v4, %v5615_v29  ;;  %v1193_v47 = vpop.f32.mrf.mxu3  ;;  %v1374_v48 = vpack.c.bf16 %v1311_v45, %v1309_v43 }
 0x106   : > { %v1127_v49 = vpop.f32.mrf.mxu0  ;;  %1543 = vmatpush.bf16.msrb.mxu1 %v4249_v21 }
 0x107   : > { %v1194_v50 = vadd.f32 %v1193_v47, %v1145_v46  ;;  %1497 = vmatmul.bf16.vlgmr.msrb.gmra.mxu0 %v1374_v48  ;;  %v1128_v54 = vadd.f32 %v1127_v49, %v5615_v29 }
 0x108   : > { %v1176_v51 = vpop.f32.mrf.mxu1 }
 0x109   : > { %v1327_v53 = vmax.f32 %v1194_v50, 0.0  ;;  %1244 = vmatmul.bf16.gmra.mxu2 %v5510_v36  ;;  %v1177_v58 = vadd.f32 %v1176_v51, %v1128_v54 }
 0x10a   : > { %1293 = vmatmul.bf16.gmra.mxu3 %v5521_v40  ;;  %1544 = vmatpush.bf16.msrb.mxu1 %v4248_v32 }
 0x10b   : > { %v5635_v56 = vpack.c.bf16 %v1327_v53, %v1325_v52  ;;  %v1313_v36 = vmax.f32 %v1177_v58, 0.0 }
 0x10c   : > { %v1147_v57 = vpop.f32.mrf.mxu2 }
 0x10d   : > { %v1148_v59 = vadd.f32 %v1147_v57, %v5615_v29  ;;  %v1196_v60 = vpop.f32.mrf.mxu3 }
 0x10e   : > { %v1129_v61 = vpop.f32.mrf.mxu0  ;;  %1545 = vmatpush.bf16.msrb.mxu1 %v4247_v0 }
 0x10f   : > { %v1197_v62 = vadd.f32 %v1196_v60, %v1148_v59  ;;  %v1130_v1 = vadd.f32 %v1129_v61, %v5615_v29 }
 0x110   : > { %v1178_v2 = vpop.f32.mrf.mxu1 }
 0x111   : > { %v1179_v7 = vadd.f32 %v1178_v2, %v1130_v1  ;;  %v1329_v16 = vmax.f32 %v1197_v62, 0.0  ;;  %v4262_v62 = vld [vmem:[#allocation7 + $0x38] sm:$0xff] }
 0x112   : > { %1679 = vmatpush.bf16.msra.mxu2 %v4262_v62 }
 0x113   : > { %v1315_v40 = vmax.f32 %v1179_v7, 0.0 }
 0x114   : > { %v1149_v9 = vpop.f32.mrf.mxu2 }
 0x115   : > { %v1150_v10 = vadd.f32 %v1149_v9, %v5615_v29  ;;  %v1198_v11 = vpop.f32.mrf.mxu3  ;;  %v1376_v12 = vpack.c.bf16 %v1315_v40, %v1313_v36  ;;  %v5667_v36 = vperm.slane %v5612_v27, 1 }
 0x116   : > { %v1132_v13 = vpop.f32.mrf.mxu0 }
 0x117   : > { %v1199_v14 = vadd.f32 %v1198_v11, %v1150_v10  ;;  %1502 = vmatmul.bf16.gmra.mxu0 %v1376_v12  ;;  %v1133_v20 = vadd.f32 %v1132_v13, %v5615_v29 }
 0x118   : > { %v1181_v15 = vpop.f32.mrf.mxu1 }
 0x119   : > { %v1331_v19 = vmax.f32 %v1199_v14, 0.0  ;;  %1249 = vmatmul.bf16.gmra.mxu2 %v5561_v3  ;;  %v1182_v22 = vadd.f32 %v1181_v15, %v1133_v20  ;;  %v4261_v14 = vld [vmem:[#allocation7 + $0x30] sm:$0xff] }
 0x11a   : > { %1298 = vmatmul.bf16.gmra.mxu3 %v5563_v6  ;;  %1680 = vmatpush.bf16.msra.mxu2 %v4261_v14 }
 0x11b   : > { %v5649_v63 = vpack.c.bf16 %v1331_v19, %v1329_v16  ;;  %v1317_v3 = vmax.f32 %v1182_v22, 0.0 }
 0x11c   : > { %v1152_v5 = vpop.f32.mrf.mxu2 }
 0x11d   : > { %v1153_v23 = vadd.f32 %v1152_v5, %v5615_v29  ;;  %v1201_v24 = vpop.f32.mrf.mxu3 }
 0x11e   : > { %v1134_v25 = vpop.f32.mrf.mxu0 }
 0x11f   : > { %v1202_v26 = vadd.f32 %v1201_v24, %v1153_v23  ;;  %v1135_v28 = vadd.f32 %v1134_v25, %v5615_v29  ;;  %v4260_v25 = vld [vmem:[#allocation7 + $0x28] sm:$0xff] }
 0x120   : > { %v1183_v30 = vpop.f32.mrf.mxu1  ;;  %1681 = vmatpush.bf16.msra.mxu2 %v4260_v25 }
 0x121   : > { %v1184_v31 = vadd.f32 %v1183_v30, %v1135_v28  ;;  %v1333_v42 = vmax.f32 %v1202_v26, 0.0 }
 0x123   : > { %v1319_v6 = vmax.f32 %v1184_v31, 0.0 }
 0x124   : > { %v1154_v33 = vpop.f32.mrf.mxu2 }
 0x125   : > { %v1155_v34 = vadd.f32 %v1154_v33, %v5615_v29  ;;  %v1203_v35 = vpop.f32.mrf.mxu3  ;;  %v1378_v37 = vpack.c.bf16 %v1319_v6, %v1317_v3 }
 0x126   : > { %v1137_v38 = vpop.f32.mrf.mxu0 }
 0x127   : > { %v1204_v39 = vadd.f32 %v1203_v35, %v1155_v34  ;;  %1507 = vmatmul.bf16.gmra.mxu0 %v1378_v37  ;;  %v1138_v44 = vadd.f32 %v1137_v38, %v5615_v29 }
 0x128   : > { %v1186_v41 = vpop.f32.mrf.mxu1 }
 0x129   : > { %v1335_v43 = vmax.f32 %v1204_v39, 0.0  ;;  %1254 = vmatmul.bf16.gmra.mxu2 %v5575_v17  ;;  %v1187_v46 = vadd.f32 %v1186_v41, %v1138_v44 }
 0x12a   : > { %1303 = vmatmul.bf16.gmra.mxu3 %v5577_v18 }
 0x12b   : > { %v1386_v45 = vpack.c.bf16 %v1335_v43, %v1333_v42  ;;  %v1321_v53 = vmax.f32 %v1187_v46, 0.0 }
 0x12c   : > { %v1157_v4 = vpop.f32.mrf.mxu2 }
 0x12d   : > { %v1158_v47 = vadd.f32 %v1157_v4, %v5615_v29  ;;  %v1206_v48 = vpop.f32.mrf.mxu3 }
 0x12e   : > { %v1139_v49 = vpop.f32.mrf.mxu0 }
 0x12f   : > { %v1207_v50 = vadd.f32 %v1206_v48, %v1158_v47  ;;  %v1140_v51 = vadd.f32 %v1139_v49, %v5615_v29 }
 0x130   : > { %v1188_v52 = vpop.f32.mrf.mxu1 }
 0x131   : > { %v1189_v17 = vadd.f32 %v1188_v52, %v1140_v51  ;;  %v1337_v60 = vmax.f32 %v1207_v50, 0.0 }
 0x133   : > { %v1323_v54 = vmax.f32 %v1189_v17, 0.0 }
 0x134   : > { %v1159_v55 = vpop.f32.mrf.mxu2 }
 0x135   : > { %v1160_v57 = vadd.f32 %v1159_v55, %v5615_v29  ;;  %v1208_v58 = vpop.f32.mrf.mxu3  ;;  %v1380_v18 = vpack.c.bf16 %v1323_v54, %v1321_v53 }
 0x137   : > { %v1209_v59 = vadd.f32 %v1208_v58, %v1160_v57  ;;  %1512 = vmatmul.bf16.gmra.mxu0 %v1380_v18 }
 0x139   : > { %v1339_v61 = vmax.f32 %v1209_v59, 0.0  ;;  %v4257_v59 = vld [vmem:[#allocation7 + $0x10] sm:$0xff] }
 0x13b   : > { %v1388_v1 = vpack.c.bf16 %v1339_v61, %v1337_v60 }
 0x13c   : > { %v1220_v2 = vpop.f32.mrf.mxu2 }
 0x13d   : > { %v1269_v7 = vpop.f32.mrf.mxu3  ;;  %v1221_v8 = vadd.f32 %v1220_v2, %v5667_v36 }
 0x13f   : > { %v1270_v9 = vadd.f32 %v1269_v7, %v1221_v8 }
 0x141   : > { %v1310_v12 = vmax.f32 %v1270_v9, 0.0 }
 0x144   : > { %v1222_v40 = vpop.f32.mrf.mxu2 }
 0x145   : > { %v1223_v29 = vadd.f32 %v1222_v40, %v5667_v36  ;;  %v1271_v10 = vpop.f32.mrf.mxu3 }
 0x147   : > { %v1272_v11 = vadd.f32 %v1271_v10, %v1223_v29  ;;  %1517 = vmatmul.bf16.gmra.mxu0 %v5635_v56 }
 0x149   : > { %v1312_v13 = vmax.f32 %v1272_v11, 0.0  ;;  %v4256_v11 = vld [vmem:[#allocation7 + $0x8] sm:$0xff] }
 0x14b   : > { %v1375_v15 = vpack.c.bf16 %v1312_v13, %v1310_v12 }
 0x14c   : > { %v1225_v16 = vpop.f32.mrf.mxu2 }
 0x14d   : > { %v1274_v19 = vpop.f32.mrf.mxu3  ;;  %1546 = vmatmul.bf16.vlgmr.msrb.gmra.mxu1 %v1375_v15  ;;  %v1226_v27 = vadd.f32 %v1225_v16, %v5667_v36 }
 0x14f   : > { %v1275_v21 = vadd.f32 %v1274_v19, %v1226_v27 }
 0x151   : > { %v1314_v24 = vmax.f32 %v1275_v21, 0.0  ;;  %v4255_v21 = vld [vmem:[#allocation7] sm:$0xff] }
 0x154   : > { %v1227_v20 = vpop.f32.mrf.mxu2 }
 0x155   : > { %v1228_v5 = vadd.f32 %v1227_v20, %v5667_v36  ;;  %v1276_v22 = vpop.f32.mrf.mxu3 }
 0x157   : > { %v1277_v23 = vadd.f32 %v1276_v22, %v1228_v5  ;;  %1522 = vmatmul.bf16.gmra.mxu0 %v5649_v63  ;;  %v4259_v63 = vld [vmem:[#allocation7 + $0x20] sm:$0xff] }
 0x158   : > { %1682 = vmatpush.bf16.msra.mxu2 %v4259_v63 }
 0x159   : > { %v1316_v56 = vmax.f32 %v1277_v23, 0.0 }
 0x15b   : > { %v1377_v26 = vpack.c.bf16 %v1316_v56, %v1314_v24 }
 0x15c   : > { %v1230_v28 = vpop.f32.mrf.mxu2 }
 0x15d   : > { %v1279_v30 = vpop.f32.mrf.mxu3  ;;  %1551 = vmatmul.bf16.gmra.mxu1 %v1377_v26  ;;  %v1231_v3 = vadd.f32 %v1230_v28, %v5667_v36 }
 0x15f   : > { %v1280_v32 = vadd.f32 %v1279_v30, %v1231_v3 }
 0x161   : > { %v1318_v35 = vmax.f32 %v1280_v32, 0.0 }
 0x164   : > { %v1232_v31 = vpop.f32.mrf.mxu2 }
 0x165   : > { %v1233_v6 = vadd.f32 %v1232_v31, %v5667_v36  ;;  %v1281_v33 = vpop.f32.mrf.mxu3 }
 0x167   : > { %v1282_v34 = vadd.f32 %v1281_v33, %v1233_v6  ;;  %1527 = vmatmul.bf16.gmra.mxu0 %v1386_v45  ;;  %v4258_v45 = vld [vmem:[#allocation7 + $0x18] sm:$0xff] }
 0x168   : > { %1683 = vmatpush.bf16.msra.mxu2 %v4258_v45 }
 0x169   : > { %v1320_v37 = vmax.f32 %v1282_v34, 0.0 }
 0x16b   : > { %v1379_v38 = vpack.c.bf16 %v1320_v37, %v1318_v35 }
 0x16c   : > { %v1235_v39 = vpop.f32.mrf.mxu2  ;;  %1684 = vmatpush.bf16.msra.mxu2 %v4257_v59 }
 0x16d   : > { %v1284_v41 = vpop.f32.mrf.mxu3  ;;  %1556 = vmatmul.bf16.gmra.mxu1 %v1379_v38  ;;  %v1236_v42 = vadd.f32 %v1235_v39, %v5667_v36 }
 0x16f   : > { %v1285_v44 = vadd.f32 %v1284_v41, %v1236_v42  ;;  %v5687_v41 = vld [vmem:[#allocation5] ss:$0 sm:$0xff] }
 0x170   : > { %1685 = vmatpush.bf16.msra.mxu2 %v4256_v11  ;;  %v4270_v42 = vld [vmem:[#allocation10 + $0x38] sm:$0xff] }
 0x171   : > { %v1322_v47 = vmax.f32 %v1285_v44, 0.0  ;;  %1820 = vmatpush.bf16.msra.mxu3 %v4270_v42 }
 0x174   : > { %v1237_v43 = vpop.f32.mrf.mxu2  ;;  %1686 = vmatpush.bf16.msra.mxu2 %v4255_v21 }
 0x175   : > { %v1238_v0 = vadd.f32 %v1237_v43, %v5667_v36  ;;  %v1286_v4 = vpop.f32.mrf.mxu3 }
 0x177   : > { %v1287_v46 = vadd.f32 %v1286_v4, %v1238_v0  ;;  %1532 = vmatmul.bf16.gmra.mxu0 %v1388_v1 }
 0x179   : > { %v1324_v48 = vmax.f32 %v1287_v46, 0.0 }
 0x17b   : > { %v1381_v49 = vpack.c.bf16 %v1324_v48, %v1322_v47 }
 0x17c   : > { %v1240_v50 = vpop.f32.mrf.mxu2 }
 0x17d   : > { %v1289_v51 = vpop.f32.mrf.mxu3  ;;  %1561 = vmatmul.bf16.gmra.mxu1 %v1381_v49  ;;  %v1241_v52 = vadd.f32 %v1240_v50, %v5667_v36 }
 0x17f   : > { %v1290_v17 = vadd.f32 %v1289_v51, %v1241_v52  ;;  %v4269_v51 = vld [vmem:[#allocation10 + $0x30] sm:$0xff] }
 0x180   : > { %1821 = vmatpush.bf16.msra.mxu3 %v4269_v51 }
 0x181   : > { %v1326_v58 = vmax.f32 %v1290_v17, 0.0 }
 0x184   : > { %v1242_v53 = vpop.f32.mrf.mxu2  ;;  %v1498_v22 = vpop.f32.mrf.mxu0 }
 0x185   : > { %v1243_v54 = vadd.f32 %v1242_v53, %v5667_v36  ;;  %v1291_v55 = vpop.f32.mrf.mxu3  ;;  %v1499_v43 = vadd.f32 %v5687_v41, %v1498_v22 }
 0x187   : > { %v1292_v57 = vadd.f32 %v1291_v55, %v1243_v54 }
 0x189   : > { %v1328_v18 = vmax.f32 %v1292_v57, 0.0 }
 0x18b   : > { %v1383_v60 = vpack.c.bf16 %v1328_v18, %v1326_v58 }
 0x18c   : > { %v1245_v61 = vpop.f32.mrf.mxu2  ;;  %v1500_v30 = vpop.f32.mrf.mxu0 }
 0x18d   : > { %v1294_v62 = vpop.f32.mrf.mxu3  ;;  %1566 = vmatmul.bf16.gmra.mxu1 %v1383_v60  ;;  %v1246_v1 = vadd.f32 %v1245_v61, %v5667_v36  ;;  %v1501_v0 = vadd.f32 %v5687_v41, %v1500_v30  ;;  %v4268_v61 = vld [vmem:[#allocation10 + $0x28] sm:$0xff] }
 0x18e   : > { %1822 = vmatpush.bf16.msra.mxu3 %v4268_v61 }
 0x18f   : > { %v1295_v7 = vadd.f32 %v1294_v62, %v1246_v1 }
 0x191   : > { %v1330_v29 = vmax.f32 %v1295_v7, 0.0 }
 0x194   : > { %v1247_v2 = vpop.f32.mrf.mxu2  ;;  %v1503_v63 = vpop.f32.mrf.mxu0 }
 0x195   : > { %v1248_v8 = vadd.f32 %v1247_v2, %v5667_v36  ;;  %v1296_v40 = vpop.f32.mrf.mxu3  ;;  %v1504_v52 = vadd.f32 %v5687_v41, %v1503_v63 }
 0x197   : > { %v1297_v9 = vadd.f32 %v1296_v40, %v1248_v8 }
 0x199   : > { %v1332_v10 = vmax.f32 %v1297_v9, 0.0 }
 0x19b   : > { %v1385_v12 = vpack.c.bf16 %v1332_v10, %v1330_v29 }
 0x19c   : > { %v1250_v13 = vpop.f32.mrf.mxu2  ;;  %v1505_v38 = vpop.f32.mrf.mxu0 }
 0x19d   : > { %v1299_v14 = vpop.f32.mrf.mxu3  ;;  %1571 = vmatmul.bf16.gmra.mxu1 %v1385_v12  ;;  %v1251_v15 = vadd.f32 %v1250_v13, %v5667_v36  ;;  %v1506_v53 = vadd.f32 %v5687_v41, %v1505_v38  ;;  %v4267_v13 = vld [vmem:[#allocation10 + $0x20] sm:$0xff] }
 0x19e   : > { %1823 = vmatpush.bf16.msra.mxu3 %v4267_v13 }
 0x19f   : > { %v1300_v19 = vadd.f32 %v1299_v14, %v1251_v15 }
 0x1a1   : > { %v1334_v23 = vmax.f32 %v1300_v19, 0.0 }
 0x1a4   : > { %v1252_v16 = vpop.f32.mrf.mxu2  ;;  %v1508_v44 = vpop.f32.mrf.mxu0 }
 0x1a5   : > { %v1253_v27 = vadd.f32 %v1252_v16, %v5667_v36  ;;  %v1301_v20 = vpop.f32.mrf.mxu3  ;;  %v1509_v1 = vadd.f32 %v5687_v41, %v1508_v44 }
 0x1a7   : > { %v1302_v5 = vadd.f32 %v1301_v20, %v1253_v27 }
 0x1a9   : > { %v1336_v24 = vmax.f32 %v1302_v5, 0.0 }
 0x1ab   : > { %v1387_v56 = vpack.c.bf16 %v1336_v24, %v1334_v23 }
 0x1ac   : > { %v1255_v25 = vpop.f32.mrf.mxu2  ;;  %v1510_v49 = vpop.f32.mrf.mxu0 }
 0x1ad   : > { %v1304_v26 = vpop.f32.mrf.mxu3  ;;  %1576 = vmatmul.bf16.gmra.mxu1 %v1387_v56  ;;  %v1256_v28 = vadd.f32 %v1255_v25, %v5667_v36  ;;  %v1511_v2 = vadd.f32 %v5687_v41, %v1510_v49  ;;  %v4266_v56 = vld [vmem:[#allocation10 + $0x18] sm:$0xff] }
 0x1ae   : > { %1824 = vmatpush.bf16.msra.mxu3 %v4266_v56 }
 0x1af   : > { %v1305_v31 = vadd.f32 %v1304_v26, %v1256_v28 }
 0x1b1   : > { %v1338_v34 = vmax.f32 %v1305_v31, 0.0 }
 0x1b4   : > { %v1257_v3 = vpop.f32.mrf.mxu2  ;;  %v1513_v57 = vpop.f32.mrf.mxu0 }
 0x1b5   : > { %v1258_v32 = vadd.f32 %v1257_v3, %v5667_v36  ;;  %v1306_v6 = vpop.f32.mrf.mxu3  ;;  %v1514_v14 = vadd.f32 %v5687_v41, %v1513_v57 }
 0x1b7   : > { %v1307_v33 = vadd.f32 %v1306_v6, %v1258_v32 }
 0x1b9   : > { %v1340_v35 = vmax.f32 %v1307_v33, 0.0 }
 0x1bb   : > { %v1389_v37 = vpack.c.bf16 %v1340_v35, %v1338_v34  ;;  %v4265_v35 = vld [vmem:[#allocation10 + $0x10] sm:$0xff] }
 0x1bc   : > { %v1515_v62 = vpop.f32.mrf.mxu0  ;;  %1825 = vmatpush.bf16.msra.mxu3 %v4265_v35 }
 0x1bd   : > { %1581 = vmatmul.bf16.gmra.mxu1 %v1389_v37  ;;  %v1516_v15 = vadd.f32 %v5687_v41, %v1515_v62 }
 0x1c4   : > { %v1518_v11 = vpop.f32.mrf.mxu0 }
 0x1c5   : > { %v1519_v25 = vadd.f32 %v5687_v41, %v1518_v11 }
 0x1ca   : > { %v1547_v39 = vpop.f32.mrf.mxu1 }
 0x1cb   : > { %v1548_v4 = vadd.f32 %v1547_v39, %v1499_v43 }
 0x1cc   : > { %v1520_v19 = vpop.f32.mrf.mxu0 }
 0x1cd   : > { %v1587_v47 = vmax.f32 %v1548_v4, 0.0  ;;  %v1521_v26 = vadd.f32 %v5687_v41, %v1520_v19 }
 0x1d2   : > { %v1549_v36 = vpop.f32.mrf.mxu1 }
 0x1d3   : > { %v1550_v46 = vadd.f32 %v1549_v36, %v1501_v0  ;;  %v4264_v36 = vld [vmem:[#allocation10 + $0x8] sm:$0xff] }
 0x1d4   : > { %v1523_v24 = vpop.f32.mrf.mxu0  ;;  %1826 = vmatpush.bf16.msra.mxu3 %v4264_v36 }
 0x1d5   : > { %v1588_v48 = vmax.f32 %v1550_v46, 0.0  ;;  %v1524_v37 = vadd.f32 %v5687_v41, %v1523_v24 }
 0x1d7   : > { %v1620_v45 = vpack.c.bf16 %v1588_v48, %v1587_v47  ;;  %v4263_v48 = vld [vmem:[#allocation10] sm:$0xff] }
 0x1d8   : > { %1827 = vmatpush.bf16.msra.mxu3 %v4263_v48 }
 0x1d9   : > { %1687 = vmatmul.bf16.vlgmr.msra.gmra.mxu2 %v1620_v45 }
 0x1da   : > { %v1552_v50 = vpop.f32.mrf.mxu1 }
 0x1db   : > { %v1553_v17 = vadd.f32 %v1552_v50, %v1504_v52 }
 0x1dc   : > { %v1525_v6 = vpop.f32.mrf.mxu0 }
 0x1dd   : > { %v1589_v58 = vmax.f32 %v1553_v17, 0.0  ;;  %v1526_v38 = vadd.f32 %v5687_v41, %v1525_v6 }
 0x1e2   : > { %v1554_v54 = vpop.f32.mrf.mxu1 }
 0x1e3   : > { %v1555_v55 = vadd.f32 %v1554_v54, %v1506_v53 }
 0x1e4   : > { %v1528_v63 = vpop.f32.mrf.mxu0 }
 0x1e5   : > { %v1590_v18 = vmax.f32 %v1555_v55, 0.0  ;;  %v1529_v45 = vadd.f32 %v5687_v41, %v1528_v63 }
 0x1e7   : > { %v1621_v59 = vpack.c.bf16 %v1590_v18, %v1589_v58 }
 0x1e9   : > { %1692 = vmatmul.bf16.gmra.mxu2 %v1621_v59 }
 0x1ea   : > { %v1557_v60 = vpop.f32.mrf.mxu1 }
 0x1eb   : > { %v1558_v7 = vadd.f32 %v1557_v60, %v1509_v1 }
 0x1ec   : > { %v1530_v46 = vpop.f32.mrf.mxu0 }
 0x1ed   : > { %v1591_v9 = vmax.f32 %v1558_v7, 0.0  ;;  %v1531_v49 = vadd.f32 %v5687_v41, %v1530_v46  ;;  %v4273_v46 = vld [vmem:[#allocation13 + $0x10] sm:$0xff] }
 0x1f2   : > { %v1559_v8 = vpop.f32.mrf.mxu1 }
 0x1f3   : > { %v1560_v40 = vadd.f32 %v1559_v8, %v1511_v2 }
 0x1f4   : > { %v1533_v53 = vpop.f32.mrf.mxu0 }
 0x1f5   : > { %v1592_v29 = vmax.f32 %v1560_v40, 0.0  ;;  %v1534_v18 = vadd.f32 %v5687_v41, %v1533_v53  ;;  %v5705_v40 = vld [vmem:[#allocation8] ss:$0 sm:$0xff] }
 0x1f7   : > { %v1622_v10 = vpack.c.bf16 %v1592_v29, %v1591_v9  ;;  %v4278_v9 = vld [vmem:[#allocation13 + $0x38] sm:$0xff] }
 0x1f8   : > { %1961 = vmatpush.bf16.msra.mxu0 %v4278_v9  ;;  %v4286_v9 = vld [vmem:[#allocation14 + $0x38] sm:$0xff] }
 0x1f9   : > { %1697 = vmatmul.bf16.gmra.mxu2 %v1622_v10  ;;  %2086 = vmatpush.bf16.msra.mxu1 %v4286_v9 }
 0x1fa   : > { %v1562_v12 = vpop.f32.mrf.mxu1 }
 0x1fb   : > { %v1563_v16 = vadd.f32 %v1562_v12, %v1514_v14 }
 0x1fc   : > { %v1535_v58 = vpop.f32.mrf.mxu0 }
 0x1fd   : > { %v1593_v21 = vmax.f32 %v1563_v16, 0.0  ;;  %v1536_v59 = vadd.f32 %v5687_v41, %v1535_v58 }
 0x202   : > { %v1564_v27 = vpop.f32.mrf.mxu1 }
 0x203   : > { %v1565_v20 = vadd.f32 %v1564_v27, %v1516_v15  ;;  %v4277_v15 = vld [vmem:[#allocation13 + $0x30] sm:$0xff] }
 0x204   : > { %1962 = vmatpush.bf16.msra.mxu0 %v4277_v15  ;;  %v4285_v15 = vld [vmem:[#allocation14 + $0x30] sm:$0xff] }
 0x205   : > { %v1594_v5 = vmax.f32 %v1565_v20, 0.0  ;;  %2087 = vmatpush.bf16.msra.mxu1 %v4285_v15 }
 0x207   : > { %v1623_v22 = vpack.c.bf16 %v1594_v5, %v1593_v21 }
 0x209   : > { %1702 = vmatmul.bf16.gmra.mxu2 %v1623_v22 }
 0x20a   : > { %v1567_v23 = vpop.f32.mrf.mxu1 }
 0x20b   : > { %v1568_v28 = vadd.f32 %v1567_v23, %v1519_v25  ;;  %v4276_v23 = vld [vmem:[#allocation13 + $0x28] sm:$0xff] }
 0x20c   : > { %1963 = vmatpush.bf16.msra.mxu0 %v4276_v23 }
 0x20d   : > { %v1595_v31 = vmax.f32 %v1568_v28, 0.0 }
 0x212   : > { %v1569_v30 = vpop.f32.mrf.mxu1 }
 0x213   : > { %v1570_v3 = vadd.f32 %v1569_v30, %v1521_v26 }
 0x215   : > { %v1596_v32 = vmax.f32 %v1570_v3, 0.0 }
 0x217   : > { %v1624_v33 = vpack.c.bf16 %v1596_v32, %v1595_v31  ;;  %v4275_v31 = vld [vmem:[#allocation13 + $0x20] sm:$0xff] }
 0x218   : > { %1964 = vmatpush.bf16.msra.mxu0 %v4275_v31 }
 0x219   : > { %1707 = vmatmul.bf16.gmra.mxu2 %v1624_v33 }
 0x21a   : > { %v1572_v34 = vpop.f32.mrf.mxu1 }
 0x21b   : > { %v1573_v39 = vadd.f32 %v1572_v34, %v1524_v37 }
 0x21d   : > { %v1597_v44 = vmax.f32 %v1573_v39, 0.0 }
 0x222   : > { %v1574_v42 = vpop.f32.mrf.mxu1 }
 0x223   : > { %v1575_v43 = vadd.f32 %v1574_v42, %v1526_v38  ;;  %v4274_v38 = vld [vmem:[#allocation13 + $0x18] sm:$0xff] }
 0x224   : > { %1965 = vmatpush.bf16.msra.mxu0 %v4274_v38 }
 0x225   : > { %v1598_v0 = vmax.f32 %v1575_v43, 0.0 }
 0x227   : > { %v1625_v4 = vpack.c.bf16 %v1598_v0, %v1597_v44 }
 0x228   : > { %1966 = vmatpush.bf16.msra.mxu0 %v4273_v46 }
 0x229   : > { %1712 = vmatmul.bf16.gmra.mxu2 %v1625_v4 }
 0x22a   : > { %v1577_v47 = vpop.f32.mrf.mxu1 }
 0x22b   : > { %v1578_v50 = vadd.f32 %v1577_v47, %v1529_v45 }
 0x22d   : > { %v1599_v17 = vmax.f32 %v1578_v50, 0.0 }
 0x232   : > { %v1579_v51 = vpop.f32.mrf.mxu1 }
 0x233   : > { %v1580_v52 = vadd.f32 %v1579_v51, %v1531_v49 }
 0x235   : > { %v1600_v54 = vmax.f32 %v1580_v52, 0.0  ;;  %v4272_v52 = vld [vmem:[#allocation13 + $0x8] sm:$0xff] }
 0x236   : > { %1967 = vmatpush.bf16.msra.mxu0 %v4272_v52  ;;  %v4280_v52 = vld [vmem:[#allocation14 + $0x8] sm:$0xff] }
 0x237   : > { %v1626_v55 = vpack.c.bf16 %v1600_v54, %v1599_v17  ;;  %v4271_v17 = vld [vmem:[#allocation13] sm:$0xff] }
 0x239   : > { %1717 = vmatmul.bf16.gmra.mxu2 %v1626_v55 }
 0x23a   : > { %v1582_v57 = vpop.f32.mrf.mxu1  ;;  %1968 = vmatpush.bf16.msra.mxu0 %v4271_v17  ;;  %v4279_v17 = vld [vmem:[#allocation14] sm:$0xff] }
 0x23b   : > { %v1583_v60 = vadd.f32 %v1582_v57, %v1534_v18 }
 0x23d   : > { %v1601_v1 = vmax.f32 %v1583_v60, 0.0 }
 0x242   : > { %v1584_v61 = vpop.f32.mrf.mxu1 }
 0x243   : > { %v1585_v62 = vadd.f32 %v1584_v61, %v1536_v59 }
 0x245   : > { %v1602_v2 = vmax.f32 %v1585_v62, 0.0 }
 0x247   : > { %v1627_v7 = vpack.c.bf16 %v1602_v2, %v1601_v1 }
 0x249   : > { %1722 = vmatmul.bf16.gmra.mxu2 %v1627_v7 }
 0x25c   : > { %v1688_v8 = vpop.f32.mrf.mxu2 }
 0x25d   : > { %v1689_v29 = vadd.f32 %v5705_v40, %v1688_v8 }
 0x25f   : > { %v1728_v12 = vmax.f32 %v1689_v29, 0.0 }
 0x264   : > { %v1690_v10 = vpop.f32.mrf.mxu2 }
 0x265   : > { %v1691_v11 = vadd.f32 %v5705_v40, %v1690_v10  ;;  %v5723_v10 = vld [vmem:[#allocation11] ss:$0 sm:$0xff] }
 0x267   : > { %v1729_v13 = vmax.f32 %v1691_v11, 0.0 }
 0x269   : > { %v1761_v41 = vpack.c.bf16 %v1729_v13, %v1728_v12 }
 0x26b   : > { %1828 = vmatmul.bf16.vlgmr.msra.gmra.mxu3 %v1761_v41 }
 0x26c   : > { %v1693_v14 = vpop.f32.mrf.mxu2 }
 0x26d   : > { %v1694_v16 = vadd.f32 %v5705_v40, %v1693_v14 }
 0x26f   : > { %v1730_v20 = vmax.f32 %v1694_v16, 0.0 }
 0x274   : > { %v1695_v19 = vpop.f32.mrf.mxu2 }
 0x275   : > { %v1696_v27 = vadd.f32 %v5705_v40, %v1695_v19 }
 0x277   : > { %v1731_v21 = vmax.f32 %v1696_v27, 0.0 }
 0x279   : > { %v1762_v5 = vpack.c.bf16 %v1731_v21, %v1730_v20 }
 0x27b   : > { %1833 = vmatmul.bf16.gmra.mxu3 %v1762_v5 }
 0x27c   : > { %v1698_v22 = vpop.f32.mrf.mxu2 }
 0x27d   : > { %v1699_v24 = vadd.f32 %v5705_v40, %v1698_v22  ;;  %v4284_v22 = vld [vmem:[#allocation14 + $0x28] sm:$0xff] }
 0x27e   : > { %2088 = vmatpush.bf16.msra.mxu1 %v4284_v22 }
 0x27f   : > { %v1732_v26 = vmax.f32 %v1699_v24, 0.0 }
 0x284   : > { %v1700_v56 = vpop.f32.mrf.mxu2 }
 0x285   : > { %v1701_v25 = vadd.f32 %v5705_v40, %v1700_v56 }
 0x287   : > { %v1733_v28 = vmax.f32 %v1701_v25, 0.0 }
 0x289   : > { %v1763_v30 = vpack.c.bf16 %v1733_v28, %v1732_v26 }
 0x28b   : > { %1838 = vmatmul.bf16.gmra.mxu3 %v1763_v30 }
 0x28c   : > { %v1703_v3 = vpop.f32.mrf.mxu2 }
 0x28d   : > { %v1704_v32 = vadd.f32 %v5705_v40, %v1703_v3  ;;  %v4283_v3 = vld [vmem:[#allocation14 + $0x20] sm:$0xff] }
 0x28e   : > { %2089 = vmatpush.bf16.msra.mxu1 %v4283_v3 }
 0x28f   : > { %v1734_v34 = vmax.f32 %v1704_v32, 0.0 }
 0x294   : > { %v1705_v6 = vpop.f32.mrf.mxu2 }
 0x295   : > { %v1706_v33 = vadd.f32 %v5705_v40, %v1705_v6 }
 0x297   : > { %v1735_v35 = vmax.f32 %v1706_v33, 0.0 }
 0x299   : > { %v1764_v37 = vpack.c.bf16 %v1735_v35, %v1734_v34 }
 0x29b   : > { %1843 = vmatmul.bf16.gmra.mxu3 %v1764_v37 }
 0x29c   : > { %v1708_v63 = vpop.f32.mrf.mxu2 }
 0x29d   : > { %v1709_v39 = vadd.f32 %v5705_v40, %v1708_v63  ;;  %v4282_v63 = vld [vmem:[#allocation14 + $0x18] sm:$0xff] }
 0x29e   : > { %2090 = vmatpush.bf16.msra.mxu1 %v4282_v63  ;;  %v4289_v63 = vld [vmem:[#allocation16 + $0x10] sm:$0xff] }
 0x29f   : > { %v1736_v44 = vmax.f32 %v1709_v39, 0.0 }
 0x2a4   : > { %v1710_v42 = vpop.f32.mrf.mxu2 }
 0x2a5   : > { %v1711_v43 = vadd.f32 %v5705_v40, %v1710_v42 }
 0x2a7   : > { %v1737_v0 = vmax.f32 %v1711_v43, 0.0 }
 0x2a9   : > { %v1765_v4 = vpack.c.bf16 %v1737_v0, %v1736_v44 }
 0x2ab   : > { %1848 = vmatmul.bf16.gmra.mxu3 %v1765_v4 }
 0x2ac   : > { %v1713_v36 = vpop.f32.mrf.mxu2 }
 0x2ad   : > { %v1714_v47 = vadd.f32 %v5705_v40, %v1713_v36  ;;  %v4281_v36 = vld [vmem:[#allocation14 + $0x10] sm:$0xff] }
 0x2ae   : > { %2091 = vmatpush.bf16.msra.mxu1 %v4281_v36 }
 0x2af   : > { %v1738_v49 = vmax.f32 %v1714_v47, 0.0 }
 0x2b2   : > { %2092 = vmatpush.bf16.msra.mxu1 %v4280_v52 }
 0x2b4   : > { %v1715_v48 = vpop.f32.mrf.mxu2 }
 0x2b5   : > { %v1716_v45 = vadd.f32 %v5705_v40, %v1715_v48 }
 0x2b6   : > { %2093 = vmatpush.bf16.msra.mxu1 %v4279_v17 }
 0x2b7   : > { %v1739_v50 = vmax.f32 %v1716_v45, 0.0 }
 0x2b9   : > { %v1766_v51 = vpack.c.bf16 %v1739_v50, %v1738_v49 }
 0x2bb   : > { %1853 = vmatmul.bf16.gmra.mxu3 %v1766_v51 }
 0x2bc   : > { %v1718_v53 = vpop.f32.mrf.mxu2 }
 0x2bd   : > { %v1719_v54 = vadd.f32 %v5705_v40, %v1718_v53 }
 0x2bf   : > { %v1740_v58 = vmax.f32 %v1719_v54, 0.0 }
 0x2c4   : > { %v1720_v55 = vpop.f32.mrf.mxu2 }
 0x2c5   : > { %v1721_v57 = vadd.f32 %v5705_v40, %v1720_v55 }
 0x2c7   : > { %v1741_v18 = vmax.f32 %v1721_v57, 0.0 }
 0x2c9   : > { %v1767_v59 = vpack.c.bf16 %v1741_v18, %v1740_v58 }
 0x2cb   : > { %1858 = vmatmul.bf16.gmra.mxu3 %v1767_v59 }
 0x2cc   : > { %v1723_v60 = vpop.f32.mrf.mxu2 }
 0x2cd   : > { %v1724_v61 = vadd.f32 %v5705_v40, %v1723_v60 }
 0x2cf   : > { %v1742_v2 = vmax.f32 %v1724_v61, 0.0 }
 0x2d4   : > { %v1725_v62 = vpop.f32.mrf.mxu2 }
 0x2d5   : > { %v1726_v1 = vadd.f32 %v5705_v40, %v1725_v62 }
 0x2d7   : > { %v1743_v7 = vmax.f32 %v1726_v1, 0.0 }
 0x2d9   : > { %v1768_v8 = vpack.c.bf16 %v1743_v7, %v1742_v2 }
 0x2db   : > { %1863 = vmatmul.bf16.gmra.mxu3 %v1768_v8 }
 0x2ee   : > { %v1829_v29 = vpop.f32.mrf.mxu3 }
 0x2ef   : > { %v1830_v11 = vadd.f32 %v5723_v10, %v1829_v29  ;;  %v4294_v29 = vld [vmem:[#allocation16 + $0x38] sm:$0xff] }
 0x2f0   : > { %2227 = vmatpush.bf16.msrb.mxu2 %v4294_v29 }
 0x2f1   : > { %v1869_v41 = vmax.f32 %v1830_v11, 0.0 }
 0x2f6   : > { %v1831_v12 = vpop.f32.mrf.mxu3 }
 0x2f7   : > { %v1832_v13 = vadd.f32 %v5723_v10, %v1831_v12  ;;  %v4516_v12 = vld [vmem:[%s6254_s10] ss:$0 sm:$0xff] }
 0x2f9   : > { %v1870_v14 = vmax.f32 %v1832_v13, 0.0 }
 0x2fb   : > { %v1902_v16 = vpack.c.bf16 %v1870_v14, %v1869_v41 }
 0x2fd   : > { %1969 = vmatmul.bf16.vlgmr.msra.gmra.mxu0 %v1902_v16  ;;  %v4293_v16 = vld [vmem:[#allocation16 + $0x30] sm:$0xff] }
 0x2fe   : > { %v1834_v40 = vpop.f32.mrf.mxu3  ;;  %2228 = vmatpush.bf16.msrb.mxu2 %v4293_v16 }
 0x2ff   : > { %v1835_v19 = vadd.f32 %v5723_v10, %v1834_v40 }
 0x301   : > { %v1871_v21 = vmax.f32 %v1835_v19, 0.0 }
 0x306   : > { %v1836_v27 = vpop.f32.mrf.mxu3 }
 0x307   : > { %v1837_v20 = vadd.f32 %v5723_v10, %v1836_v27 }
 0x309   : > { %v1872_v5 = vmax.f32 %v1837_v20, 0.0 }
 0x30b   : > { %v1903_v23 = vpack.c.bf16 %v1872_v5, %v1871_v21  ;;  %v4292_v21 = vld [vmem:[#allocation16 + $0x28] sm:$0xff] }
 0x30c   : > { %2229 = vmatpush.bf16.msrb.mxu2 %v4292_v21 }
 0x30d   : > { %1974 = vmatmul.bf16.gmra.mxu0 %v1903_v23 }
 0x30e   : > { %v1839_v24 = vpop.f32.mrf.mxu3 }
 0x30f   : > { %v1840_v56 = vadd.f32 %v5723_v10, %v1839_v24 }
 0x311   : > { %v1873_v28 = vmax.f32 %v1840_v56, 0.0 }
 0x316   : > { %v1841_v25 = vpop.f32.mrf.mxu3 }
 0x317   : > { %v1842_v26 = vadd.f32 %v5723_v10, %v1841_v25  ;;  %v4291_v25 = vld [vmem:[#allocation16 + $0x20] sm:$0xff] }
 0x318   : > { %2230 = vmatpush.bf16.msrb.mxu2 %v4291_v25  ;;  %v4298_v25 = vld [vmem:[#allocation17 + $0x18] sm:$0xff] }
 0x319   : > { %v1874_v30 = vmax.f32 %v1842_v26, 0.0 }
 0x31b   : > { %v1904_v31 = vpack.c.bf16 %v1874_v30, %v1873_v28 }
 0x31d   : > { %1979 = vmatmul.bf16.gmra.mxu0 %v1904_v31 }
 0x31e   : > { %v1844_v32 = vpop.f32.mrf.mxu3 }
 0x31f   : > { %v1845_v6 = vadd.f32 %v5723_v10, %v1844_v32  ;;  %v4290_v32 = vld [vmem:[#allocation16 + $0x18] sm:$0xff] }
 0x320   : > { %2231 = vmatpush.bf16.msrb.mxu2 %v4290_v32 }
 0x321   : > { %v1875_v35 = vmax.f32 %v1845_v6, 0.0 }
 0x324   : > { %2232 = vmatpush.bf16.msrb.mxu2 %v4289_v63 }
 0x326   : > { %v1846_v33 = vpop.f32.mrf.mxu3 }
 0x327   : > { %v1847_v34 = vadd.f32 %v5723_v10, %v1846_v33 }
 0x329   : > { %v1876_v37 = vmax.f32 %v1847_v34, 0.0 }
 0x32b   : > { %v1905_v38 = vpack.c.bf16 %v1876_v37, %v1875_v35 }
 0x32d   : > { %1984 = vmatmul.bf16.gmra.mxu0 %v1905_v38 }
 0x32e   : > { %v1849_v39 = vpop.f32.mrf.mxu3 }
 0x32f   : > { %v1850_v42 = vadd.f32 %v5723_v10, %v1849_v39 }
 0x331   : > { %v1877_v0 = vmax.f32 %v1850_v42, 0.0 }
 0x336   : > { %v1851_v43 = vpop.f32.mrf.mxu3 }
 0x337   : > { %v1852_v44 = vadd.f32 %v5723_v10, %v1851_v43 }
 0x339   : > { %v1878_v4 = vmax.f32 %v1852_v44, 0.0 }
 0x33b   : > { %v1906_v46 = vpack.c.bf16 %v1878_v4, %v1877_v0  ;;  %v4288_v0 = vld [vmem:[#allocation16 + $0x8] sm:$0xff]  ;;  %v4287_v4 = vld [vmem:[#allocation16] sm:$0xff] }
 0x33c   : > { %2233 = vmatpush.bf16.msrb.mxu2 %v4288_v0 }
 0x33d   : > { %1989 = vmatmul.bf16.gmra.mxu0 %v1906_v46 }
 0x33e   : > { %v1854_v47 = vpop.f32.mrf.mxu3 }
 0x33f   : > { %v1855_v48 = vadd.f32 %v5723_v10, %v1854_v47 }
 0x340   : > { %2234 = vmatpush.bf16.msrb.mxu2 %v4287_v4 }
 0x341   : > { %v1879_v50 = vmax.f32 %v1855_v48, 0.0 }
 0x346   : > { %v1856_v45 = vpop.f32.mrf.mxu3 }
 0x347   : > { %v1857_v49 = vadd.f32 %v5723_v10, %v1856_v45 }
 0x349   : > { %v1880_v51 = vmax.f32 %v1857_v49, 0.0 }
 0x34b   : > { %v1907_v53 = vpack.c.bf16 %v1880_v51, %v1879_v50 }
 0x34d   : > { %1994 = vmatmul.bf16.gmra.mxu0 %v1907_v53 }
 0x34e   : > { %v1859_v54 = vpop.f32.mrf.mxu3 }
 0x34f   : > { %v1860_v55 = vadd.f32 %v5723_v10, %v1859_v54  ;;  %v5747_v54 = vld [vmem:[%s6256_s12] ss:$0 sm:$0xff] }
 0x351   : > { %v1881_v18 = vmax.f32 %v1860_v55, 0.0  ;;  %v4302_v55 = vld [vmem:[#allocation17 + $0x38] sm:$0xff] }
 0x352   : > { %2368 = vmatpush.bf16.msrb.mxu3 %v4302_v55 }
 0x356   : > { %v1861_v57 = vpop.f32.mrf.mxu3 }
 0x357   : > { %v1862_v58 = vadd.f32 %v5723_v10, %v1861_v57 }
 0x359   : > { %v1882_v59 = vmax.f32 %v1862_v58, 0.0 }
 0x35b   : > { %v1908_v60 = vpack.c.bf16 %v1882_v59, %v1881_v18 }
 0x35d   : > { %1999 = vmatmul.bf16.gmra.mxu0 %v1908_v60 }
 0x35e   : > { %v1864_v61 = vpop.f32.mrf.mxu3 }
 0x35f   : > { %v1865_v62 = vadd.f32 %v5723_v10, %v1864_v61 }
 0x361   : > { %v1883_v7 = vmax.f32 %v1865_v62, 0.0 }
 0x366   : > { %v1866_v1 = vpop.f32.mrf.mxu3 }
 0x367   : > { %v1867_v2 = vadd.f32 %v5723_v10, %v1866_v1  ;;  %v4301_v1 = vld [vmem:[#allocation17 + $0x30] sm:$0xff] }
 0x368   : > { %2369 = vmatpush.bf16.msrb.mxu3 %v4301_v1 }
 0x369   : > { %v1884_v8 = vmax.f32 %v1867_v2, 0.0 }
 0x36b   : > { %v1909_v9 = vpack.c.bf16 %v1884_v8, %v1883_v7 }
 0x36d   : > { %2004 = vmatmul.bf16.gmra.mxu0 %v1909_v9 }
 0x37a   : > { %v1970_v11 = vpop.f32.mrf.mxu0 }
 0x37b   : > { %v1971_v41 = vadd.f32 %v4516_v12, %v1970_v11 }
 0x382   : > { %v1972_v13 = vpop.f32.mrf.mxu0 }
 0x383   : > { %v1973_v14 = vadd.f32 %v4516_v12, %v1972_v13  ;;  %v4300_v13 = vld [vmem:[#allocation17 + $0x28] sm:$0xff] }
 0x384   : > { %2370 = vmatpush.bf16.msrb.mxu3 %v4300_v13 }
 0x385   : > { %v2027_v15 = vpack.c.bf16 %v1973_v14, %v1971_v41 }
 0x387   : > { %2094 = vmatmul.bf16.vlgmr.msra.gmra.mxu1 %v2027_v15 }
 0x38a   : > { %v1975_v40 = vpop.f32.mrf.mxu0 }
 0x38b   : > { %v1976_v19 = vadd.f32 %v4516_v12, %v1975_v40 }
 0x392   : > { %v1977_v10 = vpop.f32.mrf.mxu0 }
 0x393   : > { %v1978_v27 = vadd.f32 %v4516_v12, %v1977_v10 }
 0x395   : > { %v2028_v20 = vpack.c.bf16 %v1978_v27, %v1976_v19  ;;  %v4299_v27 = vld [vmem:[#allocation17 + $0x20] sm:$0xff] }
 0x396   : > { %2371 = vmatpush.bf16.msrb.mxu3 %v4299_v27 }
 0x397   : > { %2099 = vmatmul.bf16.gmra.mxu1 %v2028_v20 }
 0x39a   : > { %v1980_v5 = vpop.f32.mrf.mxu0  ;;  %2372 = vmatpush.bf16.msrb.mxu3 %v4298_v25 }
 0x39b   : > { %v1981_v23 = vadd.f32 %v4516_v12, %v1980_v5 }
 0x3a2   : > { %v1982_v22 = vpop.f32.mrf.mxu0 }
 0x3a3   : > { %v1983_v24 = vadd.f32 %v4516_v12, %v1982_v22 }
 0x3a5   : > { %v2029_v56 = vpack.c.bf16 %v1983_v24, %v1981_v23 }
 0x3a7   : > { %2104 = vmatmul.bf16.gmra.mxu1 %v2029_v56 }
 0x3aa   : > { %v1985_v26 = vpop.f32.mrf.mxu0 }
 0x3ab   : > { %v1986_v30 = vadd.f32 %v4516_v12, %v1985_v26 }
 0x3b2   : > { %v1987_v28 = vpop.f32.mrf.mxu0 }
 0x3b3   : > { %v1988_v3 = vadd.f32 %v4516_v12, %v1987_v28 }
 0x3b5   : > { %v2030_v31 = vpack.c.bf16 %v1988_v3, %v1986_v30 }
 0x3b7   : > { %2109 = vmatmul.bf16.gmra.mxu1 %v2030_v31 }
 0x3ba   : > { %v1990_v6 = vpop.f32.mrf.mxu0 }
 0x3bb   : > { %v1991_v34 = vadd.f32 %v4516_v12, %v1990_v6 }
 0x3c2   : > { %v1992_v33 = vpop.f32.mrf.mxu0 }
 0x3c3   : > { %v1993_v35 = vadd.f32 %v4516_v12, %v1992_v33  ;;  %v4297_v33 = vld [vmem:[#allocation17 + $0x10] sm:$0xff] }
 0x3c4   : > { %2373 = vmatpush.bf16.msrb.mxu3 %v4297_v33  ;;  %v4026_v33 = vld [vmem:[%s6261_s17 + $0x40] sm:$0xf] }
 0x3c5   : > { %v2031_v37 = vpack.c.bf16 %v1993_v35, %v1991_v34 }
 0x3c7   : > { %2114 = vmatmul.bf16.gmra.mxu1 %v2031_v37 }
 0x3ca   : > { %v1995_v38 = vpop.f32.mrf.mxu0 }
 0x3cb   : > { %v1996_v42 = vadd.f32 %v4516_v12, %v1995_v38 }
 0x3d2   : > { %v1997_v39 = vpop.f32.mrf.mxu0 }
 0x3d3   : > { %v1998_v43 = vadd.f32 %v4516_v12, %v1997_v39 }
 0x3d5   : > { %v2032_v44 = vpack.c.bf16 %v1998_v43, %v1996_v42  ;;  %v4296_v42 = vld [vmem:[#allocation17 + $0x8] sm:$0xff] }
 0x3d6   : > { %2374 = vmatpush.bf16.msrb.mxu3 %v4296_v42 }
 0x3d7   : > { %2119 = vmatmul.bf16.gmra.mxu1 %v2032_v44  ;;  %v4295_v44 = vld [vmem:[#allocation17] sm:$0xff] }
 0x3da   : > { %v2000_v36 = vpop.f32.mrf.mxu0  ;;  %2375 = vmatpush.bf16.msrb.mxu3 %v4295_v44 }
 0x3db   : > { %v2001_v47 = vadd.f32 %v4516_v12, %v2000_v36 }
 0x3e2   : > { %v2002_v46 = vpop.f32.mrf.mxu0 }
 0x3e3   : > { %v2003_v48 = vadd.f32 %v4516_v12, %v2002_v46 }
 0x3e5   : > { %v2033_v45 = vpack.c.bf16 %v2003_v48, %v2001_v47 }
 0x3e7   : > { %2124 = vmatmul.bf16.gmra.mxu1 %v2033_v45 }
 0x3ea   : > { %v2005_v49 = vpop.f32.mrf.mxu0 }
 0x3eb   : > { %v2006_v51 = vadd.f32 %v4516_v12, %v2005_v49 }
 0x3f2   : > { %v2007_v50 = vpop.f32.mrf.mxu0 }
 0x3f3   : > { %v2008_v52 = vadd.f32 %v4516_v12, %v2007_v50 }
 0x3f5   : > { %v2034_v53 = vpack.c.bf16 %v2008_v52, %v2006_v51 }
 0x3f7   : > { %2129 = vmatmul.bf16.gmra.mxu1 %v2034_v53 }
 0x404   : > { %v2095_v17 = vpop.f32.mrf.mxu1 }
 0x405   : > { %v2096_v57 = vadd.f32 %v5747_v54, %v2095_v17 }
 0x407   : > { %v2135_v59 = vmax.f32 %v2096_v57, 0.0  ;;  %v5768_v57 = vld [vmem:[%s6258_s14] ss:$0 sm:$0xff] }
 0x40c   : > { %v2097_v58 = vpop.f32.mrf.mxu1 }
 0x40d   : > { %v2098_v18 = vadd.f32 %v5747_v54, %v2097_v58  ;;  %v4050_v58 = vld [vmem:[%s6261_s17 + $0x70] sm:$0xf] }
 0x40f   : > { %v2136_v60 = vmax.f32 %v2098_v18, 0.0  ;;  %v4318_v18 = vld [vmem:[%s6261_s17 + $0x74] sm:$0xf0] }
 0x411   : > { %v2168_v61 = vpack.c.bf16 %v2136_v60, %v2135_v59  ;;  %v4051_v59 = vor.u32 %v4318_v18, %v4050_v58  ;;  %v4052_v60 = vld [vmem:[%s6261_s17 + $0x78] sm:$0xf0] }
 0x413   : > { %2235 = vmatmul.bf16.vlgmr.msrb.gmra.mxu2 %v2168_v61  ;;  %2543 = vmatpush.bf16.msrb.mxu0 %v4051_v59  ;;  %v4010_v59 = vld [vmem:[%s6261_s17 + $0x20] sm:$0xf] }
 0x414   : > { %v2100_v62 = vpop.f32.mrf.mxu1 }
 0x415   : > { %v2101_v2 = vadd.f32 %v5747_v54, %v2100_v62 }
 0x417   : > { %v2137_v9 = vmax.f32 %v2101_v2, 0.0 }
 0x41c   : > { %v2102_v7 = vpop.f32.mrf.mxu1 }
 0x41d   : > { %v2103_v8 = vadd.f32 %v5747_v54, %v2102_v7 }
 0x41f   : > { %v2138_v29 = vmax.f32 %v2103_v8, 0.0 }
 0x421   : > { %v2169_v11 = vpack.c.bf16 %v2138_v29, %v2137_v9 }
 0x423   : > { %2240 = vmatmul.bf16.gmra.mxu2 %v2169_v11  ;;  %v4042_v11 = vld [vmem:[%s6261_s17 + $0x60] sm:$0xf] }
 0x424   : > { %v2105_v12 = vpop.f32.mrf.mxu1 }
 0x425   : > { %v2106_v41 = vadd.f32 %v5747_v54, %v2105_v12  ;;  %v4316_v12 = vld [vmem:[%s6261_s17 + $0x64] sm:$0xf0] }
 0x426   : > { %v4043_v13 = vor.u32 %v4316_v12, %v4042_v11  ;;  %v4002_v12 = vld [vmem:[%s6261_s17 + $0x10] sm:$0xf] }
 0x427   : > { %v2139_v16 = vmax.f32 %v2106_v41, 0.0  ;;  %v4315_v41 = vld [vmem:[%s6261_s17 + $0x64] sm:$0xf] }
 0x428   : > { %2544 = vmatpush.bf16.msrb.mxu0 %v4043_v13  ;;  %v4306_v13 = vld [vmem:[%s6261_s17 + $0x14] sm:$0xf0] }
 0x42c   : > { %v2107_v14 = vpop.f32.mrf.mxu1 }
 0x42d   : > { %v2108_v15 = vadd.f32 %v5747_v54, %v2107_v14  ;;  %v4044_v14 = vld [vmem:[%s6261_s17 + $0x68] sm:$0xf0] }
 0x42f   : > { %v2140_v40 = vmax.f32 %v2108_v15, 0.0  ;;  %v4047_v15 = vor.u32 %v4315_v41, %v4044_v14  ;;  %v4305_v41 = vld [vmem:[%s6261_s17 + $0x14] sm:$0xf] }
 0x431   : > { %v2170_v10 = vpack.c.bf16 %v2140_v40, %v2139_v16 }
 0x433   : > { %2245 = vmatmul.bf16.gmra.mxu2 %v2170_v10 }
 0x434   : > { %v2110_v19 = vpop.f32.mrf.mxu1 }
 0x435   : > { %v2111_v20 = vadd.f32 %v5747_v54, %v2110_v19 }
 0x437   : > { %v2141_v22 = vmax.f32 %v2111_v20, 0.0 }
 0x43c   : > { %v2112_v21 = vpop.f32.mrf.mxu1 }
 0x43d   : > { %v2113_v5 = vadd.f32 %v5747_v54, %v2112_v21 }
 0x43f   : > { %v2142_v23 = vmax.f32 %v2113_v5, 0.0  ;;  %v4034_v5 = vld [vmem:[%s6261_s17 + $0x50] sm:$0xf] }
 0x441   : > { %v2171_v24 = vpack.c.bf16 %v2142_v23, %v2141_v22  ;;  %v4314_v22 = vld [vmem:[%s6261_s17 + $0x54] sm:$0xf0] }
 0x442   : > { %v4035_v23 = vor.u32 %v4314_v22, %v4034_v5 }
 0x443   : > { %2250 = vmatmul.bf16.gmra.mxu2 %v2171_v24  ;;  %v4313_v24 = vld [vmem:[%s6261_s17 + $0x54] sm:$0xf] }
 0x444   : > { %v2115_v56 = vpop.f32.mrf.mxu1  ;;  %2545 = vmatpush.bf16.msrb.mxu0 %v4035_v23 }
 0x445   : > { %v2116_v26 = vadd.f32 %v5747_v54, %v2115_v56  ;;  %v4036_v56 = vld [vmem:[%s6261_s17 + $0x58] sm:$0xf0] }
 0x446   : > { %v4039_v25 = vor.u32 %v4313_v24, %v4036_v56 }
 0x447   : > { %v2143_v3 = vmax.f32 %v2116_v26, 0.0 }
 0x44c   : > { %v2117_v28 = vpop.f32.mrf.mxu1 }
 0x44d   : > { %v2118_v30 = vadd.f32 %v5747_v54, %v2117_v28 }
 0x44f   : > { %v2144_v31 = vmax.f32 %v2118_v30, 0.0 }
 0x451   : > { %v2172_v32 = vpack.c.bf16 %v2144_v31, %v2143_v3 }
 0x453   : > { %2255 = vmatmul.bf16.gmra.mxu2 %v2172_v32 }
 0x454   : > { %v2120_v6 = vpop.f32.mrf.mxu1 }
 0x455   : > { %v2121_v34 = vadd.f32 %v5747_v54, %v2120_v6 }
 0x457   : > { %v2145_v63 = vmax.f32 %v2121_v34, 0.0  ;;  %v4312_v34 = vld [vmem:[%s6261_s17 + $0x44] sm:$0xf0] }
 0x45c   : > { %v2122_v35 = vpop.f32.mrf.mxu1 }
 0x45d   : > { %v2123_v37 = vadd.f32 %v5747_v54, %v2122_v35  ;;  %v4027_v35 = vor.u32 %v4312_v34, %v4026_v33  ;;  %v4114_v34 = vld [vmem:[%s6263_s19 + $0x70] sm:$0xf] }
 0x45f   : > { %v2146_v38 = vmax.f32 %v2123_v37, 0.0  ;;  %v4311_v37 = vld [vmem:[%s6261_s17 + $0x44] sm:$0xf]  ;;  %2546 = vmatpush.bf16.msrb.mxu0 %v4027_v35  ;;  %v4334_v35 = vld [vmem:[%s6263_s19 + $0x74] sm:$0xf0] }
 0x461   : > { %v2173_v39 = vpack.c.bf16 %v2146_v38, %v2145_v63  ;;  %v4028_v63 = vld [vmem:[%s6261_s17 + $0x48] sm:$0xf0] }
 0x462   : > { %v4031_v38 = vor.u32 %v4311_v37, %v4028_v63  ;;  %v4178_v37 = vld [vmem:[%s6263_s19 + $0xf0] sm:$0xf]  ;;  %v4115_v63 = vor.u32 %v4334_v35, %v4114_v34  ;;  %v4327_v35 = vld [vmem:[%s6263_s19 + $0x44] sm:$0xf] }
 0x463   : > { %2260 = vmatmul.bf16.gmra.mxu2 %v2173_v39 }
 0x464   : > { %v2125_v43 = vpop.f32.mrf.mxu1  ;;  %2887 = vmatpush.bf16.msra.mxu2 %v4115_v63 }
 0x465   : > { %v2126_v0 = vadd.f32 %v5747_v54, %v2125_v43 }
 0x467   : > { %v2147_v46 = vmax.f32 %v2126_v0, 0.0 }
 0x46c   : > { %v2127_v4 = vpop.f32.mrf.mxu1 }
 0x46d   : > { %v2128_v36 = vadd.f32 %v5747_v54, %v2127_v4 }
 0x46f   : > { %v2148_v47 = vmax.f32 %v2128_v36, 0.0 }
 0x471   : > { %v2174_v48 = vpack.c.bf16 %v2148_v47, %v2147_v46  ;;  %v4018_v46 = vld [vmem:[%s6261_s17 + $0x30] sm:$0xf]  ;;  %v4310_v47 = vld [vmem:[%s6261_s17 + $0x34] sm:$0xf0] }
 0x473   : > { %2265 = vmatmul.bf16.gmra.mxu2 %v2174_v48  ;;  %v4019_v48 = vor.u32 %v4310_v47, %v4018_v46 }
 0x474   : > { %v2130_v45 = vpop.f32.mrf.mxu1 }
 0x475   : > { %v2131_v49 = vadd.f32 %v5747_v54, %v2130_v45  ;;  %v4309_v45 = vld [vmem:[%s6261_s17 + $0x34] sm:$0xf]  ;;  %2547 = vmatpush.bf16.msrb.mxu0 %v4019_v48 }
 0x477   : > { %v2149_v52 = vmax.f32 %v2131_v49, 0.0  ;;  %v4020_v49 = vld [vmem:[%s6261_s17 + $0x38] sm:$0xf0] }
 0x47c   : > { %v2132_v50 = vpop.f32.mrf.mxu1 }
 0x47d   : > { %v2133_v51 = vadd.f32 %v5747_v54, %v2132_v50  ;;  %v4317_v54 = vld [vmem:[%s6261_s17 + $0x74] sm:$0xf]  ;;  %v4023_v50 = vor.u32 %v4309_v45, %v4020_v49 }
 0x47e   : > { %v4055_v61 = vor.u32 %v4317_v54, %v4052_v60  ;;  %v4308_v54 = vld [vmem:[%s6261_s17 + $0x24] sm:$0xf0] }
 0x47f   : > { %v2150_v53 = vmax.f32 %v2133_v51, 0.0  ;;  %v4011_v60 = vor.u32 %v4308_v54, %v4010_v59  ;;  %v4331_v54 = vld [vmem:[%s6263_s19 + $0x64] sm:$0xf] }
 0x480   : > { %2592 = vmatpush.bf16.msrb.mxu1 %v4055_v61  ;;  %v4307_v61 = vld [vmem:[%s6261_s17 + $0x24] sm:$0xf] }
 0x481   : > { %v2175_v17 = vpack.c.bf16 %v2150_v53, %v2149_v52  ;;  %2548 = vmatpush.bf16.msrb.mxu0 %v4011_v60  ;;  %v4108_v60 = vld [vmem:[%s6263_s19 + $0x68] sm:$0xf0] }
 0x483   : > { %2270 = vmatmul.bf16.gmra.mxu2 %v2175_v17 }
 0x484   : > { %2593 = vmatpush.bf16.msrb.mxu1 %v4047_v15  ;;  %v4003_v15 = vor.u32 %v4306_v13, %v4002_v12  ;;  %v4098_v12 = vld [vmem:[%s6263_s19 + $0x50] sm:$0xf]  ;;  %v4330_v13 = vld [vmem:[%s6263_s19 + $0x54] sm:$0xf0] }
 0x486   : > { %2549 = vmatpush.bf16.msrb.mxu0 %v4003_v15  ;;  %v4346_v15 = vld [vmem:[%s6263_s19 + $0xd4] sm:$0xf0] }
 0x488   : > { %2594 = vmatpush.bf16.msrb.mxu1 %v4039_v25  ;;  %v4303_v25 = vld [vmem:[%s6261_s17 + $0x4] sm:$0xf] }
 0x48c   : > { %2595 = vmatpush.bf16.msrb.mxu1 %v4031_v38 }
 0x490   : > { %2596 = vmatpush.bf16.msrb.mxu1 %v4023_v50 }
 0x496   : > { %v2236_v55 = vpop.f32.mrf.mxu2 }
 0x497   : > { %v2237_v62 = vadd.f32 %v5768_v57, %v2236_v55 }
 0x499   : > { %v2276_v7 = vmax.f32 %v2237_v62, 0.0  ;;  %v4012_v62 = vld [vmem:[%s6261_s17 + $0x28] sm:$0xf0] }
 0x49e   : > { %v2238_v1 = vpop.f32.mrf.mxu2 }
 0x49f   : > { %v2239_v2 = vadd.f32 %v5768_v57, %v2238_v1  ;;  %v4015_v1 = vor.u32 %v4307_v61, %v4012_v62  ;;  %v4111_v61 = vor.u32 %v4331_v54, %v4108_v60  ;;  %v4347_v62 = vld [vmem:[%s6263_s19 + $0xe4] sm:$0xf] }
 0x4a1   : > { %v2277_v8 = vmax.f32 %v2239_v2, 0.0  ;;  %2597 = vmatpush.bf16.msrb.mxu1 %v4015_v1  ;;  %v4172_v1 = vld [vmem:[%s6263_s19 + $0xe8] sm:$0xf0] }
 0x4a3   : > { %v2309_v9 = vpack.c.bf16 %v2277_v8, %v2276_v7 }
 0x4a5   : > { %2376 = vmatmul.bf16.vlgmr.msrb.gmra.mxu3 %v2309_v9 }
 0x4a6   : > { %v2241_v29 = vpop.f32.mrf.mxu2 }
 0x4a7   : > { %v2242_v16 = vadd.f32 %v5768_v57, %v2241_v29 }
 0x4a9   : > { %v2278_v19 = vmax.f32 %v2242_v16, 0.0  ;;  %v4004_v16 = vld [vmem:[%s6261_s17 + $0x18] sm:$0xf0] }
 0x4ae   : > { %v2243_v40 = vpop.f32.mrf.mxu2 }
 0x4af   : > { %v2244_v10 = vadd.f32 %v5768_v57, %v2243_v40  ;;  %v3994_v40 = vld [vmem:[%s6261_s17] sm:$0xf] }
 0x4b1   : > { %v2279_v27 = vmax.f32 %v2244_v10, 0.0  ;;  %v4304_v10 = vld [vmem:[%s6261_s17 + $0x4] sm:$0xf0] }
 0x4b3   : > { %v2310_v20 = vpack.c.bf16 %v2279_v27, %v2278_v19  ;;  %v4007_v19 = vor.u32 %v4305_v41, %v4004_v16  ;;  %v3995_v27 = vor.u32 %v4304_v10, %v3994_v40  ;;  %v4099_v41 = vor.u32 %v4330_v13, %v4098_v12 }
 0x4b5   : > { %2381 = vmatmul.bf16.gmra.mxu3 %v2310_v20  ;;  %2598 = vmatpush.bf16.msrb.mxu1 %v4007_v19  ;;  %v4329_v19 = vld [vmem:[%s6263_s19 + $0x54] sm:$0xf] }
 0x4b6   : > { %v2246_v21 = vpop.f32.mrf.mxu2  ;;  %2550 = vmatpush.bf16.msrb.mxu0 %v3995_v27  ;;  %v4100_v27 = vld [vmem:[%s6263_s19 + $0x58] sm:$0xf0] }
 0x4b7   : > { %v2247_v26 = vadd.f32 %v5768_v57, %v2246_v21 }
 0x4b9   : > { %v2280_v3 = vmax.f32 %v2247_v26, 0.0  ;;  %v3996_v26 = vld [vmem:[%s6261_s17 + $0x8] sm:$0xf0] }
 0x4be   : > { %v2248_v28 = vpop.f32.mrf.mxu2 }
 0x4bf   : > { %v2249_v30 = vadd.f32 %v5768_v57, %v2248_v28  ;;  %v3999_v28 = vor.u32 %v4303_v25, %v3996_v26 }
 0x4c1   : > { %v2281_v31 = vmax.f32 %v2249_v30, 0.0  ;;  %2599 = vmatpush.bf16.msrb.mxu1 %v3999_v28 }
 0x4c3   : > { %v2311_v32 = vpack.c.bf16 %v2281_v31, %v2280_v3 }
 0x4c5   : > { %2386 = vmatmul.bf16.gmra.mxu3 %v2311_v32 }
 0x4c6   : > { %v2251_v6 = vpop.f32.mrf.mxu2 }
 0x4c7   : > { %v2252_v39 = vadd.f32 %v5768_v57, %v2251_v6 }
 0x4c9   : > { %v2282_v44 = vmax.f32 %v2252_v39, 0.0 }
 0x4ce   : > { %v2253_v42 = vpop.f32.mrf.mxu2 }
 0x4cf   : > { %v2254_v43 = vadd.f32 %v5768_v57, %v2253_v42  ;;  %v5897_v42 = vld [vmem:[%s6260_s16] ss:$0 sm:$0xff] }
 0x4d1   : > { %v2283_v0 = vmax.f32 %v2254_v43, 0.0  ;;  %v4333_v43 = vld [vmem:[%s6263_s19 + $0x74] sm:$0xf] }
 0x4d3   : > { %v2312_v4 = vpack.c.bf16 %v2283_v0, %v2282_v44  ;;  %v4116_v44 = vld [vmem:[%s6263_s19 + $0x78] sm:$0xf0] }
 0x4d4   : > { %v4119_v0 = vor.u32 %v4333_v43, %v4116_v44 }
 0x4d5   : > { %2391 = vmatmul.bf16.gmra.mxu3 %v2312_v4  ;;  %v4349_v4 = vld [vmem:[%s6263_s19 + $0xf4] sm:$0xf] }
 0x4d6   : > { %v2256_v36 = vpop.f32.mrf.mxu2  ;;  %2985 = vmatpush.bf16.msra.mxu0 %v4119_v0 }
 0x4d7   : > { %v2257_v51 = vadd.f32 %v5768_v57, %v2256_v36  ;;  %v4180_v36 = vld [vmem:[%s6263_s19 + $0xf8] sm:$0xf0] }
 0x4d8   : > { %v4183_v46 = vor.u32 %v4349_v4, %v4180_v36 }
 0x4d9   : > { %v2284_v17 = vmax.f32 %v2257_v51, 0.0  ;;  %v4106_v51 = vld [vmem:[%s6263_s19 + $0x60] sm:$0xf] }
 0x4da   : > { %3034 = vmatpush.bf16.msra.mxu1 %v4183_v46  ;;  %2986 = vmatpush.bf16.msra.mxu0 %v4111_v61 }
 0x4de   : > { %v2258_v52 = vpop.f32.mrf.mxu2 }
 0x4df   : > { %v2259_v53 = vadd.f32 %v5768_v57, %v2258_v52  ;;  %v4332_v52 = vld [vmem:[%s6263_s19 + $0x64] sm:$0xf0] }
 0x4e1   : > { %v2285_v55 = vmax.f32 %v2259_v53, 0.0  ;;  %v4107_v53 = vor.u32 %v4332_v52, %v4106_v51 }
 0x4e3   : > { %v2313_v58 = vpack.c.bf16 %v2285_v55, %v2284_v17  ;;  %v4170_v17 = vld [vmem:[%s6263_s19 + $0xe0] sm:$0xf]  ;;  %v4348_v55 = vld [vmem:[%s6263_s19 + $0xe4] sm:$0xf0]  ;;  %2888 = vmatpush.bf16.msra.mxu2 %v4107_v53  ;;  %v4325_v53 = vld [vmem:[%s6263_s19 + $0x34] sm:$0xf] }
 0x4e5   : > { %2396 = vmatmul.bf16.gmra.mxu3 %v2313_v58 }
 0x4e6   : > { %v2261_v18 = vpop.f32.mrf.mxu2 }
 0x4e7   : > { %v2262_v2 = vadd.f32 %v5768_v57, %v2261_v18  ;;  %v4171_v18 = vor.u32 %v4348_v55, %v4170_v17  ;;  %2889 = vmatpush.bf16.msra.mxu2 %v4099_v41  ;;  %v4084_v17 = vld [vmem:[%s6263_s19 + $0x38] sm:$0xf0]  ;;  %v4323_v41 = vld [vmem:[%s6263_s19 + $0x24] sm:$0xf] }
 0x4e8   : > { %v4087_v55 = vor.u32 %v4325_v53, %v4084_v17 }
 0x4e9   : > { %v2286_v9 = vmax.f32 %v2262_v2, 0.0  ;;  %v4175_v2 = vor.u32 %v4347_v62, %v4172_v1 }
 0x4eb   : > { %3035 = vmatpush.bf16.msra.mxu1 %v4175_v2 }
 0x4ee   : > { %v2263_v7 = vpop.f32.mrf.mxu2 }
 0x4ef   : > { %v2264_v8 = vadd.f32 %v5768_v57, %v2263_v7 }
 0x4f1   : > { %v2287_v29 = vmax.f32 %v2264_v8, 0.0 }
 0x4f3   : > { %v2314_v11 = vpack.c.bf16 %v2287_v29, %v2286_v9 }
 0x4f5   : > { %2401 = vmatmul.bf16.gmra.mxu3 %v2314_v11 }
 0x4f6   : > { %v2266_v14 = vpop.f32.mrf.mxu2 }
 0x4f7   : > { %v2267_v20 = vadd.f32 %v5768_v57, %v2266_v14  ;;  %v4162_v14 = vld [vmem:[%s6263_s19 + $0xd0] sm:$0xf] }
 0x4f8   : > { %v4163_v40 = vor.u32 %v4346_v15, %v4162_v14  ;;  %v4076_v14 = vld [vmem:[%s6263_s19 + $0x28] sm:$0xf0] }
 0x4f9   : > { %v2288_v22 = vmax.f32 %v2267_v20, 0.0  ;;  %v4103_v20 = vor.u32 %v4329_v19, %v4100_v27  ;;  %v4079_v15 = vor.u32 %v4323_v41, %v4076_v14 }
 0x4fb   : > { %2987 = vmatpush.bf16.msra.mxu0 %v4103_v20 }
 0x4fe   : > { %v2268_v21 = vpop.f32.mrf.mxu2 }
 0x4ff   : > { %v2269_v5 = vadd.f32 %v5768_v57, %v2268_v21  ;;  %v4345_v21 = vld [vmem:[%s6263_s19 + $0xd4] sm:$0xf] }
 0x501   : > { %v2289_v23 = vmax.f32 %v2269_v5, 0.0  ;;  %v4164_v5 = vld [vmem:[%s6263_s19 + $0xd8] sm:$0xf0] }
 0x503   : > { %v2315_v24 = vpack.c.bf16 %v2289_v23, %v2288_v22  ;;  %v4167_v22 = vor.u32 %v4345_v21, %v4164_v5 }
 0x505   : > { %2406 = vmatmul.bf16.gmra.mxu3 %v2315_v24  ;;  %3036 = vmatpush.bf16.msra.mxu1 %v4167_v22 }
 0x506   : > { %v2271_v56 = vpop.f32.mrf.mxu2 }
 0x507   : > { %v2272_v30 = vadd.f32 %v5768_v57, %v2271_v56 }
 0x509   : > { %v2290_v32 = vmax.f32 %v2272_v30, 0.0  ;;  %v4090_v30 = vld [vmem:[%s6263_s19 + $0x40] sm:$0xf] }
 0x50e   : > { %v2273_v3 = vpop.f32.mrf.mxu2 }
 0x50f   : > { %v2274_v31 = vadd.f32 %v5768_v57, %v2273_v3  ;;  %v4350_v57 = vld [vmem:[%s6263_s19 + $0xf4] sm:$0xf0]  ;;  %v4328_v3 = vld [vmem:[%s6263_s19 + $0x44] sm:$0xf0] }
 0x510   : > { %v4179_v38 = vor.u32 %v4350_v57, %v4178_v37  ;;  %v4092_v37 = vld [vmem:[%s6263_s19 + $0x48] sm:$0xf0]  ;;  %v4343_v57 = vld [vmem:[%s6263_s19 + $0xc4] sm:$0xf] }
 0x511   : > { %v2291_v6 = vmax.f32 %v2274_v31, 0.0  ;;  %v4154_v31 = vld [vmem:[%s6263_s19 + $0xc0] sm:$0xf]  ;;  %v4095_v63 = vor.u32 %v4327_v35, %v4092_v37  ;;  %v4320_v35 = vld [vmem:[%s6263_s19 + $0x4] sm:$0xf0] }
 0x512   : > { %2936 = vmatpush.bf16.msra.mxu3 %v4179_v38  ;;  %v4156_v38 = vld [vmem:[%s6263_s19 + $0xc8] sm:$0xf0] }
 0x513   : > { %v2316_v33 = vpack.c.bf16 %v2291_v6, %v2290_v32  ;;  %v4091_v32 = vor.u32 %v4328_v3, %v4090_v30  ;;  %v4344_v6 = vld [vmem:[%s6263_s19 + $0xc4] sm:$0xf0]  ;;  %2988 = vmatpush.bf16.msra.mxu0 %v4095_v63  ;;  %v4321_v30 = vld [vmem:[%s6263_s19 + $0x14] sm:$0xf]  ;;  %v4068_v3 = vld [vmem:[%s6263_s19 + $0x18] sm:$0xf0] }
 0x515   : > { %2411 = vmatmul.bf16.gmra.mxu3 %v2316_v33  ;;  %v4155_v33 = vor.u32 %v4344_v6, %v4154_v31  ;;  %2890 = vmatpush.bf16.msra.mxu2 %v4091_v32  ;;  %v4337_v31 = vld [vmem:[%s6263_s19 + $0x94] sm:$0xf]  ;;  %v4071_v6 = vor.u32 %v4321_v30, %v4068_v3 }
 0x516   : > { %2937 = vmatpush.bf16.msra.mxu3 %v4171_v18  ;;  %v4148_v18 = vld [vmem:[%s6263_s19 + $0xb8] sm:$0xf0] }
 0x517   : > { %2989 = vmatpush.bf16.msra.mxu0 %v4087_v55 }
 0x51a   : > { %2938 = vmatpush.bf16.msra.mxu3 %v4163_v40  ;;  %v4140_v40 = vld [vmem:[%s6263_s19 + $0xa8] sm:$0xf0] }
 0x51b   : > { %2990 = vmatpush.bf16.msra.mxu0 %v4079_v15 }
 0x51e   : > { %2939 = vmatpush.bf16.msra.mxu3 %v4155_v33  ;;  %v4132_v33 = vld [vmem:[%s6263_s19 + $0x98] sm:$0xf0] }
 0x51f   : > { %v4135_v37 = vor.u32 %v4337_v31, %v4132_v33  ;;  %2991 = vmatpush.bf16.msra.mxu0 %v4071_v6 }
 0x528   : > { %v2377_v39 = vpop.f32.mrf.mxu3 }
 0x529   : > { %v2378_v47 = vadd.f32 %v5897_v42, %v2377_v39  ;;  %v4159_v39 = vor.u32 %v4343_v57, %v4156_v38 }
 0x52b   : > { %v2417_v49 = vmax.f32 %v2378_v47, 0.0  ;;  %3037 = vmatpush.bf16.msra.mxu1 %v4159_v39  ;;  %v4082_v47 = vld [vmem:[%s6263_s19 + $0x30] sm:$0xf] }
 0x530   : > { %v2379_v48 = vpop.f32.mrf.mxu3 }
 0x531   : > { %v2380_v45 = vadd.f32 %v5897_v42, %v2379_v48  ;;  %v4326_v48 = vld [vmem:[%s6263_s19 + $0x34] sm:$0xf0] }
 0x533   : > { %v2418_v50 = vmax.f32 %v2380_v45, 0.0  ;;  %v4146_v45 = vld [vmem:[%s6263_s19 + $0xb0] sm:$0xf] }
 0x535   : > { %v2450_v58 = vpack.c.bf16 %v2418_v50, %v2417_v49  ;;  %v4083_v49 = vor.u32 %v4326_v48, %v4082_v47  ;;  %v4342_v50 = vld [vmem:[%s6263_s19 + $0xb4] sm:$0xf0] }
 0x536   : > { %v4147_v51 = vor.u32 %v4342_v50, %v4146_v45  ;;  %v4060_v45 = vld [vmem:[%s6263_s19 + $0x8] sm:$0xf0] }
 0x537   : > { %2551 = vmatmul.bf16.vlgmr.msrb.gmra.mxu0 %v2450_v58  ;;  %2600 = vmatmul.bf16.vlgmr.msrb.gmra.mxu1 %v2450_v58  ;;  %v4341_v58 = vld [vmem:[%s6263_s19 + $0xb4] sm:$0xf]  ;;  %v4124_v50 = vld [vmem:[%s6263_s19 + $0x88] sm:$0xf0] }
 0x538   : > { %v2382_v59 = vpop.f32.mrf.mxu3  ;;  %2891 = vmatpush.bf16.msra.mxu2 %v4083_v49  ;;  %2940 = vmatpush.bf16.msra.mxu3 %v4147_v51  ;;  %v4335_v49 = vld [vmem:[%s6263_s19 + $0x84] sm:$0xf] }
 0x539   : > { %v2383_v7 = vadd.f32 %v5897_v42, %v2382_v59  ;;  %v4151_v59 = vor.u32 %v4341_v58, %v4148_v18 }
 0x53b   : > { %v2419_v29 = vmax.f32 %v2383_v7, 0.0  ;;  %3038 = vmatpush.bf16.msra.mxu1 %v4151_v59  ;;  %v4074_v7 = vld [vmem:[%s6263_s19 + $0x20] sm:$0xf] }
 0x540   : > { %v2384_v8 = vpop.f32.mrf.mxu3 }
 0x541   : > { %v2385_v9 = vadd.f32 %v5897_v42, %v2384_v8  ;;  %v4324_v8 = vld [vmem:[%s6263_s19 + $0x24] sm:$0xf0] }
 0x543   : > { %v2420_v11 = vmax.f32 %v2385_v9, 0.0  ;;  %v4138_v9 = vld [vmem:[%s6263_s19 + $0xa0] sm:$0xf] }
 0x545   : > { %v2451_v16 = vpack.c.bf16 %v2420_v11, %v2419_v29  ;;  %v4075_v29 = vor.u32 %v4324_v8, %v4074_v7  ;;  %v4340_v11 = vld [vmem:[%s6263_s19 + $0xa4] sm:$0xf0] }
 0x546   : > { %v4139_v12 = vor.u32 %v4340_v11, %v4138_v9 }
 0x547   : > { %2556 = vmatmul.bf16.gmra.mxu0 %v2451_v16  ;;  %2605 = vmatmul.bf16.gmra.mxu1 %v2451_v16  ;;  %v4339_v16 = vld [vmem:[%s6263_s19 + $0xa4] sm:$0xf] }
 0x548   : > { %v2387_v10 = vpop.f32.mrf.mxu3  ;;  %2892 = vmatpush.bf16.msra.mxu2 %v4075_v29  ;;  %2941 = vmatpush.bf16.msra.mxu3 %v4139_v12 }
 0x549   : > { %v2388_v23 = vadd.f32 %v5897_v42, %v2387_v10  ;;  %v4143_v10 = vor.u32 %v4339_v16, %v4140_v40 }
 0x54b   : > { %v2421_v25 = vmax.f32 %v2388_v23, 0.0  ;;  %3039 = vmatpush.bf16.msra.mxu1 %v4143_v10  ;;  %v4066_v23 = vld [vmem:[%s6263_s19 + $0x10] sm:$0xf] }
 0x54f   : > { %3040 = vmatpush.bf16.msra.mxu1 %v4135_v37 }
 0x550   : > { %v2389_v24 = vpop.f32.mrf.mxu3 }
 0x551   : > { %v2390_v56 = vadd.f32 %v5897_v42, %v2389_v24  ;;  %v4322_v24 = vld [vmem:[%s6263_s19 + $0x14] sm:$0xf0] }
 0x553   : > { %v2422_v26 = vmax.f32 %v2390_v56, 0.0  ;;  %v4130_v56 = vld [vmem:[%s6263_s19 + $0x90] sm:$0xf] }
 0x555   : > { %v2452_v28 = vpack.c.bf16 %v2422_v26, %v2421_v25  ;;  %v4067_v25 = vor.u32 %v4322_v24, %v4066_v23  ;;  %v4338_v26 = vld [vmem:[%s6263_s19 + $0x94] sm:$0xf0] }
 0x557   : > { %2561 = vmatmul.bf16.gmra.mxu0 %v2452_v28  ;;  %2610 = vmatmul.bf16.gmra.mxu1 %v2452_v28  ;;  %v4131_v28 = vor.u32 %v4338_v26, %v4130_v56 }
 0x558   : > { %v2392_v34 = vpop.f32.mrf.mxu3  ;;  %2893 = vmatpush.bf16.msra.mxu2 %v4067_v25 }
 0x559   : > { %v2393_v43 = vadd.f32 %v5897_v42, %v2392_v34  ;;  %v4058_v34 = vld [vmem:[%s6263_s19] sm:$0xf]  ;;  %2942 = vmatpush.bf16.msra.mxu3 %v4131_v28 }
 0x55a   : > { %v4059_v63 = vor.u32 %v4320_v35, %v4058_v34 }
 0x55b   : > { %v2423_v4 = vmax.f32 %v2393_v43, 0.0 }
 0x55c   : > { %2894 = vmatpush.bf16.msra.mxu2 %v4059_v63 }
 0x560   : > { %v2394_v44 = vpop.f32.mrf.mxu3 }
 0x561   : > { %v2395_v0 = vadd.f32 %v5897_v42, %v2394_v44 }
 0x563   : > { %v2424_v36 = vmax.f32 %v2395_v0, 0.0 }
 0x565   : > { %v2453_v46 = vpack.c.bf16 %v2424_v36, %v2423_v4  ;;  %v4122_v4 = vld [vmem:[%s6263_s19 + $0x80] sm:$0xf]  ;;  %v4336_v36 = vld [vmem:[%s6263_s19 + $0x84] sm:$0xf0] }
 0x566   : > { %v4123_v48 = vor.u32 %v4336_v36, %v4122_v4 }
 0x567   : > { %2566 = vmatmul.bf16.gmra.mxu0 %v2453_v46  ;;  %2615 = vmatmul.bf16.gmra.mxu1 %v2453_v46  ;;  %v4319_v46 = vld [vmem:[%s6263_s19 + $0x4] sm:$0xf] }
 0x568   : > { %v2397_v52 = vpop.f32.mrf.mxu3  ;;  %v4063_v51 = vor.u32 %v4319_v46, %v4060_v45  ;;  %2943 = vmatpush.bf16.msra.mxu3 %v4123_v48 }
 0x569   : > { %v2398_v54 = vadd.f32 %v5897_v42, %v2397_v52  ;;  %v4127_v52 = vor.u32 %v4335_v49, %v4124_v50 }
 0x56a   : > { %2992 = vmatpush.bf16.msra.mxu0 %v4063_v51 }
 0x56b   : > { %v2425_v62 = vmax.f32 %v2398_v54, 0.0  ;;  %3041 = vmatpush.bf16.msra.mxu1 %v4127_v52  ;;  %v2449_v54 = vld [vmem:[%s6262_s18] sm:$0x3] }
 0x570   : > { %v2399_v60 = vpop.f32.mrf.mxu3 }
 0x571   : > { %v2400_v61 = vadd.f32 %v5897_v42, %v2399_v60 }
 0x573   : > { %v2426_v1 = vmax.f32 %v2400_v61, 0.0 }
 0x575   : > { %v2454_v2 = vpack.c.bf16 %v2426_v1, %v2425_v62  ;;  %v6098_v62 = vperm.slane %v2449_v54, 0  ;;  %v6100_v1 = vperm.slane %v2449_v54, 1 }
 0x577   : > { %2571 = vmatmul.bf16.gmra.mxu0 %v2454_v2  ;;  %2620 = vmatmul.bf16.gmra.mxu1 %v2454_v2 }
 0x578   : > { %v2402_v13 = vpop.f32.mrf.mxu3 }
 0x579   : > { %v2403_v19 = vadd.f32 %v5897_v42, %v2402_v13 }
 0x57b   : > { %v2427_v21 = vmax.f32 %v2403_v19, 0.0 }
 0x580   : > { %v2404_v27 = vpop.f32.mrf.mxu3 }
 0x581   : > { %v2405_v20 = vadd.f32 %v5897_v42, %v2404_v27 }
 0x583   : > { %v2428_v5 = vmax.f32 %v2405_v20, 0.0 }
 0x585   : > { %v2455_v22 = vpack.c.bf16 %v2428_v5, %v2427_v21 }
 0x587   : > { %2576 = vmatmul.bf16.gmra.mxu0 %v2455_v22  ;;  %2625 = vmatmul.bf16.gmra.mxu1 %v2455_v22 }
 0x588   : > { %v2407_v32 = vpop.f32.mrf.mxu3 }
 0x589   : > { %v2408_v57 = vadd.f32 %v5897_v42, %v2407_v32 }
 0x58b   : > { %v2429_v43 = vmax.f32 %v2408_v57, 0.0 }
 0x590   : > { %v2409_v38 = vpop.f32.mrf.mxu3 }
 0x591   : > { %v2410_v39 = vadd.f32 %v5897_v42, %v2409_v38 }
 0x593   : > { %v2430_v44 = vmax.f32 %v2410_v39, 0.0 }
 0x595   : > { %v2456_v0 = vpack.c.bf16 %v2430_v44, %v2429_v43 }
 0x597   : > { %2581 = vmatmul.bf16.gmra.mxu0 %v2456_v0  ;;  %2630 = vmatmul.bf16.gmra.mxu1 %v2456_v0 }
 0x598   : > { %v2412_v47 = vpop.f32.mrf.mxu3 }
 0x599   : > { %v2413_v53 = vadd.f32 %v5897_v42, %v2412_v47 }
 0x59b   : > { %v2431_v58 = vmax.f32 %v2413_v53, 0.0 }
 0x5a0   : > { %v2414_v17 = vpop.f32.mrf.mxu3 }
 0x5a1   : > { %v2415_v55 = vadd.f32 %v5897_v42, %v2414_v17 }
 0x5a3   : > { %v2432_v18 = vmax.f32 %v2415_v55, 0.0 }
 0x5a5   : > { %v2457_v59 = vpack.c.bf16 %v2432_v18, %v2431_v58 }
 0x5a7   : > { %2586 = vmatmul.bf16.gmra.mxu0 %v2457_v59  ;;  %2635 = vmatmul.bf16.gmra.mxu1 %v2457_v59 }
 0x5b4   : > { %v2552_v60 = vpop.f32.mrf.mxu0  ;;  %v2601_v61 = vpop.f32.mrf.mxu1 }
 0x5b5   : > { %v2553_v2 = vadd.f32 %v2552_v60, %v6098_v62  ;;  %v2602_v7 = vadd.f32 %v2601_v61, %v6100_v1 }
 0x5b7   : > { %v2641_v11 = vmax.f32 %v2553_v2, 0.0  ;;  %v2642_v12 = vmax.f32 %v2602_v7, 0.0 }
 0x5bc   : > { %v2554_v42 = vpop.f32.mrf.mxu0  ;;  %v2603_v8 = vpop.f32.mrf.mxu1 }
 0x5bd   : > { %v2555_v9 = vadd.f32 %v2554_v42, %v6098_v62  ;;  %v2604_v29 = vadd.f32 %v2603_v8, %v6100_v1 }
 0x5bf   : > { %v2643_v13 = vmax.f32 %v2555_v9, 0.0  ;;  %v2644_v41 = vmax.f32 %v2604_v29, 0.0 }
 0x5c1   : > { %v2706_v14 = vpack.c.bf16 %v2643_v13, %v2641_v11  ;;  %v2707_v15 = vpack.c.bf16 %v2644_v41, %v2642_v12 }
 0x5c3   : > { %2895 = vmatmul.bf16.vlgmr.msra.gmra.mxu2 %v2706_v14  ;;  %2944 = vmatmul.bf16.vlgmr.msra.gmra.mxu3 %v2707_v15 }
 0x5c4   : > { %2993 = vmatmul.bf16.vlgmr.msra.gmra.mxu0 %v2706_v14  ;;  %3042 = vmatmul.bf16.vlgmr.msra.gmra.mxu1 %v2707_v15  ;;  %v2557_v16 = vpop.f32.mrf.mxu0  ;;  %v2606_v40 = vpop.f32.mrf.mxu1 }
 0x5c5   : > { %v2558_v10 = vadd.f32 %v2557_v16, %v6098_v62  ;;  %v2607_v19 = vadd.f32 %v2606_v40, %v6100_v1 }
 0x5c7   : > { %v2645_v22 = vmax.f32 %v2558_v10, 0.0  ;;  %v2646_v23 = vmax.f32 %v2607_v19, 0.0 }
 0x5cc   : > { %v2559_v27 = vpop.f32.mrf.mxu0  ;;  %v2608_v20 = vpop.f32.mrf.mxu1 }
 0x5cd   : > { %v2560_v21 = vadd.f32 %v2559_v27, %v6098_v62  ;;  %v2609_v5 = vadd.f32 %v2608_v20, %v6100_v1 }
 0x5cf   : > { %v2647_v24 = vmax.f32 %v2560_v21, 0.0  ;;  %v2648_v56 = vmax.f32 %v2609_v5, 0.0 }
 0x5d1   : > { %v2708_v25 = vpack.c.bf16 %v2647_v24, %v2645_v22  ;;  %v2709_v26 = vpack.c.bf16 %v2648_v56, %v2646_v23 }
 0x5d3   : > { %2900 = vmatmul.bf16.gmra.mxu2 %v2708_v25  ;;  %2949 = vmatmul.bf16.gmra.mxu3 %v2709_v26 }
 0x5d4   : > { %2998 = vmatmul.bf16.gmra.mxu0 %v2708_v25  ;;  %3047 = vmatmul.bf16.gmra.mxu1 %v2709_v26  ;;  %v2562_v28 = vpop.f32.mrf.mxu0  ;;  %v2611_v30 = vpop.f32.mrf.mxu1 }
 0x5d5   : > { %v2563_v3 = vadd.f32 %v2562_v28, %v6098_v62  ;;  %v2612_v31 = vadd.f32 %v2611_v30, %v6100_v1 }
 0x5d7   : > { %v2649_v35 = vmax.f32 %v2563_v3, 0.0  ;;  %v2650_v37 = vmax.f32 %v2612_v31, 0.0 }
 0x5dc   : > { %v2564_v32 = vpop.f32.mrf.mxu0  ;;  %v2613_v6 = vpop.f32.mrf.mxu1 }
 0x5dd   : > { %v2565_v33 = vadd.f32 %v2564_v32, %v6098_v62  ;;  %v2614_v34 = vadd.f32 %v2613_v6, %v6100_v1 }
 0x5df   : > { %v2651_v63 = vmax.f32 %v2565_v33, 0.0  ;;  %v2652_v57 = vmax.f32 %v2614_v34, 0.0 }
 0x5e1   : > { %v2710_v38 = vpack.c.bf16 %v2651_v63, %v2649_v35  ;;  %v2711_v39 = vpack.c.bf16 %v2652_v57, %v2650_v37 }
 0x5e3   : > { %2905 = vmatmul.bf16.gmra.mxu2 %v2710_v38  ;;  %2954 = vmatmul.bf16.gmra.mxu3 %v2711_v39 }
 0x5e4   : > { %3003 = vmatmul.bf16.gmra.mxu0 %v2710_v38  ;;  %3052 = vmatmul.bf16.gmra.mxu1 %v2711_v39  ;;  %v2567_v43 = vpop.f32.mrf.mxu0  ;;  %v2616_v44 = vpop.f32.mrf.mxu1 }
 0x5e5   : > { %v2568_v0 = vadd.f32 %v2567_v43, %v6098_v62  ;;  %v2617_v4 = vadd.f32 %v2616_v44, %v6100_v1 }
 0x5e7   : > { %v2653_v45 = vmax.f32 %v2568_v0, 0.0  ;;  %v2654_v49 = vmax.f32 %v2617_v4, 0.0 }
 0x5ec   : > { %v2569_v36 = vpop.f32.mrf.mxu0  ;;  %v2618_v46 = vpop.f32.mrf.mxu1 }
 0x5ed   : > { %v2570_v47 = vadd.f32 %v2569_v36, %v6098_v62  ;;  %v2619_v48 = vadd.f32 %v2618_v46, %v6100_v1 }
 0x5ef   : > { %v2655_v50 = vmax.f32 %v2570_v47, 0.0  ;;  %v2656_v51 = vmax.f32 %v2619_v48, 0.0 }
 0x5f1   : > { %v2712_v52 = vpack.c.bf16 %v2655_v50, %v2653_v45  ;;  %v2713_v53 = vpack.c.bf16 %v2656_v51, %v2654_v49  ;;  %v2705_v45 = vld [vmem:[%s6264_s20] sm:$0x3] }
 0x5f2   : > { %v6137_v49 = vperm.slane %v2705_v45, 1  ;;  %v6140_v51 = vperm.slane %v2705_v45, 0 }
 0x5f3   : > { %2910 = vmatmul.bf16.gmra.mxu2 %v2712_v52  ;;  %2959 = vmatmul.bf16.gmra.mxu3 %v2713_v53 }
 0x5f4   : > { %3008 = vmatmul.bf16.gmra.mxu0 %v2712_v52  ;;  %3057 = vmatmul.bf16.gmra.mxu1 %v2713_v53  ;;  %v2572_v17 = vpop.f32.mrf.mxu0  ;;  %v2621_v55 = vpop.f32.mrf.mxu1 }
 0x5f5   : > { %v2573_v58 = vadd.f32 %v2572_v17, %v6098_v62  ;;  %v2622_v18 = vadd.f32 %v2621_v55, %v6100_v1 }
 0x5f7   : > { %v2657_v2 = vmax.f32 %v2573_v58, 0.0  ;;  %v2658_v7 = vmax.f32 %v2622_v18, 0.0 }
 0x5fc   : > { %v2574_v59 = vpop.f32.mrf.mxu0  ;;  %v2623_v54 = vpop.f32.mrf.mxu1 }
 0x5fd   : > { %v2575_v60 = vadd.f32 %v2574_v59, %v6098_v62  ;;  %v2624_v61 = vadd.f32 %v2623_v54, %v6100_v1 }
 0x5ff   : > { %v2659_v42 = vmax.f32 %v2575_v60, 0.0  ;;  %v2660_v8 = vmax.f32 %v2624_v61, 0.0 }
 0x601   : > { %v2714_v9 = vpack.c.bf16 %v2659_v42, %v2657_v2  ;;  %v2715_v29 = vpack.c.bf16 %v2660_v8, %v2658_v7 }
 0x603   : > { %2915 = vmatmul.bf16.gmra.mxu2 %v2714_v9  ;;  %2964 = vmatmul.bf16.gmra.mxu3 %v2715_v29 }
 0x604   : > { %3013 = vmatmul.bf16.gmra.mxu0 %v2714_v9  ;;  %3062 = vmatmul.bf16.gmra.mxu1 %v2715_v29  ;;  %v2577_v11 = vpop.f32.mrf.mxu0  ;;  %v2626_v12 = vpop.f32.mrf.mxu1 }
 0x605   : > { %v2578_v13 = vadd.f32 %v2577_v11, %v6098_v62  ;;  %v2627_v41 = vadd.f32 %v2626_v12, %v6100_v1 }
 0x607   : > { %v2661_v10 = vmax.f32 %v2578_v13, 0.0  ;;  %v2662_v19 = vmax.f32 %v2627_v41, 0.0 }
 0x60c   : > { %v2579_v14 = vpop.f32.mrf.mxu0  ;;  %v2628_v15 = vpop.f32.mrf.mxu1 }
 0x60d   : > { %v2580_v16 = vadd.f32 %v2579_v14, %v6098_v62  ;;  %v2629_v40 = vadd.f32 %v2628_v15, %v6100_v1 }
 0x60f   : > { %v2663_v27 = vmax.f32 %v2580_v16, 0.0  ;;  %v2664_v20 = vmax.f32 %v2629_v40, 0.0 }
 0x611   : > { %v2716_v21 = vpack.c.bf16 %v2663_v27, %v2661_v10  ;;  %v2717_v5 = vpack.c.bf16 %v2664_v20, %v2662_v19 }
 0x613   : > { %2920 = vmatmul.bf16.gmra.mxu2 %v2716_v21  ;;  %2969 = vmatmul.bf16.gmra.mxu3 %v2717_v5 }
 0x614   : > { %3018 = vmatmul.bf16.gmra.mxu0 %v2716_v21  ;;  %3067 = vmatmul.bf16.gmra.mxu1 %v2717_v5  ;;  %v2582_v22 = vpop.f32.mrf.mxu0  ;;  %v2631_v23 = vpop.f32.mrf.mxu1 }
 0x615   : > { %v2583_v24 = vadd.f32 %v2582_v22, %v6098_v62  ;;  %v2632_v56 = vadd.f32 %v2631_v23, %v6100_v1 }
 0x617   : > { %v2665_v3 = vmax.f32 %v2583_v24, 0.0  ;;  %v2666_v31 = vmax.f32 %v2632_v56, 0.0 }
 0x61c   : > { %v2584_v25 = vpop.f32.mrf.mxu0  ;;  %v2633_v26 = vpop.f32.mrf.mxu1 }
 0x61d   : > { %v2585_v28 = vadd.f32 %v2584_v25, %v6098_v62  ;;  %v2634_v30 = vadd.f32 %v2633_v26, %v6100_v1 }
 0x61f   : > { %v2667_v32 = vmax.f32 %v2585_v28, 0.0  ;;  %v2668_v6 = vmax.f32 %v2634_v30, 0.0 }
 0x621   : > { %v2718_v33 = vpack.c.bf16 %v2667_v32, %v2665_v3  ;;  %v2719_v34 = vpack.c.bf16 %v2668_v6, %v2666_v31 }
 0x623   : > { %2925 = vmatmul.bf16.gmra.mxu2 %v2718_v33  ;;  %2974 = vmatmul.bf16.gmra.mxu3 %v2719_v34 }
 0x624   : > { %3023 = vmatmul.bf16.gmra.mxu0 %v2718_v33  ;;  %3072 = vmatmul.bf16.gmra.mxu1 %v2719_v34  ;;  %v2587_v35 = vpop.f32.mrf.mxu0  ;;  %v2636_v37 = vpop.f32.mrf.mxu1 }
 0x625   : > { %v2588_v63 = vadd.f32 %v2587_v35, %v6098_v62  ;;  %v2637_v57 = vadd.f32 %v2636_v37, %v6100_v1 }
 0x627   : > { %v2669_v0 = vmax.f32 %v2588_v63, 0.0  ;;  %v2670_v4 = vmax.f32 %v2637_v57, 0.0 }
 0x62c   : > { %v2589_v38 = vpop.f32.mrf.mxu0  ;;  %v2638_v39 = vpop.f32.mrf.mxu1 }
 0x62d   : > { %v2590_v43 = vadd.f32 %v2589_v38, %v6098_v62  ;;  %v2639_v44 = vadd.f32 %v2638_v39, %v6100_v1 }
 0x62f   : > { %v2671_v36 = vmax.f32 %v2590_v43, 0.0  ;;  %v2672_v46 = vmax.f32 %v2639_v44, 0.0 }
 0x631   : > { %v2720_v47 = vpack.c.bf16 %v2671_v36, %v2669_v0  ;;  %v2721_v48 = vpack.c.bf16 %v2672_v46, %v2670_v4 }
 0x633   : > { %2930 = vmatmul.bf16.gmra.mxu2 %v2720_v47  ;;  %2979 = vmatmul.bf16.gmra.mxu3 %v2721_v48 }
 0x634   : > { %3028 = vmatmul.bf16.gmra.mxu0 %v2720_v47  ;;  %3077 = vmatmul.bf16.gmra.mxu1 %v2721_v48 }
 0x641   : > { %v2994_v50 = vpop.f32.mrf.mxu0  ;;  %v3043_v62 = vpop.f32.mrf.mxu1 }
 0x642   : > { %v2995_v1 = vadd.f32 %v2994_v50, %v6137_v49 }
 0x644   : > { %v3044_v52 = vadd.f32 %v3043_v62, %v2995_v1 }
 0x646   : > { %v3084_v53 = vsub.f32 0.0, %v3044_v52  ;;  %v2896_v17 = vpop.f32.mrf.mxu2  ;;  %v2945_v55 = vpop.f32.mrf.mxu3 }
 0x647   : > { %v2897_v58 = vadd.f32 %v2896_v17, %v6140_v51 }
 0x648   : > { %v3117_v18 = vmul.f32 1.442695, %v3084_v53 }
 0x649   : > { %v2946_v59 = vadd.f32 %v2945_v55, %v2897_v58  ;;  %v2996_v54 = vpop.f32.mrf.mxu0  ;;  %v3045_v60 = vpop.f32.mrf.mxu1 }
 0x64a   : > { %4520 = vpow2.f32 %v3117_v18  ;;  %v2997_v61 = vadd.f32 %v2996_v54, %v6137_v49 }
 0x64b   : > { %v3083_v2 = vsub.f32 0.0, %v2946_v59 }
 0x64c   : > { %v3046_v7 = vadd.f32 %v3045_v60, %v2997_v61 }
 0x64d   : > { %v3115_v42 = vmul.f32 1.442695, %v3083_v2 }
 0x64e   : > { %v3086_v8 = vsub.f32 0.0, %v3046_v7  ;;  %v2898_v9 = vpop.f32.mrf.mxu2  ;;  %v2947_v29 = vpop.f32.mrf.mxu3 }
 0x64f   : > { %4522 = vpow2.f32 %v3115_v42  ;;  %v2899_v11 = vadd.f32 %v2898_v9, %v6140_v51 }
 0x650   : > { %v4521_v12 = vpop.eup %4520  ;;  %v3121_v13 = vmul.f32 1.442695, %v3086_v8 }
 0x651   : > { %v3180_v41 = vadd.f32 1.0, %v4521_v12  ;;  %v2948_v14 = vadd.f32 %v2947_v29, %v2899_v11  ;;  %v2999_v15 = vpop.f32.mrf.mxu0  ;;  %v3048_v16 = vpop.f32.mrf.mxu1 }
 0x652   : > { %4524 = vpow2.f32 %v3121_v13  ;;  %v3000_v40 = vadd.f32 %v2999_v15, %v6137_v49 }
 0x653   : > { %4526 = vrcp.f32 %v3180_v41  ;;  %v3085_v10 = vsub.f32 0.0, %v2948_v14 }
 0x654   : > { %v3049_v19 = vadd.f32 %v3048_v16, %v3000_v40 }
 0x655   : > { %v4523_v27 = vpop.eup %4522  ;;  %v3119_v20 = vmul.f32 1.442695, %v3085_v10 }
 0x656   : > { %v3179_v21 = vadd.f32 1.0, %v4523_v27  ;;  %v3088_v5 = vsub.f32 0.0, %v3049_v19  ;;  %v2901_v22 = vpop.f32.mrf.mxu2  ;;  %v2950_v23 = vpop.f32.mrf.mxu3 }
 0x657   : > { %4528 = vpow2.f32 %v3119_v20  ;;  %v2902_v24 = vadd.f32 %v2901_v22, %v6140_v51 }
 0x658   : > { %v4525_v56 = vpop.eup %4524  ;;  %4530 = vrcp.f32 %v3179_v21  ;;  %v3125_v25 = vmul.f32 1.442695, %v3088_v5 }
 0x659   : > { %v4527_v26 = vpop.eup %4526  ;;  %v3182_v28 = vadd.f32 1.0, %v4525_v56  ;;  %v2951_v30 = vadd.f32 %v2950_v23, %v2902_v24  ;;  %v3001_v3 = vpop.f32.mrf.mxu0 }
 0x65a   : > { %v3050_v31 = vpop.f32.mrf.mxu1  ;;  %v3244_v32 = vmax.f32 %v4527_v26, 0.0  ;;  %4532 = vpow2.f32 %v3125_v25  ;;  %v3002_v6 = vadd.f32 %v3001_v3, %v6137_v49 }
 0x65b   : > { %4534 = vrcp.f32 %v3182_v28  ;;  %v3087_v33 = vsub.f32 0.0, %v2951_v30 }
 0x65c   : > { %v3276_v34 = vmin.f32 %v3244_v32, 1.0  ;;  %v3051_v35 = vadd.f32 %v3050_v31, %v3002_v6 }
 0x65d   : > { %v4529_v37 = vpop.eup %4528  ;;  %v3123_v63 = vmul.f32 1.442695, %v3087_v33 }
 0x65e   : > { %v4531_v57 = vpop.eup %4530  ;;  %3308 = vst [vmem:[%s6151_s6 + $0x8] sm:$0xff] %v3276_v34  ;;  %v3181_v38 = vadd.f32 1.0, %v4529_v37  ;;  %v3090_v39 = vsub.f32 0.0, %v3051_v35  ;;  %v2903_v43 = vpop.f32.mrf.mxu2 }
 0x65f   : > { %v2952_v44 = vpop.f32.mrf.mxu3  ;;  %v3243_v0 = vmax.f32 %v4531_v57, 0.0  ;;  %4536 = vpow2.f32 %v3123_v63  ;;  %v2904_v4 = vadd.f32 %v2903_v43, %v6140_v51 }
 0x660   : > { %v4533_v36 = vpop.eup %4532  ;;  %4538 = vrcp.f32 %v3181_v38  ;;  %v3129_v46 = vmul.f32 1.442695, %v3090_v39 }
 0x661   : > { %v4535_v47 = vpop.eup %4534  ;;  %v3275_v48 = vmin.f32 %v3243_v0, 1.0  ;;  %v3184_v45 = vadd.f32 1.0, %v4533_v36  ;;  %v2953_v50 = vadd.f32 %v2952_v44, %v2904_v4  ;;  %v3004_v62 = vpop.f32.mrf.mxu0 }
 0x662   : > { %v3053_v1 = vpop.f32.mrf.mxu1  ;;  %v3246_v52 = vmax.f32 %v4535_v47, 0.0  ;;  %4540 = vpow2.f32 %v3129_v46  ;;  %v3005_v53 = vadd.f32 %v3004_v62, %v6137_v49 }
 0x663   : > { %3307 = vst [vmem:[%s6151_s6] sm:$0xff] %v3275_v48  ;;  %4542 = vrcp.f32 %v3184_v45  ;;  %v3089_v17 = vsub.f32 0.0, %v2953_v50 }
 0x664   : > { %v3278_v55 = vmin.f32 %v3246_v52, 1.0  ;;  %v3054_v58 = vadd.f32 %v3053_v1, %v3005_v53 }
 0x665   : > { %v4537_v18 = vpop.eup %4536  ;;  %v3127_v59 = vmul.f32 1.442695, %v3089_v17 }
 0x666   : > { %v4539_v54 = vpop.eup %4538  ;;  %3310 = vst [vmem:[%s6151_s6 + $0x18] sm:$0xff] %v3278_v55  ;;  %v3183_v60 = vadd.f32 1.0, %v4537_v18  ;;  %v3092_v61 = vsub.f32 0.0, %v3054_v58  ;;  %v2906_v2 = vpop.f32.mrf.mxu2 }
 0x667   : > { %v2955_v7 = vpop.f32.mrf.mxu3  ;;  %v3245_v42 = vmax.f32 %v4539_v54, 0.0  ;;  %4544 = vpow2.f32 %v3127_v59  ;;  %v2907_v8 = vadd.f32 %v2906_v2, %v6140_v51 }
 0x668   : > { %v4541_v9 = vpop.eup %4540  ;;  %4546 = vrcp.f32 %v3183_v60  ;;  %v3133_v29 = vmul.f32 1.442695, %v3092_v61 }
 0x669   : > { %v4543_v11 = vpop.eup %4542  ;;  %v3277_v12 = vmin.f32 %v3245_v42, 1.0  ;;  %v3186_v13 = vadd.f32 1.0, %v4541_v9  ;;  %v2956_v41 = vadd.f32 %v2955_v7, %v2907_v8  ;;  %v3006_v14 = vpop.f32.mrf.mxu0 }
 0x66a   : > { %v3055_v15 = vpop.f32.mrf.mxu1  ;;  %v3248_v16 = vmax.f32 %v4543_v11, 0.0  ;;  %4548 = vpow2.f32 %v3133_v29  ;;  %v3007_v40 = vadd.f32 %v3006_v14, %v6137_v49 }
 0x66b   : > { %3309 = vst [vmem:[%s6151_s6 + $0x10] sm:$0xff] %v3277_v12  ;;  %4550 = vrcp.f32 %v3186_v13  ;;  %v3091_v10 = vsub.f32 0.0, %v2956_v41 }
 0x66c   : > { %v3280_v19 = vmin.f32 %v3248_v16, 1.0  ;;  %v3056_v27 = vadd.f32 %v3055_v15, %v3007_v40 }
 0x66d   : > { %v4545_v20 = vpop.eup %4544  ;;  %v3131_v21 = vmul.f32 1.442695, %v3091_v10 }
 0x66e   : > { %v4547_v5 = vpop.eup %4546  ;;  %3312 = vst [vmem:[%s6151_s6 + $0x28] sm:$0xff] %v3280_v19  ;;  %v3185_v22 = vadd.f32 1.0, %v4545_v20  ;;  %v3094_v23 = vsub.f32 0.0, %v3056_v27  ;;  %v2908_v24 = vpop.f32.mrf.mxu2 }
 0x66f   : > { %v2957_v56 = vpop.f32.mrf.mxu3  ;;  %v3247_v25 = vmax.f32 %v4547_v5, 0.0  ;;  %4552 = vpow2.f32 %v3131_v21  ;;  %v2909_v26 = vadd.f32 %v2908_v24, %v6140_v51 }
 0x670   : > { %v4549_v28 = vpop.eup %4548  ;;  %4554 = vrcp.f32 %v3185_v22  ;;  %v3137_v30 = vmul.f32 1.442695, %v3094_v23 }
 0x671   : > { %v4551_v3 = vpop.eup %4550  ;;  %v3279_v31 = vmin.f32 %v3247_v25, 1.0  ;;  %v3188_v32 = vadd.f32 1.0, %v4549_v28  ;;  %v2958_v6 = vadd.f32 %v2957_v56, %v2909_v26  ;;  %v3009_v33 = vpop.f32.mrf.mxu0 }
 0x672   : > { %v3058_v34 = vpop.f32.mrf.mxu1  ;;  %v3250_v35 = vmax.f32 %v4551_v3, 0.0  ;;  %4556 = vpow2.f32 %v3137_v30  ;;  %v3010_v37 = vadd.f32 %v3009_v33, %v6137_v49 }
 0x673   : > { %3311 = vst [vmem:[%s6151_s6 + $0x20] sm:$0xff] %v3279_v31  ;;  %4558 = vrcp.f32 %v3188_v32  ;;  %v3093_v63 = vsub.f32 0.0, %v2958_v6 }
 0x674   : > { %v3282_v57 = vmin.f32 %v3250_v35, 1.0  ;;  %v3059_v38 = vadd.f32 %v3058_v34, %v3010_v37 }
 0x675   : > { %v4553_v39 = vpop.eup %4552  ;;  %v3135_v43 = vmul.f32 1.442695, %v3093_v63 }
 0x676   : > { %v4555_v44 = vpop.eup %4554  ;;  %3314 = vst [vmem:[%s6151_s6 + $0x38] sm:$0xff] %v3282_v57  ;;  %v3187_v0 = vadd.f32 1.0, %v4553_v39  ;;  %v3096_v4 = vsub.f32 0.0, %v3059_v38  ;;  %v2911_v36 = vpop.f32.mrf.mxu2 }
 0x677   : > { %v2960_v46 = vpop.f32.mrf.mxu3  ;;  %v3249_v47 = vmax.f32 %v4555_v44, 0.0  ;;  %4560 = vpow2.f32 %v3135_v43  ;;  %v2912_v48 = vadd.f32 %v2911_v36, %v6140_v51 }
 0x678   : > { %v4557_v45 = vpop.eup %4556  ;;  %4562 = vrcp.f32 %v3187_v0  ;;  %v3141_v50 = vmul.f32 1.442695, %v3096_v4 }
 0x679   : > { %v4559_v62 = vpop.eup %4558  ;;  %v3281_v1 = vmin.f32 %v3249_v47, 1.0  ;;  %v3190_v52 = vadd.f32 1.0, %v4557_v45  ;;  %v2961_v53 = vadd.f32 %v2960_v46, %v2912_v48  ;;  %v3011_v17 = vpop.f32.mrf.mxu0 }
 0x67a   : > { %v3060_v55 = vpop.f32.mrf.mxu1  ;;  %v3252_v58 = vmax.f32 %v4559_v62, 0.0  ;;  %4564 = vpow2.f32 %v3141_v50  ;;  %v3012_v18 = vadd.f32 %v3011_v17, %v6137_v49 }
 0x67b   : > { %3313 = vst [vmem:[%s6151_s6 + $0x30] sm:$0xff] %v3281_v1  ;;  %4566 = vrcp.f32 %v3190_v52  ;;  %v3095_v59 = vsub.f32 0.0, %v2961_v53 }
 0x67c   : > { %v3284_v54 = vmin.f32 %v3252_v58, 1.0  ;;  %v3061_v60 = vadd.f32 %v3060_v55, %v3012_v18 }
 0x67d   : > { %v4561_v61 = vpop.eup %4560  ;;  %v3139_v2 = vmul.f32 1.442695, %v3095_v59 }
 0x67e   : > { %v4563_v7 = vpop.eup %4562  ;;  %3316 = vst [vmem:[%s6151_s6 + $0x48] sm:$0xff] %v3284_v54  ;;  %v3189_v42 = vadd.f32 1.0, %v4561_v61  ;;  %v3098_v8 = vsub.f32 0.0, %v3061_v60  ;;  %v2913_v9 = vpop.f32.mrf.mxu2 }
 0x67f   : > { %v2962_v29 = vpop.f32.mrf.mxu3  ;;  %v3251_v11 = vmax.f32 %v4563_v7, 0.0  ;;  %4568 = vpow2.f32 %v3139_v2  ;;  %v2914_v12 = vadd.f32 %v2913_v9, %v6140_v51 }
 0x680   : > { %v4565_v13 = vpop.eup %4564  ;;  %4570 = vrcp.f32 %v3189_v42  ;;  %v3145_v41 = vmul.f32 1.442695, %v3098_v8 }
 0x681   : > { %v4567_v14 = vpop.eup %4566  ;;  %v3283_v15 = vmin.f32 %v3251_v11, 1.0  ;;  %v3192_v16 = vadd.f32 1.0, %v4565_v13  ;;  %v2963_v40 = vadd.f32 %v2962_v29, %v2914_v12  ;;  %v3014_v10 = vpop.f32.mrf.mxu0 }
 0x682   : > { %v3063_v19 = vpop.f32.mrf.mxu1  ;;  %v3254_v27 = vmax.f32 %v4567_v14, 0.0  ;;  %4572 = vpow2.f32 %v3145_v41  ;;  %v3015_v20 = vadd.f32 %v3014_v10, %v6137_v49 }
 0x683   : > { %3315 = vst [vmem:[%s6151_s6 + $0x40] sm:$0xff] %v3283_v15  ;;  %4574 = vrcp.f32 %v3192_v16  ;;  %v3097_v21 = vsub.f32 0.0, %v2963_v40 }
 0x684   : > { %v3286_v5 = vmin.f32 %v3254_v27, 1.0  ;;  %v3064_v22 = vadd.f32 %v3063_v19, %v3015_v20 }
 0x685   : > { %v4569_v23 = vpop.eup %4568  ;;  %v3143_v24 = vmul.f32 1.442695, %v3097_v21 }
 0x686   : > { %v4571_v56 = vpop.eup %4570  ;;  %3318 = vst [vmem:[%s6151_s6 + $0x58] sm:$0xff] %v3286_v5  ;;  %v3191_v25 = vadd.f32 1.0, %v4569_v23  ;;  %v3100_v26 = vsub.f32 0.0, %v3064_v22  ;;  %v2916_v28 = vpop.f32.mrf.mxu2 }
 0x687   : > { %v2965_v30 = vpop.f32.mrf.mxu3  ;;  %v3253_v3 = vmax.f32 %v4571_v56, 0.0  ;;  %4576 = vpow2.f32 %v3143_v24  ;;  %v2917_v31 = vadd.f32 %v2916_v28, %v6140_v51 }
 0x688   : > { %v4573_v32 = vpop.eup %4572  ;;  %4578 = vrcp.f32 %v3191_v25  ;;  %v3149_v6 = vmul.f32 1.442695, %v3100_v26 }
 0x689   : > { %v4575_v33 = vpop.eup %4574  ;;  %v3285_v34 = vmin.f32 %v3253_v3, 1.0  ;;  %v3194_v35 = vadd.f32 1.0, %v4573_v32  ;;  %v2966_v37 = vadd.f32 %v2965_v30, %v2917_v31  ;;  %v3016_v63 = vpop.f32.mrf.mxu0 }
 0x68a   : > { %v3065_v57 = vpop.f32.mrf.mxu1  ;;  %v3256_v38 = vmax.f32 %v4575_v33, 0.0  ;;  %4580 = vpow2.f32 %v3149_v6  ;;  %v3017_v39 = vadd.f32 %v3016_v63, %v6137_v49 }
 0x68b   : > { %3317 = vst [vmem:[%s6151_s6 + $0x50] sm:$0xff] %v3285_v34  ;;  %4582 = vrcp.f32 %v3194_v35  ;;  %v3099_v43 = vsub.f32 0.0, %v2966_v37 }
 0x68c   : > { %v3288_v44 = vmin.f32 %v3256_v38, 1.0  ;;  %v3066_v0 = vadd.f32 %v3065_v57, %v3017_v39 }
 0x68d   : > { %v4577_v4 = vpop.eup %4576  ;;  %v3147_v36 = vmul.f32 1.442695, %v3099_v43 }
 0x68e   : > { %v4579_v46 = vpop.eup %4578  ;;  %3320 = vst [vmem:[%s6151_s6 + $0x68] sm:$0xff] %v3288_v44  ;;  %v3193_v47 = vadd.f32 1.0, %v4577_v4  ;;  %v3102_v48 = vsub.f32 0.0, %v3066_v0  ;;  %v2918_v45 = vpop.f32.mrf.mxu2 }
 0x68f   : > { %v2967_v50 = vpop.f32.mrf.mxu3  ;;  %v3255_v62 = vmax.f32 %v4579_v46, 0.0  ;;  %4584 = vpow2.f32 %v3147_v36  ;;  %v2919_v1 = vadd.f32 %v2918_v45, %v6140_v51 }
 0x690   : > { %v4581_v52 = vpop.eup %4580  ;;  %4586 = vrcp.f32 %v3193_v47  ;;  %v3153_v53 = vmul.f32 1.442695, %v3102_v48 }
 0x691   : > { %v4583_v17 = vpop.eup %4582  ;;  %v3287_v55 = vmin.f32 %v3255_v62, 1.0  ;;  %v3196_v58 = vadd.f32 1.0, %v4581_v52  ;;  %v2968_v18 = vadd.f32 %v2967_v50, %v2919_v1  ;;  %v3019_v59 = vpop.f32.mrf.mxu0 }
 0x692   : > { %v3068_v54 = vpop.f32.mrf.mxu1  ;;  %v3258_v60 = vmax.f32 %v4583_v17, 0.0  ;;  %4588 = vpow2.f32 %v3153_v53  ;;  %v3020_v61 = vadd.f32 %v3019_v59, %v6137_v49 }
 0x693   : > { %3319 = vst [vmem:[%s6151_s6 + $0x60] sm:$0xff] %v3287_v55  ;;  %4590 = vrcp.f32 %v3196_v58  ;;  %v3101_v2 = vsub.f32 0.0, %v2968_v18 }
 0x694   : > { %v3290_v7 = vmin.f32 %v3258_v60, 1.0  ;;  %v3069_v42 = vadd.f32 %v3068_v54, %v3020_v61 }
 0x695   : > { %v4585_v8 = vpop.eup %4584  ;;  %v3151_v9 = vmul.f32 1.442695, %v3101_v2 }
 0x696   : > { %v4587_v29 = vpop.eup %4586  ;;  %3322 = vst [vmem:[%s6151_s6 + $0x78] sm:$0xff] %v3290_v7  ;;  %v3195_v11 = vadd.f32 1.0, %v4585_v8  ;;  %v3104_v12 = vsub.f32 0.0, %v3069_v42  ;;  %v2921_v13 = vpop.f32.mrf.mxu2 }
 0x697   : > { %v2970_v41 = vpop.f32.mrf.mxu3  ;;  %v3257_v14 = vmax.f32 %v4587_v29, 0.0  ;;  %4592 = vpow2.f32 %v3151_v9  ;;  %v2922_v15 = vadd.f32 %v2921_v13, %v6140_v51 }
 0x698   : > { %v4589_v16 = vpop.eup %4588  ;;  %4594 = vrcp.f32 %v3195_v11  ;;  %v3157_v40 = vmul.f32 1.442695, %v3104_v12 }
 0x699   : > { %v4591_v10 = vpop.eup %4590  ;;  %v3289_v19 = vmin.f32 %v3257_v14, 1.0  ;;  %v3198_v27 = vadd.f32 1.0, %v4589_v16  ;;  %v2971_v20 = vadd.f32 %v2970_v41, %v2922_v15  ;;  %v3021_v21 = vpop.f32.mrf.mxu0 }
 0x69a   : > { %v3070_v5 = vpop.f32.mrf.mxu1  ;;  %v3260_v22 = vmax.f32 %v4591_v10, 0.0  ;;  %4596 = vpow2.f32 %v3157_v40  ;;  %v3022_v23 = vadd.f32 %v3021_v21, %v6137_v49 }
 0x69b   : > { %3321 = vst [vmem:[%s6151_s6 + $0x70] sm:$0xff] %v3289_v19  ;;  %4598 = vrcp.f32 %v3198_v27  ;;  %v3103_v24 = vsub.f32 0.0, %v2971_v20 }
 0x69c   : > { %v3292_v56 = vmin.f32 %v3260_v22, 1.0  ;;  %v3071_v25 = vadd.f32 %v3070_v5, %v3022_v23 }
 0x69d   : > { %v4593_v26 = vpop.eup %4592  ;;  %v3155_v28 = vmul.f32 1.442695, %v3103_v24 }
 0x69e   : > { %v4595_v30 = vpop.eup %4594  ;;  %3324 = vst [vmem:[%s6151_s6 + $0x88] sm:$0xff] %v3292_v56  ;;  %v3197_v3 = vadd.f32 1.0, %v4593_v26  ;;  %v3106_v31 = vsub.f32 0.0, %v3071_v25  ;;  %v2923_v32 = vpop.f32.mrf.mxu2 }
 0x69f   : > { %v2972_v6 = vpop.f32.mrf.mxu3  ;;  %v3259_v33 = vmax.f32 %v4595_v30, 0.0  ;;  %4600 = vpow2.f32 %v3155_v28  ;;  %v2924_v34 = vadd.f32 %v2923_v32, %v6140_v51 }
 0x6a0   : > { %v4597_v35 = vpop.eup %4596  ;;  %4602 = vrcp.f32 %v3197_v3  ;;  %v3161_v37 = vmul.f32 1.442695, %v3106_v31 }
 0x6a1   : > { %v4599_v63 = vpop.eup %4598  ;;  %v3291_v57 = vmin.f32 %v3259_v33, 1.0  ;;  %v3200_v38 = vadd.f32 1.0, %v4597_v35  ;;  %v2973_v39 = vadd.f32 %v2972_v6, %v2924_v34  ;;  %v3024_v43 = vpop.f32.mrf.mxu0 }
 0x6a2   : > { %v3073_v44 = vpop.f32.mrf.mxu1  ;;  %v3262_v0 = vmax.f32 %v4599_v63, 0.0  ;;  %4604 = vpow2.f32 %v3161_v37  ;;  %v3025_v4 = vadd.f32 %v3024_v43, %v6137_v49 }
 0x6a3   : > { %3323 = vst [vmem:[%s6151_s6 + $0x80] sm:$0xff] %v3291_v57  ;;  %4606 = vrcp.f32 %v3200_v38  ;;  %v3105_v36 = vsub.f32 0.0, %v2973_v39 }
 0x6a4   : > { %v3294_v46 = vmin.f32 %v3262_v0, 1.0  ;;  %v3074_v47 = vadd.f32 %v3073_v44, %v3025_v4 }
 0x6a5   : > { %v4601_v48 = vpop.eup %4600  ;;  %v3159_v45 = vmul.f32 1.442695, %v3105_v36 }
 0x6a6   : > { %v4603_v50 = vpop.eup %4602  ;;  %3326 = vst [vmem:[%s6151_s6 + $0x98] sm:$0xff] %v3294_v46  ;;  %v3199_v62 = vadd.f32 1.0, %v4601_v48  ;;  %v3108_v1 = vsub.f32 0.0, %v3074_v47  ;;  %v2926_v52 = vpop.f32.mrf.mxu2 }
 0x6a7   : > { %v2975_v53 = vpop.f32.mrf.mxu3  ;;  %v3261_v17 = vmax.f32 %v4603_v50, 0.0  ;;  %4608 = vpow2.f32 %v3159_v45  ;;  %v2927_v55 = vadd.f32 %v2926_v52, %v6140_v51 }
 0x6a8   : > { %v4605_v58 = vpop.eup %4604  ;;  %4610 = vrcp.f32 %v3199_v62  ;;  %v3165_v18 = vmul.f32 1.442695, %v3108_v1 }
 0x6a9   : > { %v4607_v59 = vpop.eup %4606  ;;  %v3293_v54 = vmin.f32 %v3261_v17, 1.0  ;;  %v3202_v60 = vadd.f32 1.0, %v4605_v58  ;;  %v2976_v61 = vadd.f32 %v2975_v53, %v2927_v55  ;;  %v3026_v2 = vpop.f32.mrf.mxu0 }
 0x6aa   : > { %v3075_v7 = vpop.f32.mrf.mxu1  ;;  %v3264_v42 = vmax.f32 %v4607_v59, 0.0  ;;  %4612 = vpow2.f32 %v3165_v18  ;;  %v3027_v8 = vadd.f32 %v3026_v2, %v6137_v49 }
 0x6ab   : > { %3325 = vst [vmem:[%s6151_s6 + $0x90] sm:$0xff] %v3293_v54  ;;  %4614 = vrcp.f32 %v3202_v60  ;;  %v3107_v9 = vsub.f32 0.0, %v2976_v61 }
 0x6ac   : > { %v3296_v29 = vmin.f32 %v3264_v42, 1.0  ;;  %v3076_v11 = vadd.f32 %v3075_v7, %v3027_v8 }
 0x6ad   : > { %v4609_v12 = vpop.eup %4608  ;;  %v3163_v13 = vmul.f32 1.442695, %v3107_v9 }
 0x6ae   : > { %v4611_v41 = vpop.eup %4610  ;;  %3328 = vst [vmem:[%s6151_s6 + $0xa8] sm:$0xff] %v3296_v29  ;;  %v3201_v14 = vadd.f32 1.0, %v4609_v12  ;;  %v3110_v15 = vsub.f32 0.0, %v3076_v11  ;;  %v2928_v16 = vpop.f32.mrf.mxu2 }
 0x6af   : > { %v2977_v40 = vpop.f32.mrf.mxu3  ;;  %v3263_v10 = vmax.f32 %v4611_v41, 0.0  ;;  %4616 = vpow2.f32 %v3163_v13  ;;  %v2929_v19 = vadd.f32 %v2928_v16, %v6140_v51 }
 0x6b0   : > { %v4613_v27 = vpop.eup %4612  ;;  %4618 = vrcp.f32 %v3201_v14  ;;  %v3169_v20 = vmul.f32 1.442695, %v3110_v15 }
 0x6b1   : > { %v4615_v21 = vpop.eup %4614  ;;  %v3295_v5 = vmin.f32 %v3263_v10, 1.0  ;;  %v3204_v22 = vadd.f32 1.0, %v4613_v27  ;;  %v2978_v23 = vadd.f32 %v2977_v40, %v2929_v19  ;;  %v3029_v24 = vpop.f32.mrf.mxu0 }
 0x6b2   : > { %v3078_v56 = vpop.f32.mrf.mxu1  ;;  %v3266_v25 = vmax.f32 %v4615_v21, 0.0  ;;  %4620 = vpow2.f32 %v3169_v20  ;;  %v3030_v26 = vadd.f32 %v3029_v24, %v6137_v49 }
 0x6b3   : > { %3327 = vst [vmem:[%s6151_s6 + $0xa0] sm:$0xff] %v3295_v5  ;;  %4622 = vrcp.f32 %v3204_v22  ;;  %v3109_v28 = vsub.f32 0.0, %v2978_v23 }
 0x6b4   : > { %v3298_v30 = vmin.f32 %v3266_v25, 1.0  ;;  %v3079_v3 = vadd.f32 %v3078_v56, %v3030_v26 }
 0x6b5   : > { %v4617_v31 = vpop.eup %4616  ;;  %v3167_v32 = vmul.f32 1.442695, %v3109_v28 }
 0x6b6   : > { %v4619_v6 = vpop.eup %4618  ;;  %3330 = vst [vmem:[%s6151_s6 + $0xb8] sm:$0xff] %v3298_v30  ;;  %v3203_v33 = vadd.f32 1.0, %v4617_v31  ;;  %v3112_v34 = vsub.f32 0.0, %v3079_v3  ;;  %v2931_v35 = vpop.f32.mrf.mxu2 }
 0x6b7   : > { %v2980_v37 = vpop.f32.mrf.mxu3  ;;  %v3265_v63 = vmax.f32 %v4619_v6, 0.0  ;;  %4624 = vpow2.f32 %v3167_v32  ;;  %v2932_v57 = vadd.f32 %v2931_v35, %v6140_v51 }
 0x6b8   : > { %v4621_v38 = vpop.eup %4620  ;;  %4626 = vrcp.f32 %v3203_v33  ;;  %v3173_v39 = vmul.f32 1.442695, %v3112_v34 }
 0x6b9   : > { %v4623_v43 = vpop.eup %4622  ;;  %v3297_v44 = vmin.f32 %v3265_v63, 1.0  ;;  %v3206_v0 = vadd.f32 1.0, %v4621_v38  ;;  %v2981_v4 = vadd.f32 %v2980_v37, %v2932_v57  ;;  %v3031_v36 = vpop.f32.mrf.mxu0 }
 0x6ba   : > { %v3268_v46 = vmax.f32 %v4623_v43, 0.0  ;;  %4628 = vpow2.f32 %v3173_v39  ;;  %v3032_v47 = vadd.f32 %v3031_v36, %v6137_v49  ;;  %v3080_v45 = vpop.f32.mrf.mxu1 }
 0x6bb   : > { %3329 = vst [vmem:[%s6151_s6 + $0xb0] sm:$0xff] %v3297_v44  ;;  %4630 = vrcp.f32 %v3206_v0  ;;  %v3111_v48 = vsub.f32 0.0, %v2981_v4 }
 0x6bc   : > { %v3300_v50 = vmin.f32 %v3268_v46, 1.0  ;;  %v3081_v62 = vadd.f32 %v3080_v45, %v3032_v47 }
 0x6bd   : > { %v4625_v1 = vpop.eup %4624  ;;  %v3171_v52 = vmul.f32 1.442695, %v3111_v48 }
 0x6be   : > { %v4627_v53 = vpop.eup %4626  ;;  %3332 = vst [vmem:[%s6151_s6 + $0xc8] sm:$0xff] %v3300_v50  ;;  %v3205_v17 = vadd.f32 1.0, %v4625_v1  ;;  %v3114_v55 = vsub.f32 0.0, %v3081_v62  ;;  %v2933_v58 = vpop.f32.mrf.mxu2 }
 0x6bf   : > { %v3267_v18 = vmax.f32 %v4627_v53, 0.0  ;;  %4632 = vpow2.f32 %v3171_v52  ;;  %v2934_v59 = vadd.f32 %v2933_v58, %v6140_v51  ;;  %v2982_v60 = vpop.f32.mrf.mxu3 }
 0x6c0   : > { %v4629_v54 = vpop.eup %4628  ;;  %4634 = vrcp.f32 %v3205_v17  ;;  %v3177_v49 = vmul.f32 1.442695, %v3114_v55 }
 0x6c1   : > { %v4631_v61 = vpop.eup %4630  ;;  %v3299_v2 = vmin.f32 %v3267_v18, 1.0  ;;  %v3208_v7 = vadd.f32 1.0, %v4629_v54  ;;  %v2983_v42 = vadd.f32 %v2982_v60, %v2934_v59 }
 0x6c2   : > { %v3270_v8 = vmax.f32 %v4631_v61, 0.0  ;;  %4636 = vpow2.f32 %v3177_v49 }
 0x6c3   : > { %3331 = vst [vmem:[%s6151_s6 + $0xc0] sm:$0xff] %v3299_v2  ;;  %4638 = vrcp.f32 %v3208_v7  ;;  %v3113_v9 = vsub.f32 0.0, %v2983_v42 }
 0x6c4   : > { %v3302_v29 = vmin.f32 %v3270_v8, 1.0 }
 0x6c5   : > { %v4633_v11 = vpop.eup %4632  ;;  %v3175_v12 = vmul.f32 1.442695, %v3113_v9 }
 0x6c6   : > { %v4635_v13 = vpop.eup %4634  ;;  %3334 = vst [vmem:[%s6151_s6 + $0xd8] sm:$0xff] %v3302_v29  ;;  %v3207_v51 = vadd.f32 1.0, %v4633_v11 }
 0x6c7   : > { %v3269_v41 = vmax.f32 %v4635_v13, 0.0  ;;  %4640 = vpow2.f32 %v3175_v12 }
 0x6c8   : > { %v4637_v14 = vpop.eup %4636  ;;  %4642 = vrcp.f32 %v3207_v51 }
 0x6c9   : > { %v4639_v15 = vpop.eup %4638  ;;  %v3301_v16 = vmin.f32 %v3269_v41, 1.0  ;;  %v3210_v40 = vadd.f32 1.0, %v4637_v14 }
 0x6ca   : > { %v3272_v10 = vmax.f32 %v4639_v15, 0.0 }
 0x6cb   : > { %3333 = vst [vmem:[%s6151_s6 + $0xd0] sm:$0xff] %v3301_v16  ;;  %4644 = vrcp.f32 %v3210_v40 }
 0x6cc   : > { %v3304_v19 = vmin.f32 %v3272_v10, 1.0 }
 0x6cd   : > { %v4641_v27 = vpop.eup %4640 }
 0x6ce   : > { %v4643_v20 = vpop.eup %4642  ;;  %3336 = vst [vmem:[%s6151_s6 + $0xe8] sm:$0xff] %v3304_v19  ;;  %v3209_v21 = vadd.f32 1.0, %v4641_v27 }
 0x6cf   : > { %v3271_v5 = vmax.f32 %v4643_v20, 0.0 }
 0x6d0   : > { %4646 = vrcp.f32 %v3209_v21 }
 0x6d1   : > { %v4645_v22 = vpop.eup %4644  ;;  %v3303_v23 = vmin.f32 %v3271_v5, 1.0 }
 0x6d2   : > { %v3274_v24 = vmax.f32 %v4645_v22, 0.0 }
 0x6d3   : > { %3335 = vst [vmem:[%s6151_s6 + $0xe0] sm:$0xff] %v3303_v23 }
 0x6d4   : > { %v3306_v56 = vmin.f32 %v3274_v24, 1.0 }
 0x6d6   : > { %v4647_v25 = vpop.eup %4646  ;;  %3338 = vst [vmem:[%s6151_s6 + $0xf8] sm:$0xff] %v3306_v56 }
 0x6d7   : > { %v3273_v26 = vmax.f32 %v4647_v25, 0.0 }
 0x6d9   : > { %v3305_v28 = vmin.f32 %v3273_v26, 1.0 }
 0x6db   : > { %3337 = vst [vmem:[%s6151_s6 + $0xf0] sm:$0xff] %v3305_v28 }
 0x6dc   : > { %4975 = shalt.err (!%p4972_p8)
}
 0x6dd   : > { %s5048_s2 = smov 256   ;;  %s5049_s23 = smov 16  }
 0x6de   : > { %4409 = dma.vmem_to_hbm [thread:$0]  (%p5198_p5), %s3354_s1, 4096, %s3356_s26, %s3340_s3, %s5048_s2, %s5048_s2, %s5049_s23  }
 0x6df PF: > { %s6313_s6 = sld [smem:[#allocation30_spill]] }
 0x6e0   : > { %s6314_s27 = sld [smem:[#allocation27_spill]] }
 0x6e5   : > { %p4466_p9 = scmp.ge.s32.totalorder %s6313_s6, 2 }
 0x6e6   : > { %s3370_s21 = sand.u32 1, %s6314_s27  }
 0x6e7   : > { %p4443_p10 = pnand %p4466_p9, %p5202_p6  ;;  %s3371_s25 = scalar_lea.sflag [#allocation4], %s3370_s21 }
 0x6e9   : > { %p4444_p11 = pneg %p4443_p10 }
 0x6eb   : > { %5017 = dma.done.wait (%p4444_p11), %s3371_s25, 4096  }
 0x6ec   : > { %5019 = vsyncadd (%p4444_p11), %s3371_s25, 4294963200  ;;  %s6316_s27 = sld [smem:[#allocation31_spill]] }
 0x6ed   : > { %s6317_s2 = sld [smem:[#allocation28_spill]] }
 0x6ee   : > { %s6318_s25 = sld [smem:[#allocation29_spill]] }
 0x6ef   : > { %s6319_s26 = sld [smem:[#allocation32_spill]] }
 0x6f2   : > { %p37_p12 = scmp.ge.s32.totalorder %s6316_s27, 4  }
 0x6f4   :  { %39 = sbr.rel (!%p37_p12) target bundleno = 20 (0x14), region = 180 }
 0x6f9   :  { %3377 = vsyncpa [#allocation3], 1 }
 0x6fa   :  { %3379 = vsyncpa [#allocation3 + $0x1], 1 }
 0x6fb   :  { %3380 = vsyncpa [#allocation6], 1 }
 0x6fc   :  { %3381 = vsyncpa [#allocation9], 1 }
 0x6fd   :  { %3382 = vsyncpa [#allocation12], 1 }
 0x6fe   :  { %3383 = vsyncpa [#allocation15], 1 }
 0x6ff   :  { %3384 = vsyncpa [#allocation18], 1 }
 0x700   :  { %3385 = vsyncpa [#allocation4], 1 }
 0x701   :  { %3387 = vsyncpa [#allocation4 + $0x1], 1 }

</bundles_post_ra>
